<compile_context>
chip_gen: v6e
topology: v6e:2x2x1
jax: 0.10.0
libtpu: 0.0.40
codegen_flags: <defaults>
</compile_context>

<pallas_src>
import jax
import jax.numpy as jnp
from jax import lax
from jax.experimental import pallas as pl
from jax.experimental.pallas import tpu as pltpu

NUM_HEADS = 4
LN_EPS = 1e-5
L2_EPS = 1e-12


def _fusion_kernel(xt_ref, xn_ref, wqkv_ref, bqkv_ref, wo_ref, bo_ref,
                   w1_ref, b1_ref, gamma_ref, beta_ref, w2_ref, b2_ref,
                   out_ref):
    TB, St, D = xt_ref.shape
    Sn = xn_ref.shape[1]
    S = St + Sn
    dh = D // NUM_HEADS

    # ---- join text / num along the sequence (sublane) axis in VMEM (bf16) ----
    x = jnp.concatenate([xt_ref[...], xn_ref[...]], axis=1)          # (TB, S, D) bf16
    x2 = x.reshape(TB * S, D)                                        # fold batch into M

    # ---- MultiheadAttention in-projection (one big matmul) ----
    # 1/sqrt(dh) scale is pre-folded into the Q columns of wqkv / bqkv.
    qkv_f32 = jnp.dot(x2, wqkv_ref[...],
                      preferred_element_type=jnp.float32) + bqkv_ref[...]   # (TB*S, 3D) f32
    qkv = qkv_f32.astype(jnp.bfloat16)                               # single cast

    # ---- 4-head attention; collect head outputs, one out-projection matmul ----
    o_heads = []
    for h in range(NUM_HEADS):
        lo = h * dh
        q_h = qkv[:, 0 * D + lo:0 * D + lo + dh].reshape(TB, S, dh)  # bf16
        k_h = qkv[:, 1 * D + lo:1 * D + lo + dh].reshape(TB, S, dh)
        v_h = qkv[:, 2 * D + lo:2 * D + lo + dh].reshape(TB, S, dh)

        s = jnp.einsum('bqd,bkd->bqk', q_h, k_h,
                       preferred_element_type=jnp.float32)            # (TB, S, S) f32
        s = s - jnp.max(s, axis=-1, keepdims=True)
        p = jnp.exp(s)
        p = p * pl.reciprocal(jnp.sum(p, axis=-1, keepdims=True), approx=True)

        o_h = jnp.einsum('bqk,bkd->bqd', p.astype(jnp.bfloat16), v_h,
                         preferred_element_type=jnp.float32)           # (TB, S, dh) f32
        o_heads.append(o_h.astype(jnp.bfloat16))

    o_all = jnp.concatenate(o_heads, axis=-1).reshape(TB * S, D)       # (TB*S, D) bf16
    attn = jnp.dot(o_all, wo_ref[...],
                   preferred_element_type=jnp.float32)                 # (TB*S, D) f32

    # ---- mean over sequence, then out-proj bias (linear => identical) ----
    avg = jnp.mean(attn.reshape(TB, S, D), axis=1) + bo_ref[...]       # (TB, D)

    # ---- fusion_projection: Linear -> LayerNorm -> ReLU -> (Dropout=id) -> Linear ----
    h1 = jnp.dot(avg.astype(jnp.bfloat16), w1_ref[...],
                 preferred_element_type=jnp.float32) + b1_ref[...]     # (TB, H)
    mu = jnp.mean(h1, axis=-1, keepdims=True)
    var = jnp.mean((h1 - mu) ** 2, axis=-1, keepdims=True)
    h1n = (h1 - mu) * lax.rsqrt(var + LN_EPS)
    h1n = h1n * gamma_ref[...] + beta_ref[...]
    h1n = jnp.maximum(h1n, 0.0)                                        # ReLU
    h2 = jnp.dot(h1n.astype(jnp.bfloat16), w2_ref[...],
                 preferred_element_type=jnp.float32) + b2_ref[...]     # (TB, F)

    # ---- L2 normalize (F.normalize, p=2, dim=1, eps=1e-12) ----
    inv = lax.rsqrt(jnp.maximum(jnp.sum(h2 * h2, axis=-1, keepdims=True),
                                jnp.float32(L2_EPS * L2_EPS)))
    out_ref[...] = (h2 * inv).astype(out_ref.dtype)


def prepare_params(params):
    """One-time layout/dtype prep: pre-transposed bf16 matmul weights, f32 biases.

    The 1/sqrt(d_head) attention score scale is folded into the Q part of the
    in-projection weight and bias, so the kernel never multiplies the scores.
    """
    D = params["out_proj_weight"].shape[0]
    dh = D // NUM_HEADS
    scale = jnp.float32(1.0 / (dh ** 0.5))

    wqkv_t = params["in_proj_weight"].T.astype(jnp.float32)             # (D, 3D)
    bqkv = params["in_proj_bias"].astype(jnp.float32)                   # (3D,)
    q_scale = jnp.concatenate([jnp.full((D,), scale, jnp.float32),
                               jnp.ones((2 * D,), jnp.float32)])
    wqkv_t = wqkv_t * q_scale[None, :]
    bqkv = bqkv * q_scale

    return {
        "wqkv_t": wqkv_t.astype(jnp.bfloat16),                          # (D, 3D)
        "bqkv":   bqkv[None, :],                                        # (1, 3D) f32
        "wo_t":   params["out_proj_weight"].T.astype(jnp.bfloat16),     # (D, D)
        "bo":     params["out_proj_bias"][None, :].astype(jnp.float32), # (1, D)
        "w1_t":   params["w1"].T.astype(jnp.bfloat16),                  # (D, H)
        "b1":     params["b1"][None, :].astype(jnp.float32),            # (1, H)
        "gamma":  params["ln_gamma"][None, :].astype(jnp.float32),      # (1, H)
        "beta":   params["ln_beta"][None, :].astype(jnp.float32),       # (1, H)
        "w2_t":   params["w2"].T.astype(jnp.bfloat16),                  # (H, F)
        "b2":     params["b2"][None, :].astype(jnp.float32),            # (1, F)
    }


def vector_fusion_forward(text_vectors, num_vectors, prepared, *, block_b=64):
    """Pallas implementation of VectorFusionModule.forward (fusion_method='attention').

    block_b: max batch rows per grid step. The actual tile TB is a multiple of
    8 chosen so the grid has >= 2 steps whenever possible (keeps both v7x
    TensorCores busy) while TB*S stays large enough to fill the MXU M dim.
    """
    B, St, D = text_vectors.shape
    _, Sn, _ = num_vectors.shape
    F = prepared["w2_t"].shape[1]

    # TB: multiple of 8, <= block_b, targeting >= 2 grid steps.
    tb = min(block_b, max(8, -(-B // 2)))
    TB = -(-tb // 8) * 8
    B_pad = -(-B // TB) * TB

    xt = text_vectors.astype(jnp.bfloat16)      # halve input DMA bytes
    xn = num_vectors.astype(jnp.bfloat16)
    if B_pad != B:
        pad = [(0, B_pad - B), (0, 0), (0, 0)]
        xt = jnp.pad(xt, pad)
        xn = jnp.pad(xn, pad)

    def full2d(arr):
        return pl.BlockSpec(arr.shape, lambda b: (0, 0))

    weights = [prepared[k] for k in
               ("wqkv_t", "bqkv", "wo_t", "bo", "w1_t", "b1",
                "gamma", "beta", "w2_t", "b2")]

    out = pl.pallas_call(
        _fusion_kernel,
        out_shape=jax.ShapeDtypeStruct((B_pad, F), jnp.float32),
        grid_spec=pltpu.PrefetchScalarGridSpec(
            num_scalar_prefetch=0,
            grid=(B_pad // TB,),
            in_specs=[
                pl.BlockSpec((TB, St, D), lambda b: (b, 0, 0)),   # text rows
                pl.BlockSpec((TB, Sn, D), lambda b: (b, 0, 0)),   # num rows
            ] + [full2d(w) for w in weights],                     # resident weights
            out_specs=pl.BlockSpec((TB, F), lambda b: (b, 0)),    # lane-dense output
        ),
        compiler_params=pltpu.CompilerParams(
            dimension_semantics=("parallel",),
            vmem_limit_bytes=48 * 1024 * 1024),
    )(xt, xn, *weights)

    return out[:B]


def init_params(key, vector_dim, hidden_dim, fusion_dim):
    ks = jax.random.split(key, 8)
    s = 0.05
    return {
        "in_proj_weight": s * jax.random.normal(ks[0], (3 * vector_dim, vector_dim), jnp.float32),
        "in_proj_bias": s * jax.random.normal(ks[1], (3 * vector_dim,), jnp.float32),
        "out_proj_weight": s * jax.random.normal(ks[2], (vector_dim, vector_dim), jnp.float32),
        "out_proj_bias": s * jax.random.normal(ks[3], (vector_dim,), jnp.float32),
        "w1": s * jax.random.normal(ks[4], (hidden_dim, vector_dim), jnp.float32),
        "b1": s * jax.random.normal(ks[5], (hidden_dim,), jnp.float32),
        "ln_gamma": jnp.ones((hidden_dim,), jnp.float32),
        "ln_beta": jnp.zeros((hidden_dim,), jnp.float32),
        "w2": s * jax.random.normal(ks[6], (fusion_dim, hidden_dim), jnp.float32),
        "b2": s * jax.random.normal(ks[7], (fusion_dim,), jnp.float32),
    }


def _reference(text_vectors, num_vectors, params):
    """Pure-JAX f32 reference (eval-mode PyTorch semantics)."""
    x = jnp.concatenate([text_vectors, num_vectors], axis=1)        # (B, S, D)
    B, S, D = x.shape
    dh = D // NUM_HEADS
    qkv = x @ params["in_proj_weight"].T + params["in_proj_bias"]
    q, k, v = qkv[..., :D], qkv[..., D:2 * D], qkv[..., 2 * D:]
    q = q.reshape(B, S, NUM_HEADS, dh)
    k = k.reshape(B, S, NUM_HEADS, dh)
    v = v.reshape(B, S, NUM_HEADS, dh)
    s = jnp.einsum('bqhd,bkhd->bhqk', q, k) / jnp.sqrt(jnp.float32(dh))
    p = jax.nn.softmax(s, axis=-1)
    o = jnp.einsum('bhqk,bkhd->bqhd', p, v).reshape(B, S, D)
    o = o @ params["out_proj_weight"].T + params["out_proj_bias"]
    avg = o.mean(axis=1)
    h1 = avg @ params["w1"].T + params["b1"]
    mu = h1.mean(-1, keepdims=True)
    var = ((h1 - mu) ** 2).mean(-1, keepdims=True)
    h1 = (h1 - mu) / jnp.sqrt(var + LN_EPS) * params["ln_gamma"] + params["ln_beta"]
    h1 = jnp.maximum(h1, 0.0)
    h2 = h1 @ params["w2"].T + params["b2"]
    n = jnp.maximum(jnp.linalg.norm(h2, axis=-1, keepdims=True), L2_EPS)
    return h2 / n


if __name__ == "__main__":
    # Small, module-consistent shapes: vector_dim=128 (÷ 4 heads), hidden=256, fusion=128
    B, S_TEXT, S_NUM = 2, 8, 8
    VECTOR_DIM, HIDDEN_DIM, FUSION_DIM = 128, 256, 128

    key = jax.random.PRNGKey(0)
    k_params, k_text, k_num = jax.random.split(key, 3)
    params = init_params(k_params, VECTOR_DIM, HIDDEN_DIM, FUSION_DIM)
    prepared = prepare_params(params)

    text_vectors = jax.random.normal(k_text, (B, S_TEXT, VECTOR_DIM), jnp.float32)
    num_vectors = jax.random.normal(k_num, (B, S_NUM, VECTOR_DIM), jnp.float32)

    fused = vector_fusion_forward(text_vectors, num_vectors, prepared, block_b=64)
    jax.block_until_ready(fused)

    assert fused.shape == (B, FUSION_DIM)
    # each row should be (approximately) unit L2 norm
    norms = jnp.linalg.norm(fused, axis=1)
    assert bool(jnp.all(jnp.abs(norms - 1.0) < 2e-3))
    # match f32 reference within bf16-input / bf16-matmul tolerance
    ref = _reference(text_vectors, num_vectors, params)
    assert bool(jnp.max(jnp.abs(fused - ref)) < 4e-2)
    print("KERNEL_OK")
</pallas_src>

<mosaic_0001>
module attributes {stable_mosaic.version = 11 : i64} {
  func.func @_fusion_kernel(%arg0: i32, %arg1: memref<8x8x128xbf16, #tpu.memory_space<vmem>>, %arg2: memref<8x8x128xbf16, #tpu.memory_space<vmem>>, %arg3: memref<128x384xbf16, #tpu.memory_space<vmem>>, %arg4: memref<1x384xf32, #tpu.memory_space<vmem>>, %arg5: memref<128x128xbf16, #tpu.memory_space<vmem>>, %arg6: memref<1x128xf32, #tpu.memory_space<vmem>>, %arg7: memref<128x256xbf16, #tpu.memory_space<vmem>>, %arg8: memref<1x256xf32, #tpu.memory_space<vmem>>, %arg9: memref<1x256xf32, #tpu.memory_space<vmem>>, %arg10: memref<1x256xf32, #tpu.memory_space<vmem>>, %arg11: memref<256x128xbf16, #tpu.memory_space<vmem>>, %arg12: memref<1x128xf32, #tpu.memory_space<vmem>>, %arg13: memref<8x128xf32, #tpu.memory_space<vmem>>) attributes {dimension_semantics = [#tpu.dimension_semantics<parallel>], iteration_bounds = array<i64: 1>, scalar_prefetch = 0 : i64, scratch_operands = 0 : i64, tpu.core_type = #tpu.core_type<tc>, window_params = [{transform_indices = @transform_0, window_bounds = array<i64: 8, 8, 128>}, {transform_indices = @transform_1, window_bounds = array<i64: 8, 8, 128>}, {pipeline_mode = #tpu.pipeline_mode<synchronous>, transform_indices = @transform_2, window_bounds = array<i64: 128, 384>}, {pipeline_mode = #tpu.pipeline_mode<synchronous>, transform_indices = @transform_3, window_bounds = array<i64: 1, 384>}, {pipeline_mode = #tpu.pipeline_mode<synchronous>, transform_indices = @transform_4, window_bounds = array<i64: 128, 128>}, {pipeline_mode = #tpu.pipeline_mode<synchronous>, transform_indices = @transform_5, window_bounds = array<i64: 1, 128>}, {pipeline_mode = #tpu.pipeline_mode<synchronous>, transform_indices = @transform_6, window_bounds = array<i64: 128, 256>}, {pipeline_mode = #tpu.pipeline_mode<synchronous>, transform_indices = @transform_7, window_bounds = array<i64: 1, 256>}, {pipeline_mode = #tpu.pipeline_mode<synchronous>, transform_indices = @transform_8, window_bounds = array<i64: 1, 256>}, {pipeline_mode = #tpu.pipeline_mode<synchronous>, transform_indices = @transform_9, window_bounds = array<i64: 1, 256>}, {pipeline_mode = #tpu.pipeline_mode<synchronous>, transform_indices = @transform_10, window_bounds = array<i64: 256, 128>}, {pipeline_mode = #tpu.pipeline_mode<synchronous>, transform_indices = @transform_11, window_bounds = array<i64: 1, 128>}, {transform_indices = @transform_12, window_bounds = array<i64: 8, 128>}]} {
    %c0 = arith.constant 0 : index
    %c0_0 = arith.constant 0 : index
    %c0_1 = arith.constant 0 : index
    %0 = vector.load %arg1[%c0, %c0_0, %c0_1] : memref<8x8x128xbf16, #tpu.memory_space<vmem>>, vector<8x8x128xbf16>
    %c0_2 = arith.constant 0 : index
    %c0_3 = arith.constant 0 : index
    %c0_4 = arith.constant 0 : index
    %1 = vector.load %arg2[%c0_2, %c0_3, %c0_4] : memref<8x8x128xbf16, #tpu.memory_space<vmem>>, vector<8x8x128xbf16>
    %2 = tpu.concatenate %0, %1 in 1 : vector<8x8x128xbf16>, vector<8x8x128xbf16> -> vector<8x16x128xbf16>
    %3 = vector.shape_cast %2 : vector<8x16x128xbf16> to vector<128x128xbf16>
    %c0_5 = arith.constant 0 : index
    %c0_6 = arith.constant 0 : index
    %4 = vector.load %arg3[%c0_5, %c0_6] : memref<128x384xbf16, #tpu.memory_space<vmem>>, vector<128x384xbf16>
    %cst = arith.constant dense<0.000000e+00> : vector<128x384xf32>
    %5 = tpu.matmul %3, %4, %cst {dimension_numbers = #tpu.dot_dimension_numbers<[1], [0], [0], [1], [0, 0, 1, 1], [], []>} : vector<128x128xbf16>, vector<128x384xbf16>, vector<128x384xf32> -> vector<128x384xf32>
    %c0_7 = arith.constant 0 : index
    %c0_8 = arith.constant 0 : index
    %6 = vector.load %arg4[%c0_7, %c0_8] : memref<1x384xf32, #tpu.memory_space<vmem>>, vector<1x384xf32>
    %7 = vector.broadcast %6 : vector<1x384xf32> to vector<128x384xf32>
    %8 = arith.addf %5, %7 : vector<128x384xf32>
    %9 = arith.truncf %8 : vector<128x384xf32> to vector<128x384xbf16>
    %10 = vector.extract_strided_slice %9 {offsets = [0, 0], sizes = [128, 32], strides = [1, 1]} : vector<128x384xbf16> to vector<128x32xbf16>
    %11 = vector.shape_cast %10 : vector<128x32xbf16> to vector<8x16x32xbf16>
    %12 = vector.extract_strided_slice %9 {offsets = [0, 128], sizes = [128, 32], strides = [1, 1]} : vector<128x384xbf16> to vector<128x32xbf16>
    %13 = vector.shape_cast %12 : vector<128x32xbf16> to vector<8x16x32xbf16>
    %14 = vector.extract_strided_slice %9 {offsets = [0, 256], sizes = [128, 32], strides = [1, 1]} : vector<128x384xbf16> to vector<128x32xbf16>
    %15 = vector.shape_cast %14 : vector<128x32xbf16> to vector<8x16x32xbf16>
    "tpu.trace_start"() <{level = 10 : i32, message = "bqd,bkd->bqk"}> : () -> ()
    %cst_9 = arith.constant dense<0.000000e+00> : vector<8x16x16xf32>
    %16 = tpu.matmul %11, %13, %cst_9 {dimension_numbers = #tpu.dot_dimension_numbers<[2], [2], [1], [1], [0, 0, 0, 1, 1, 1], [0], [0]>} : vector<8x16x32xbf16>, vector<8x16x32xbf16>, vector<8x16x16xf32> -> vector<8x16x16xf32>
    "tpu.trace_stop"() : () -> ()
    %cst_10 = arith.constant dense<0xFF800000> : vector<8x16xf32>
    %17 = vector.multi_reduction <maximumf>, %16, %cst_10 [2] : vector<8x16x16xf32> to vector<8x16xf32>
    %18 = vector.shape_cast %17 : vector<8x16xf32> to vector<8x16x1xf32>
    %19 = vector.broadcast %18 : vector<8x16x1xf32> to vector<8x16x16xf32>
    %20 = arith.subf %16, %19 : vector<8x16x16xf32>
    %21 = math.exp %20 : vector<8x16x16xf32>
    %cst_11 = arith.constant dense<0.000000e+00> : vector<8x16xf32>
    %22 = vector.multi_reduction <add>, %21, %cst_11 [2] : vector<8x16x16xf32> to vector<8x16xf32>
    %23 = vector.shape_cast %22 : vector<8x16xf32> to vector<8x16x1xf32>
    %24 = tpu.reciprocal %23 {approx = true} : vector<8x16x1xf32> -> vector<8x16x1xf32>
    %25 = vector.broadcast %24 : vector<8x16x1xf32> to vector<8x16x16xf32>
    %26 = arith.mulf %21, %25 : vector<8x16x16xf32>
    %27 = arith.truncf %26 : vector<8x16x16xf32> to vector<8x16x16xbf16>
    "tpu.trace_start"() <{level = 10 : i32, message = "bqk,bkd->bqd"}> : () -> ()
    %cst_12 = arith.constant dense<0.000000e+00> : vector<8x16x32xf32>
    %28 = tpu.matmul %27, %15, %cst_12 {dimension_numbers = #tpu.dot_dimension_numbers<[2], [1], [1], [2], [0, 0, 0, 1, 1, 2], [0], [0]>} : vector<8x16x16xbf16>, vector<8x16x32xbf16>, vector<8x16x32xf32> -> vector<8x16x32xf32>
    "tpu.trace_stop"() : () -> ()
    %29 = arith.truncf %28 : vector<8x16x32xf32> to vector<8x16x32xbf16>
    %30 = vector.extract_strided_slice %9 {offsets = [0, 32], sizes = [128, 32], strides = [1, 1]} : vector<128x384xbf16> to vector<128x32xbf16>
    %31 = vector.shape_cast %30 : vector<128x32xbf16> to vector<8x16x32xbf16>
    %32 = vector.extract_strided_slice %9 {offsets = [0, 160], sizes = [128, 32], strides = [1, 1]} : vector<128x384xbf16> to vector<128x32xbf16>
    %33 = vector.shape_cast %32 : vector<128x32xbf16> to vector<8x16x32xbf16>
    %34 = vector.extract_strided_slice %9 {offsets = [0, 288], sizes = [128, 32], strides = [1, 1]} : vector<128x384xbf16> to vector<128x32xbf16>
    %35 = vector.shape_cast %34 : vector<128x32xbf16> to vector<8x16x32xbf16>
    "tpu.trace_start"() <{level = 10 : i32, message = "bqd,bkd->bqk"}> : () -> ()
    %cst_13 = arith.constant dense<0.000000e+00> : vector<8x16x16xf32>
    %36 = tpu.matmul %31, %33, %cst_13 {dimension_numbers = #tpu.dot_dimension_numbers<[2], [2], [1], [1], [0, 0, 0, 1, 1, 1], [0], [0]>} : vector<8x16x32xbf16>, vector<8x16x32xbf16>, vector<8x16x16xf32> -> vector<8x16x16xf32>
    "tpu.trace_stop"() : () -> ()
    %cst_14 = arith.constant dense<0xFF800000> : vector<8x16xf32>
    %37 = vector.multi_reduction <maximumf>, %36, %cst_14 [2] : vector<8x16x16xf32> to vector<8x16xf32>
    %38 = vector.shape_cast %37 : vector<8x16xf32> to vector<8x16x1xf32>
    %39 = vector.broadcast %38 : vector<8x16x1xf32> to vector<8x16x16xf32>
    %40 = arith.subf %36, %39 : vector<8x16x16xf32>
    %41 = math.exp %40 : vector<8x16x16xf32>
    %cst_15 = arith.constant dense<0.000000e+00> : vector<8x16xf32>
    %42 = vector.multi_reduction <add>, %41, %cst_15 [2] : vector<8x16x16xf32> to vector<8x16xf32>
    %43 = vector.shape_cast %42 : vector<8x16xf32> to vector<8x16x1xf32>
    %44 = tpu.reciprocal %43 {approx = true} : vector<8x16x1xf32> -> vector<8x16x1xf32>
    %45 = vector.broadcast %44 : vector<8x16x1xf32> to vector<8x16x16xf32>
    %46 = arith.mulf %41, %45 : vector<8x16x16xf32>
    %47 = arith.truncf %46 : vector<8x16x16xf32> to vector<8x16x16xbf16>
    "tpu.trace_start"() <{level = 10 : i32, message = "bqk,bkd->bqd"}> : () -> ()
    %cst_16 = arith.constant dense<0.000000e+00> : vector<8x16x32xf32>
    %48 = tpu.matmul %47, %35, %cst_16 {dimension_numbers = #tpu.dot_dimension_numbers<[2], [1], [1], [2], [0, 0, 0, 1, 1, 2], [0], [0]>} : vector<8x16x16xbf16>, vector<8x16x32xbf16>, vector<8x16x32xf32> -> vector<8x16x32xf32>
    "tpu.trace_stop"() : () -> ()
    %49 = arith.truncf %48 : vector<8x16x32xf32> to vector<8x16x32xbf16>
    %50 = vector.extract_strided_slice %9 {offsets = [0, 64], sizes = [128, 32], strides = [1, 1]} : vector<128x384xbf16> to vector<128x32xbf16>
    %51 = vector.shape_cast %50 : vector<128x32xbf16> to vector<8x16x32xbf16>
    %52 = vector.extract_strided_slice %9 {offsets = [0, 192], sizes = [128, 32], strides = [1, 1]} : vector<128x384xbf16> to vector<128x32xbf16>
    %53 = vector.shape_cast %52 : vector<128x32xbf16> to vector<8x16x32xbf16>
    %54 = vector.extract_strided_slice %9 {offsets = [0, 320], sizes = [128, 32], strides = [1, 1]} : vector<128x384xbf16> to vector<128x32xbf16>
    %55 = vector.shape_cast %54 : vector<128x32xbf16> to vector<8x16x32xbf16>
    "tpu.trace_start"() <{level = 10 : i32, message = "bqd,bkd->bqk"}> : () -> ()
    %cst_17 = arith.constant dense<0.000000e+00> : vector<8x16x16xf32>
    %56 = tpu.matmul %51, %53, %cst_17 {dimension_numbers = #tpu.dot_dimension_numbers<[2], [2], [1], [1], [0, 0, 0, 1, 1, 1], [0], [0]>} : vector<8x16x32xbf16>, vector<8x16x32xbf16>, vector<8x16x16xf32> -> vector<8x16x16xf32>
    "tpu.trace_stop"() : () -> ()
    %cst_18 = arith.constant dense<0xFF800000> : vector<8x16xf32>
    %57 = vector.multi_reduction <maximumf>, %56, %cst_18 [2] : vector<8x16x16xf32> to vector<8x16xf32>
    %58 = vector.shape_cast %57 : vector<8x16xf32> to vector<8x16x1xf32>
    %59 = vector.broadcast %58 : vector<8x16x1xf32> to vector<8x16x16xf32>
    %60 = arith.subf %56, %59 : vector<8x16x16xf32>
    %61 = math.exp %60 : vector<8x16x16xf32>
    %cst_19 = arith.constant dense<0.000000e+00> : vector<8x16xf32>
    %62 = vector.multi_reduction <add>, %61, %cst_19 [2] : vector<8x16x16xf32> to vector<8x16xf32>
    %63 = vector.shape_cast %62 : vector<8x16xf32> to vector<8x16x1xf32>
    %64 = tpu.reciprocal %63 {approx = true} : vector<8x16x1xf32> -> vector<8x16x1xf32>
    %65 = vector.broadcast %64 : vector<8x16x1xf32> to vector<8x16x16xf32>
    %66 = arith.mulf %61, %65 : vector<8x16x16xf32>
    %67 = arith.truncf %66 : vector<8x16x16xf32> to vector<8x16x16xbf16>
    "tpu.trace_start"() <{level = 10 : i32, message = "bqk,bkd->bqd"}> : () -> ()
    %cst_20 = arith.constant dense<0.000000e+00> : vector<8x16x32xf32>
    %68 = tpu.matmul %67, %55, %cst_20 {dimension_numbers = #tpu.dot_dimension_numbers<[2], [1], [1], [2], [0, 0, 0, 1, 1, 2], [0], [0]>} : vector<8x16x16xbf16>, vector<8x16x32xbf16>, vector<8x16x32xf32> -> vector<8x16x32xf32>
    "tpu.trace_stop"() : () -> ()
    %69 = arith.truncf %68 : vector<8x16x32xf32> to vector<8x16x32xbf16>
    %70 = vector.extract_strided_slice %9 {offsets = [0, 96], sizes = [128, 32], strides = [1, 1]} : vector<128x384xbf16> to vector<128x32xbf16>
    %71 = vector.shape_cast %70 : vector<128x32xbf16> to vector<8x16x32xbf16>
    %72 = vector.extract_strided_slice %9 {offsets = [0, 224], sizes = [128, 32], strides = [1, 1]} : vector<128x384xbf16> to vector<128x32xbf16>
    %73 = vector.shape_cast %72 : vector<128x32xbf16> to vector<8x16x32xbf16>
    %74 = vector.extract_strided_slice %9 {offsets = [0, 352], sizes = [128, 32], strides = [1, 1]} : vector<128x384xbf16> to vector<128x32xbf16>
    %75 = vector.shape_cast %74 : vector<128x32xbf16> to vector<8x16x32xbf16>
    "tpu.trace_start"() <{level = 10 : i32, message = "bqd,bkd->bqk"}> : () -> ()
    %cst_21 = arith.constant dense<0.000000e+00> : vector<8x16x16xf32>
    %76 = tpu.matmul %71, %73, %cst_21 {dimension_numbers = #tpu.dot_dimension_numbers<[2], [2], [1], [1], [0, 0, 0, 1, 1, 1], [0], [0]>} : vector<8x16x32xbf16>, vector<8x16x32xbf16>, vector<8x16x16xf32> -> vector<8x16x16xf32>
    "tpu.trace_stop"() : () -> ()
    %cst_22 = arith.constant dense<0xFF800000> : vector<8x16xf32>
    %77 = vector.multi_reduction <maximumf>, %76, %cst_22 [2] : vector<8x16x16xf32> to vector<8x16xf32>
    %78 = vector.shape_cast %77 : vector<8x16xf32> to vector<8x16x1xf32>
    %79 = vector.broadcast %78 : vector<8x16x1xf32> to vector<8x16x16xf32>
    %80 = arith.subf %76, %79 : vector<8x16x16xf32>
    %81 = math.exp %80 : vector<8x16x16xf32>
    %cst_23 = arith.constant dense<0.000000e+00> : vector<8x16xf32>
    %82 = vector.multi_reduction <add>, %81, %cst_23 [2] : vector<8x16x16xf32> to vector<8x16xf32>
    %83 = vector.shape_cast %82 : vector<8x16xf32> to vector<8x16x1xf32>
    %84 = tpu.reciprocal %83 {approx = true} : vector<8x16x1xf32> -> vector<8x16x1xf32>
    %85 = vector.broadcast %84 : vector<8x16x1xf32> to vector<8x16x16xf32>
    %86 = arith.mulf %81, %85 : vector<8x16x16xf32>
    %87 = arith.truncf %86 : vector<8x16x16xf32> to vector<8x16x16xbf16>
    "tpu.trace_start"() <{level = 10 : i32, message = "bqk,bkd->bqd"}> : () -> ()
    %cst_24 = arith.constant dense<0.000000e+00> : vector<8x16x32xf32>
    %88 = tpu.matmul %87, %75, %cst_24 {dimension_numbers = #tpu.dot_dimension_numbers<[2], [1], [1], [2], [0, 0, 0, 1, 1, 2], [0], [0]>} : vector<8x16x16xbf16>, vector<8x16x32xbf16>, vector<8x16x32xf32> -> vector<8x16x32xf32>
    "tpu.trace_stop"() : () -> ()
    %89 = arith.truncf %88 : vector<8x16x32xf32> to vector<8x16x32xbf16>
    %90 = tpu.concatenate %29, %49, %69, %89 in 2 : vector<8x16x32xbf16>, vector<8x16x32xbf16>, vector<8x16x32xbf16>, vector<8x16x32xbf16> -> vector<8x16x128xbf16>
    %91 = vector.shape_cast %90 : vector<8x16x128xbf16> to vector<128x128xbf16>
    %c0_25 = arith.constant 0 : index
    %c0_26 = arith.constant 0 : index
    %92 = vector.load %arg5[%c0_25, %c0_26] : memref<128x128xbf16, #tpu.memory_space<vmem>>, vector<128x128xbf16>
    %cst_27 = arith.constant dense<0.000000e+00> : vector<128x128xf32>
    %93 = tpu.matmul %91, %92, %cst_27 {dimension_numbers = #tpu.dot_dimension_numbers<[1], [0], [0], [1], [0, 0, 1, 1], [], []>} : vector<128x128xbf16>, vector<128x128xbf16>, vector<128x128xf32> -> vector<128x128xf32>
    %94 = vector.shape_cast %93 : vector<128x128xf32> to vector<8x16x128xf32>
    %cst_28 = arith.constant dense<0.000000e+00> : vector<8x128xf32>
    %95 = vector.multi_reduction <add>, %94, %cst_28 [1] : vector<8x16x128xf32> to vector<8x128xf32>
    %cst_29 = arith.constant 1.600000e+01 : f32
    %96 = vector.broadcast %cst_29 : f32 to vector<8x128xf32>
    %97 = arith.divf %95, %96 : vector<8x128xf32>
    %c0_30 = arith.constant 0 : index
    %c0_31 = arith.constant 0 : index
    %98 = vector.load %arg6[%c0_30, %c0_31] : memref<1x128xf32, #tpu.memory_space<vmem>>, vector<1x128xf32>
    %99 = vector.broadcast %98 : vector<1x128xf32> to vector<8x128xf32>
    %100 = arith.addf %97, %99 : vector<8x128xf32>
    %101 = arith.truncf %100 : vector<8x128xf32> to vector<8x128xbf16>
    %c0_32 = arith.constant 0 : index
    %c0_33 = arith.constant 0 : index
    %102 = vector.load %arg7[%c0_32, %c0_33] : memref<128x256xbf16, #tpu.memory_space<vmem>>, vector<128x256xbf16>
    %cst_34 = arith.constant dense<0.000000e+00> : vector<8x256xf32>
    %103 = tpu.matmul %101, %102, %cst_34 {dimension_numbers = #tpu.dot_dimension_numbers<[1], [0], [0], [1], [0, 0, 1, 1], [], []>} : vector<8x128xbf16>, vector<128x256xbf16>, vector<8x256xf32> -> vector<8x256xf32>
    %c0_35 = arith.constant 0 : index
    %c0_36 = arith.constant 0 : index
    %104 = vector.load %arg8[%c0_35, %c0_36] : memref<1x256xf32, #tpu.memory_space<vmem>>, vector<1x256xf32>
    %105 = vector.broadcast %104 : vector<1x256xf32> to vector<8x256xf32>
    %106 = arith.addf %103, %105 : vector<8x256xf32>
    %cst_37 = arith.constant dense<0.000000e+00> : vector<8xf32>
    %107 = vector.multi_reduction <add>, %106, %cst_37 [1] : vector<8x256xf32> to vector<8xf32>
    %108 = vector.shape_cast %107 : vector<8xf32> to vector<8x1xf32>
    %cst_38 = arith.constant 2.560000e+02 : f32
    %109 = vector.broadcast %cst_38 : f32 to vector<8x1xf32>
    %110 = arith.divf %108, %109 : vector<8x1xf32>
    %111 = vector.broadcast %110 : vector<8x1xf32> to vector<8x256xf32>
    %112 = arith.subf %106, %111 : vector<8x256xf32>
    %113 = arith.mulf %112, %112 : vector<8x256xf32>
    %cst_39 = arith.constant dense<0.000000e+00> : vector<8xf32>
    %114 = vector.multi_reduction <add>, %113, %cst_39 [1] : vector<8x256xf32> to vector<8xf32>
    %115 = vector.shape_cast %114 : vector<8xf32> to vector<8x1xf32>
    %cst_40 = arith.constant 2.560000e+02 : f32
    %116 = vector.broadcast %cst_40 : f32 to vector<8x1xf32>
    %117 = arith.divf %115, %116 : vector<8x1xf32>
    %118 = vector.broadcast %110 : vector<8x1xf32> to vector<8x256xf32>
    %119 = arith.subf %106, %118 : vector<8x256xf32>
    %cst_41 = arith.constant 9.99999974E-6 : f32
    %120 = vector.broadcast %cst_41 : f32 to vector<8x1xf32>
    %121 = arith.addf %117, %120 : vector<8x1xf32>
    %122 = math.rsqrt %121 : vector<8x1xf32>
    %123 = vector.broadcast %122 : vector<8x1xf32> to vector<8x256xf32>
    %124 = arith.mulf %119, %123 : vector<8x256xf32>
    %c0_42 = arith.constant 0 : index
    %c0_43 = arith.constant 0 : index
    %125 = vector.load %arg9[%c0_42, %c0_43] : memref<1x256xf32, #tpu.memory_space<vmem>>, vector<1x256xf32>
    %126 = vector.broadcast %125 : vector<1x256xf32> to vector<8x256xf32>
    %127 = arith.mulf %124, %126 : vector<8x256xf32>
    %c0_44 = arith.constant 0 : index
    %c0_45 = arith.constant 0 : index
    %128 = vector.load %arg10[%c0_44, %c0_45] : memref<1x256xf32, #tpu.memory_space<vmem>>, vector<1x256xf32>
    %129 = vector.broadcast %128 : vector<1x256xf32> to vector<8x256xf32>
    %130 = arith.addf %127, %129 : vector<8x256xf32>
    %cst_46 = arith.constant 0.000000e+00 : f32
    %131 = vector.broadcast %cst_46 : f32 to vector<8x256xf32>
    %132 = arith.maximumf %130, %131 : vector<8x256xf32>
    %133 = arith.truncf %132 : vector<8x256xf32> to vector<8x256xbf16>
    %c0_47 = arith.constant 0 : index
    %c0_48 = arith.constant 0 : index
    %134 = vector.load %arg11[%c0_47, %c0_48] : memref<256x128xbf16, #tpu.memory_space<vmem>>, vector<256x128xbf16>
    %cst_49 = arith.constant dense<0.000000e+00> : vector<8x128xf32>
    %135 = tpu.matmul %133, %134, %cst_49 {dimension_numbers = #tpu.dot_dimension_numbers<[1], [0], [0], [1], [0, 0, 1, 1], [], []>} : vector<8x256xbf16>, vector<256x128xbf16>, vector<8x128xf32> -> vector<8x128xf32>
    %c0_50 = arith.constant 0 : index
    %c0_51 = arith.constant 0 : index
    %136 = vector.load %arg12[%c0_50, %c0_51] : memref<1x128xf32, #tpu.memory_space<vmem>>, vector<1x128xf32>
    %137 = vector.broadcast %136 : vector<1x128xf32> to vector<8x128xf32>
    %138 = arith.addf %135, %137 : vector<8x128xf32>
    %139 = arith.mulf %138, %138 : vector<8x128xf32>
    %cst_52 = arith.constant dense<0.000000e+00> : vector<8xf32>
    %140 = vector.multi_reduction <add>, %139, %cst_52 [1] : vector<8x128xf32> to vector<8xf32>
    %141 = vector.shape_cast %140 : vector<8xf32> to vector<8x1xf32>
    %cst_53 = arith.constant 1.000000e-24 : f32
    %142 = vector.broadcast %cst_53 : f32 to vector<8x1xf32>
    %143 = arith.maximumf %141, %142 : vector<8x1xf32>
    %144 = math.rsqrt %143 : vector<8x1xf32>
    %145 = vector.broadcast %144 : vector<8x1xf32> to vector<8x128xf32>
    %146 = arith.mulf %138, %145 : vector<8x128xf32>
    %c0_54 = arith.constant 0 : index
    %c0_55 = arith.constant 0 : index
    %147 = vector.load %arg13[%c0_54, %c0_55] : memref<8x128xf32, #tpu.memory_space<vmem>>, vector<8x128xf32>
    tpu.vector_store %arg13[%c0_54, %c0_55], %146 {strides = array<i32>} : memref<8x128xf32, #tpu.memory_space<vmem>>, vector<8x128xf32>,
    return
  }
  func.func @transform_0(%arg0: i32) -> (i32, i32, i32) {
    %c0_i32 = arith.constant 0 : i32
    %c0_i32_0 = arith.constant 0 : i32
    %c0_i32_1 = arith.constant 0 : i32
    return %arg0, %c0_i32, %c0_i32_0 : i32, i32, i32
  }
  func.func @transform_1(%arg0: i32) -> (i32, i32, i32) {
    %c0_i32 = arith.constant 0 : i32
    %c0_i32_0 = arith.constant 0 : i32
    %c0_i32_1 = arith.constant 0 : i32
    return %arg0, %c0_i32, %c0_i32_0 : i32, i32, i32
  }
  func.func @transform_2(%arg0: i32) -> (i32, i32) {
    %c0_i32 = arith.constant 0 : i32
    %c0_i32_0 = arith.constant 0 : i32
    %c0_i32_1 = arith.constant 0 : i32
    return %c0_i32, %c0_i32_0 : i32, i32
  }
  func.func @transform_3(%arg0: i32) -> (i32, i32) {
    %c0_i32 = arith.constant 0 : i32
    %c0_i32_0 = arith.constant 0 : i32
    %c0_i32_1 = arith.constant 0 : i32
    return %c0_i32, %c0_i32_0 : i32, i32
  }
  func.func @transform_4(%arg0: i32) -> (i32, i32) {
    %c0_i32 = arith.constant 0 : i32
    %c0_i32_0 = arith.constant 0 : i32
    %c0_i32_1 = arith.constant 0 : i32
    return %c0_i32, %c0_i32_0 : i32, i32
  }
  func.func @transform_5(%arg0: i32) -> (i32, i32) {
    %c0_i32 = arith.constant 0 : i32
    %c0_i32_0 = arith.constant 0 : i32
    %c0_i32_1 = arith.constant 0 : i32
    return %c0_i32, %c0_i32_0 : i32, i32
  }
  func.func @transform_6(%arg0: i32) -> (i32, i32) {
    %c0_i32 = arith.constant 0 : i32
    %c0_i32_0 = arith.constant 0 : i32
    %c0_i32_1 = arith.constant 0 : i32
    return %c0_i32, %c0_i32_0 : i32, i32
  }
  func.func @transform_7(%arg0: i32) -> (i32, i32) {
    %c0_i32 = arith.constant 0 : i32
    %c0_i32_0 = arith.constant 0 : i32
    %c0_i32_1 = arith.constant 0 : i32
    return %c0_i32, %c0_i32_0 : i32, i32
  }
  func.func @transform_8(%arg0: i32) -> (i32, i32) {
    %c0_i32 = arith.constant 0 : i32
    %c0_i32_0 = arith.constant 0 : i32
    %c0_i32_1 = arith.constant 0 : i32
    return %c0_i32, %c0_i32_0 : i32, i32
  }
  func.func @transform_9(%arg0: i32) -> (i32, i32) {
    %c0_i32 = arith.constant 0 : i32
    %c0_i32_0 = arith.constant 0 : i32
    %c0_i32_1 = arith.constant 0 : i32
    return %c0_i32, %c0_i32_0 : i32, i32
  }
  func.func @transform_10(%arg0: i32) -> (i32, i32) {
    %c0_i32 = arith.constant 0 : i32
    %c0_i32_0 = arith.constant 0 : i32
    %c0_i32_1 = arith.constant 0 : i32
    return %c0_i32, %c0_i32_0 : i32, i32
  }
  func.func @transform_11(%arg0: i32) -> (i32, i32) {
    %c0_i32 = arith.constant 0 : i32
    %c0_i32_0 = arith.constant 0 : i32
    %c0_i32_1 = arith.constant 0 : i32
    return %c0_i32, %c0_i32_0 : i32, i32
  }
  func.func @transform_12(%arg0: i32) -> (i32, i32) {
    %c0_i32 = arith.constant 0 : i32
    %c0_i32_0 = arith.constant 0 : i32
    return %arg0, %c0_i32 : i32, i32
  }
}

</mosaic_0001>

<bundles_post_ra>
// kernel: tpu_custom_call.1
= control target key start
LH: loop header
LB: loop body
LE: loop exit
PB: predicated region body
PF: predicated region fallthrough
CT: control target
= control target key end

     0   :  { %17 = vsyncpa [#allocation3], 0  ;;  %s8288_s0 = inlined_call_operand.hbm [shape: bf16[8,8,128], index: 0, kind: input, shape index: {}]   ;;  %s8289_s1 = inlined_call_operand.hbm [shape: bf16[8,8,128], index: 1, kind: input, shape index: {}]   ;;  %s8290_s2 = inlined_call_operand.hbm [shape: bf16[128,384], index: 2, kind: input, shape index: {}]   ;;  %s8291_s3 = inlined_call_operand.vmem [shape: f32[1,384], index: 3, kind: input, shape index: {}]   ;;  %s8292_s4 = inlined_call_operand.hbm [shape: bf16[128,128], index: 4, kind: input, shape index: {}]   ;;  %s8293_s5 = inlined_call_operand.hbm [shape: f32[1,128], index: 5, kind: input, shape index: {}]   ;;  %s8294_s6 = inlined_call_operand.hbm [shape: bf16[128,256], index: 6, kind: input, shape index: {}]   ;;  %s8295_s7 = inlined_call_operand.vmem [shape: f32[1,256], index: 7, kind: input, shape index: {}]   ;;  %s8296_s8 = inlined_call_operand.vmem [shape: f32[1,256], index: 8, kind: input, shape index: {}]   ;;  %s8297_s9 = inlined_call_operand.vmem [shape: f32[1,256], index: 9, kind: input, shape index: {}]   ;;  %s8298_s10 = inlined_call_operand.hbm [shape: bf16[256,128], index: 10, kind: input, shape index: {}]   ;;  %s8299_s11 = inlined_call_operand.vmem [shape: f32[1,128], index: 11, kind: input, shape index: {}]   ;;  %s8300_s12 = inlined_call_operand.hbm [shape: f32[8,128], index: 12, kind: output, shape index: {}]  }
   0x1   :  { %18 = vsyncpa [#allocation6], 0 }
   0x2   :  { %19 = vsyncpa [#allocation9], 0 }
   0x3   :  { %20 = vsyncpa [#allocation12], 0 }
   0x4   :  { %21 = vsyncpa [#allocation4], 0  ;;  %s6623_s21 = smov [#allocation5]   ;;  %s6624_s23 = smov [#allocation8]  }
   0x5   :  { %s39_s22 = sshll.u32 %s6623_s21, 4  ;;  %s65_s24 = sshll.u32 %s6624_s23, 4  ;;  %s40_s22 = int_to_ptr.vmem [resolvable:$true] %s39_s22  ;;  %s66_s24 = int_to_ptr.vmem [resolvable:$true] %s65_s24 }
   0x6   :  { %s6461_s25 = scalar_lea.vmem %s40_s22, 512  ;;  %p6466_p1 = scmp.lt.s32.totalorder %s40_s22, %s40_s22 }
   0x7   :  { %p6462_p0 = scmp.ne.s32.totalorder %s40_s22, %s6461_s25  ;;  %p6467_p2 = scmp.lt.s32.totalorder %s6461_s25, %s6461_s25 }
   0x9   :  { %p6468_p3 = por %p6467_p2, %p6466_p1 }
   0xb   :  { %p6469_p4 = pnand %p6468_p3, %p6462_p0 }
   0xd   :  { %6472 = shalt.err (!%p6469_p4)
}
   0xe   :  { %s6625_s26 = smov 64   ;;  %s6626_s27 = smov 4  }
   0xf   :  { %45 = dma.hbm_to_vmem [thread:$0]  %s8289_s1, 512, %s40_s22, [#allocation6], %s6625_s26, %s6625_s26, %s6626_s27  }
  0x10   :  { %s6481_s30 = scalar_lea.vmem %s66_s24, 1024  ;;  %p6486_p6 = scmp.lt.s32.totalorder %s66_s24, %s66_s24 }
  0x11   :  { %p6482_p5 = scmp.ne.s32.totalorder %s66_s24, %s6481_s30  ;;  %p6487_p7 = scmp.lt.s32.totalorder %s6481_s30, %s6481_s30 }
  0x13   :  { %p6488_p8 = por %p6487_p7, %p6486_p6 }
  0x15   :  { %p6489_p9 = pnand %p6488_p8, %p6482_p5 }
  0x17   :  { %6492 = shalt.err (!%p6489_p9)
}
  0x18   :  { %71 = dma.hbm_to_vmem [thread:$0]  %s8292_s4, 1024, %s66_s24, [#allocation9], %s6625_s26, %s6625_s26, %s6626_s27  }
  0x19   :  { %s6627_s15 = smov [#allocation11]  }
  0x1a   :  { %s87_s16 = sshll.u32 %s6627_s15, 4  ;;  %s88_s16 = int_to_ptr.vmem [resolvable:$true] %s87_s16 }
  0x1b   :  { %s6501_s17 = scalar_lea.vmem %s88_s16, 2048  ;;  %p6506_p11 = scmp.lt.s32.totalorder %s88_s16, %s88_s16 }
  0x1c   :  { %p6502_p10 = scmp.ne.s32.totalorder %s88_s16, %s6501_s17  ;;  %p6507_p12 = scmp.lt.s32.totalorder %s6501_s17, %s6501_s17 }
  0x1e   :  { %p6508_p13 = por %p6507_p12, %p6506_p11 }
  0x20   :  { %p6509_p0 = pnand %p6508_p13, %p6502_p10 }
  0x22   :  { %6512 = shalt.err (!%p6509_p0)
}
  0x23   :  { %s6628_s1 = smov 128   ;;  %s6629_s18 = smov 8  }
  0x24   :  { %93 = dma.hbm_to_vmem [thread:$0]  %s8294_s6, 2048, %s88_s16, [#allocation12], %s6628_s1, %s6628_s1, %s6629_s18  }
  0x25   :  { %s6630_s21 = smov [#allocation2]   ;;  %s6631_s4 = smov [#allocation7]  }
  0x26   :  { %s27_s22 = sshll.u32 %s6630_s21, 4  ;;  %s51_s23 = sshll.u32 %s6631_s4, 4  ;;  %s28_s22 = int_to_ptr.vmem [resolvable:$true] %s27_s22  ;;  %s52_s23 = int_to_ptr.vmem [resolvable:$true] %s51_s23 }
  0x27   :  { %s6521_s24 = scalar_lea.vmem %s28_s22, 512  ;;  %p6526_p2 = scmp.lt.s32.totalorder %s28_s22, %s28_s22 }
  0x28   :  { %p6522_p1 = scmp.ne.s32.totalorder %s28_s22, %s6521_s24  ;;  %p6527_p3 = scmp.lt.s32.totalorder %s6521_s24, %s6521_s24 }
  0x2a   :  { %p6528_p4 = por %p6527_p3, %p6526_p2 }
  0x2c   :  { %p6529_p5 = pnand %p6528_p4, %p6522_p1 }
  0x2e   :  { %6532 = shalt.err (!%p6529_p5)
}
  0x2f   :  { %33 = dma.hbm_to_vmem [thread:$0]  %s8288_s0, 512, %s28_s22, [#allocation3], %s6625_s26, %s6625_s26, %s6626_s27  }
  0x30   :  { %s6541_s6 = scalar_lea.vmem %s52_s23, 3072  ;;  %p6546_p7 = scmp.lt.s32.totalorder %s52_s23, %s52_s23 }
  0x31   :  { %p6542_p6 = scmp.ne.s32.totalorder %s52_s23, %s6541_s6  ;;  %p6547_p8 = scmp.lt.s32.totalorder %s6541_s6, %s6541_s6 }
  0x33   :  { %p6548_p9 = por %p6547_p8, %p6546_p7 }
  0x35   :  { %p6549_p10 = pnand %p6548_p9, %p6542_p6 }
  0x37   :  { %6552 = shalt.err (!%p6549_p10)
}
  0x38   :  { %s6632_s29 = smov 192   ;;  %s6633_s30 = smov 12  }
  0x39   :  { %57 = dma.hbm_to_vmem [thread:$0]  %s8290_s2, 3072, %s52_s23, [#allocation6], %s6632_s29, %s6632_s29, %s6633_s30  }
  0x3a   :  { %s6634_s15 = smov [#allocation10]   ;;  %s6635_s17 = smov [#allocation13]  }
  0x3b   :  { %s78_s16 = sshll.u32 %s6634_s15, 4  ;;  %s105_s1 = sshll.u32 %s6635_s17, 4  ;;  %s79_s16 = int_to_ptr.vmem [resolvable:$true] %s78_s16  ;;  %s106_s1 = int_to_ptr.vmem [resolvable:$true] %s105_s1 }
  0x3c   :  { %s6561_s0 = scalar_lea.vmem %s79_s16, 16  ;;  %s6565_s18 = scalar_lea.vmem %s79_s16, 32 }
  0x3d   :  { %p6562_p11 = scmp.ne.s32.totalorder %s79_s16, %s6561_s0  ;;  %p6566_p12 = scmp.lt.s32.totalorder %s79_s16, %s79_s16 }
  0x3e   :  { %p6567_p13 = scmp.lt.s32.totalorder %s6565_s18, %s6561_s0 }
  0x40   :  { %p6568_p0 = por %p6567_p13, %p6566_p12 }
  0x42   :  { %p6569_p1 = pnand %p6568_p0, %p6562_p11 }
  0x44   :  { %6572 = shalt.err (!%p6569_p1)
}
  0x45   :  { %81 = dma.hbm_to_vmem [thread:$0]  %s8293_s5, 16, %s79_s16, [#allocation9]  }
  0x46   :  { %s6581_s21 = scalar_lea.vmem %s106_s1, 2048  ;;  %p6586_p3 = scmp.lt.s32.totalorder %s106_s1, %s106_s1 }
  0x47   :  { %p6582_p2 = scmp.ne.s32.totalorder %s106_s1, %s6581_s21  ;;  %p6587_p4 = scmp.lt.s32.totalorder %s6581_s21, %s6581_s21 }
  0x49   :  { %p6588_p5 = por %p6587_p4, %p6586_p3 }
  0x4b   :  { %p6589_p6 = pnand %p6588_p5, %p6582_p2 }
  0x4d   :  { %6592 = shalt.err (!%p6589_p6)
}
  0x4e   :  { %111 = dma.hbm_to_vmem [thread:$0]  %s8298_s10, 2048, %s106_s1, [#allocation12], %s6625_s26, %s6625_s26, %s6626_s27  }
  0x4f   :  { %6613 = dma.done.wait [#allocation3], 512  }
  0x50   :  { %6614 = vsyncadd [#allocation3], 4294966784 }
  0x51   :  { %6615 = dma.done.wait [#allocation6], 3584  }
  0x52   :  { %6616 = vsyncadd [#allocation6], 4294963712 }
  0x53   :  { %6617 = dma.done.wait [#allocation9], 1040  }
  0x54   :  { %6618 = vsyncadd [#allocation9], 4294966256 }
  0x55   :  { %6619 = dma.done.wait [#allocation12], 4096  }
  0x56   :  { %6620 = vsyncadd [#allocation12], 4294963200  ;;  %v8301_v0 = vmov 0   ;;  %v6105_v1 = vld [vmem:[#allocation7 + $0xac] ss:$12 sps:$4 sm:$0xff]   ;;  %vm176_vm0 = vcmask 1043456   ;;  %v243_v50 = vlaneseq }
  0x57   :  { %418 = vmatprep.mubr.bf16.mxu0 %v8301_v0  ;;  %v6107_v2 = vld [vmem:[#allocation7 + $0xa8] ss:$12 sps:$4 sm:$0xff]   ;;  %386 = vmatprep.subr.bf16.mxu0 %v6105_v1  ;;  %v6110_v4 = vld [vmem:[#allocation7 + $0x90] ss:$12 sps:$4 sm:$0xff]   ;;  %v6113_v6 = vld [vmem:[#allocation7 + $0x78] ss:$12 sps:$4 sm:$0xff]  }
  0x58   :  { %v6108_v3 = vld [vmem:[#allocation7 + $0x94] ss:$12 sps:$4 sm:$0xff]   ;;  %387 = vmatpush1.bf16.msra.mxu0 %v6107_v2  ;;  %v6111_v5 = vld [vmem:[#allocation7 + $0x7c] ss:$12 sps:$4 sm:$0xff]   ;;  %v6114_v7 = vld [vmem:[#allocation7 + $0x64] ss:$12 sps:$4 sm:$0xff]  }
  0x59   :  { %388 = vmatprep.subr.bf16.mxu0 %v6108_v3  ;;  %v136_v8 = vld [vmem:[#allocation2] sm:$0xf]  ;;  %v6117_v11 = vld [vmem:[#allocation7 + $0x4c] ss:$12 sps:$4 sm:$0xff]   ;;  %v6119_v13 = vld [vmem:[#allocation7 + $0x48] ss:$12 sps:$4 sm:$0xff]  }
  0x5a   :  { %v6116_v9 = vld [vmem:[#allocation7 + $0x60] ss:$12 sps:$4 sm:$0xff]   ;;  %v6122_v15 = vld [vmem:[#allocation7 + $0x30] ss:$12 sps:$4 sm:$0xff]   ;;  %v6138_v18 = vld [vmem:[#allocation7 + $0x98] ss:$12 sps:$4 sm:$0xff]  }
  0x5b   :  { %v6129_v10 = vld [vmem:[#allocation5] ss:$0 sps:$4 sm:$0xff]   ;;  %v6123_v16 = vld [vmem:[#allocation7 + $0x1c] ss:$12 sps:$4 sm:$0xff]   ;;  %v6125_v19 = vld [vmem:[#allocation7 + $0x18] ss:$12 sps:$4 sm:$0xff]  }
  0x5c   :  { %389 = vmatpush1.bf16.msra.mxu0 %v6110_v4  ;;  %v179_v12 = vsel %vm176_vm0, %v136_v8, %v6129_v10  ;;  %v6120_v14 = vld [vmem:[#allocation7 + $0x34] ss:$12 sps:$4 sm:$0xff]   ;;  %v6137_v17 = vld [vmem:[#allocation7 + $0xb0] ss:$12 sps:$4 sm:$0xff]   ;;  %v6130_v25 = vld [vmem:[#allocation5 + $0x4] ss:$0 sps:$4 sm:$0xff]  }
  0x5d   :  { %390 = vmatprep.subr.bf16.mxu0 %v6111_v5  ;;  %5654 = vmatprep.mubr.bf16.mxu1 %v179_v12  ;;  %v6139_v20 = vld [vmem:[#allocation7 + $0x80] ss:$12 sps:$4 sm:$0xff]   ;;  %v6126_v21 = vld [vmem:[#allocation7 + $0x4] ss:$12 sps:$4 sm:$0xff]   ;;  %v6140_v23 = vld [vmem:[#allocation7 + $0x68] ss:$12 sps:$4 sm:$0xff]  }
  0x5e   :  { %5638 = vmatprep.subr.bf16.mxu1 %v6137_v17  ;;  %v6128_v22 = vld [vmem:[#allocation7] ss:$12 sps:$4 sm:$0xff]   ;;  %v6141_v24 = vld [vmem:[#allocation7 + $0x50] ss:$12 sps:$4 sm:$0xff]   ;;  %v6142_v26 = vld [vmem:[#allocation7 + $0x38] ss:$12 sps:$4 sm:$0xff]  }
  0x5f   :  { %5639 = vmatpush3.bf16.msra.mxu1 %v6137_v17  ;;  %v137_v27 = vld [vmem:[#allocation2 + $0x4] sm:$0xf]  ;;  %v6143_v28 = vld [vmem:[#allocation7 + $0x20] ss:$12 sps:$4 sm:$0xff]   ;;  %v6131_v30 = vld [vmem:[#allocation5 + $0x8] ss:$0 sps:$4 sm:$0xff]  }
  0x60   :  { %391 = vmatpush1.bf16.msra.mxu0 %v6113_v6  ;;  %5640 = vmatprep.subr.bf16.mxu1 %v6138_v18  ;;  %v183_v29 = vsel %vm176_vm0, %v137_v27, %v6130_v25  ;;  %v6144_v31 = vld [vmem:[#allocation7 + $0x8] ss:$12 sps:$4 sm:$0xff]   ;;  %v6132_v34 = vld [vmem:[#allocation5 + $0xc] ss:$0 sps:$4 sm:$0xff]   ;;  %v6133_v37 = vld [vmem:[#allocation5 + $0x10] ss:$0 sps:$4 sm:$0xff]  }
  0x61   :  { %392 = vmatprep.subr.bf16.mxu0 %v6114_v7  ;;  %v138_v32 = vld [vmem:[#allocation2 + $0x8] sm:$0xf]  ;;  %v139_v35 = vld [vmem:[#allocation2 + $0xc] sm:$0xf]  ;;  %v140_v38 = vld [vmem:[#allocation2 + $0x10] sm:$0xf] }
  0x62   :  { %v187_v33 = vsel %vm176_vm0, %v138_v32, %v6131_v30  ;;  %v191_v36 = vsel %vm176_vm0, %v139_v35, %v6132_v34  ;;  %v195_v39 = vsel %vm176_vm0, %v140_v38, %v6133_v37  ;;  %v6134_v40 = vld [vmem:[#allocation5 + $0x14] ss:$0 sps:$4 sm:$0xff]   ;;  %v6135_v42 = vld [vmem:[#allocation5 + $0x18] ss:$0 sps:$4 sm:$0xff]   ;;  %v6136_v46 = vld [vmem:[#allocation5 + $0x1c] ss:$0 sps:$4 sm:$0xff]  }
  0x63   :  { %5641 = vmatpush3.bf16.msra.mxu1 %v6138_v18  ;;  %v141_v41 = vld [vmem:[#allocation2 + $0x14] sm:$0xf]  ;;  %v142_v43 = vld [vmem:[#allocation2 + $0x18] sm:$0xf]  ;;  %v143_v47 = vld [vmem:[#allocation2 + $0x1c] sm:$0xf] }
  0x64   :  { %393 = vmatpush1.bf16.msra.mxu0 %v6116_v9  ;;  %5642 = vmatprep.subr.bf16.mxu1 %v6139_v20  ;;  %v199_v44 = vsel %vm176_vm0, %v141_v41, %v6134_v40  ;;  %v203_v45 = vsel %vm176_vm0, %v142_v43, %v6135_v42  ;;  %v207_v48 = vsel %vm176_vm0, %v143_v47, %v6136_v46  ;;  %v8302_v49 = vmov 0.0   ;;  %v241_v54 = vld [vmem:[%s8291_s3] sm:$0x7]  ;;  %s6639_s3 = smov 96   ;;  %s6640_s27 = smov 32  }
  0x65   :  { %394 = vmatprep.subr.bf16.mxu0 %v6117_v11  ;;  %vm6638_vm1 = vmmov 0   ;;  %v244_v51 = vshrl.u32 %v243_v50, 7  ;;  %vm620_vm2 = vcmask 261120   ;;  %vm997_vm3 = vcmask 130048   ;;  %s6641_s28 = smov [#allocation14]  }
  0x66   :  { %vm4590_vm4 = vcmask 523264   ;;  %vm4607_vm5 = vcmask 785408   ;;  %vm4926_vm6 = vcmask 1041409   ;;  %vm4929_vm7 = vcmask 1042434   ;;  %s5306_s6 = sshll.u32 %s6641_s28, 4  ;;  %s5307_s6 = int_to_ptr.vmem [resolvable:$true] %s5306_s6 }
  0x67   :  { %5643 = vmatpush3.bf16.msra.mxu1 %v6139_v20  ;;  %v6762_v52 = vsub.s32 1, %v244_v51  ;;  %v6770_v59 = vsub.s32 0, %v244_v51  ;;  %v253_v11 = vsub.s32 2, %v244_v51  ;;  %vm4932_vm8 = vcmask 1043459   ;;  %s6593_s29 = scalar_lea.vmem %s5307_s6, 128  ;;  %p6598_p8 = scmp.lt.s32.totalorder %s5307_s6, %s5307_s6 }
  0x68   :  { %395 = vmatpush1.bf16.msra.mxu0 %v6119_v13  ;;  %5644 = vmatprep.subr.bf16.mxu1 %v6140_v23  ;;  %vm4935_vm9 = vcmask 1044484   ;;  %vm4938_vm10 = vcmask 1045509   ;;  %vm4941_vm11 = vcmask 1046534   ;;  %vm4944_vm12 = vcmask 1047559   ;;  %p6594_p7 = scmp.ne.s32.totalorder %s5307_s6, %s6593_s29  ;;  %p6599_p9 = scmp.lt.s32.totalorder %s6593_s29, %s6593_s29 }
  0x69   :  { %396 = vmatprep.subr.bf16.mxu0 %v6120_v14  ;;  %8331 = vst [vmem:[#allocation20_spill] sm:$0xff] %v6762_v52  ;;  %v6768_v56 = vrot.slane %v241_v54, %v6762_v52  ;;  %8332 = vst [vmem:[#allocation21_spill] sm:$0xff] %v6770_v59  ;;  %v6777_v2 = vrot.slane %v241_v54, %v6770_v59  ;;  %v6798_v18 = vrot.slane %v241_v54, %v253_v11 }
  0x6a   :  { %p6600_p10 = por %p6599_p9, %p6598_p8 }
  0x6b   :  { %5645 = vmatpush3.bf16.msra.mxu1 %v6140_v23 }
  0x6c   :  { %397 = vmatpush1.bf16.msra.mxu0 %v6122_v15  ;;  %5646 = vmatprep.subr.bf16.mxu1 %v6141_v24  ;;  %p6601_p11 = pnand %p6600_p10, %p6594_p7 }
  0x6d   :  { %398 = vmatprep.subr.bf16.mxu0 %v6123_v16 }
  0x6f   :  { %5647 = vmatpush3.bf16.msra.mxu1 %v6141_v24 }
  0x70   :  { %399 = vmatpush1.bf16.msra.mxu0 %v6125_v19  ;;  %5648 = vmatprep.subr.bf16.mxu1 %v6142_v26 }
  0x71   :  { %400 = vmatprep.subr.bf16.mxu0 %v6126_v21 }
  0x73   :  { %5649 = vmatpush3.bf16.msra.mxu1 %v6142_v26 }
  0x74   :  { %401 = vmatpush1.bf16.msra.mxu0 %v6128_v22  ;;  %5650 = vmatprep.subr.bf16.mxu1 %v6143_v28 }
  0x75   :  { %5718 = vmatprep.subr.bf16.mxu0 %v8302_v49 }
  0x77   :  { %419 = vmatmul.mubr.bf16.vlgmr.msra.gmra.mxu0 %v179_v12  ;;  %5651 = vmatpush3.bf16.msra.mxu1 %v6143_v28 }
  0x78   :  { %428 = vmatprep.mubr.bf16.mxu0 %v8301_v0  ;;  %5652 = vmatprep.subr.bf16.mxu1 %v6144_v31 }
  0x7b   :  { %5653 = vmatpush3.bf16.msra.mxu1 %v6144_v31 }
  0x7c   :  { %5670 = vmatprep.subr.bf16.mxu1 %v8302_v49 }
  0x7e   :  { %5655 = vmatmul.mubr.bf16.vlgmr.msra.gmra.mxu1 %v183_v29 }
  0x7f   :  { %429 = vmatmul.mubr.bf16.gmra.mxu0 %v183_v29  ;;  %5658 = vmatprep.mubr.bf16.mxu1 %v187_v33 }
  0x80   :  { %438 = vmatprep.mubr.bf16.mxu0 %v8301_v0 }
  0x86   :  { %5659 = vmatmul.mubr.bf16.gmra.mxu1 %v191_v36 }
  0x87   :  { %439 = vmatmul.mubr.bf16.gmra.mxu0 %v187_v33  ;;  %5662 = vmatprep.mubr.bf16.mxu1 %v195_v39 }
  0x88   :  { %448 = vmatprep.mubr.bf16.mxu0 %v8301_v0 }
  0x8e   :  { %5663 = vmatmul.mubr.bf16.gmra.mxu1 %v199_v44 }
  0x8f   :  { %449 = vmatmul.mubr.bf16.gmra.mxu0 %v191_v36  ;;  %5666 = vmatprep.mubr.bf16.mxu1 %v203_v45 }
  0x90   :  { %458 = vmatprep.mubr.bf16.mxu0 %v8301_v0 }
  0x96   :  { %5667 = vmatmul.mubr.bf16.gmra.mxu1 %v207_v48 }
  0x97   :  { %459 = vmatmul.mubr.bf16.gmra.mxu0 %v195_v39  ;;  %5672 = vmatprep.mubr.msk.bf16.mxu1 %vm6638_vm1, %v8302_v49 }
  0x98   :  { %468 = vmatprep.mubr.bf16.mxu0 %v8301_v0 }
  0x9f   :  { %469 = vmatmul.mubr.bf16.gmra.mxu0 %v199_v44 }
  0xa0   :  { %478 = vmatprep.mubr.bf16.mxu0 %v8301_v0 }
  0xa7   :  { %479 = vmatmul.mubr.bf16.gmra.mxu0 %v203_v45 }
  0xa8   :  { %488 = vmatprep.mubr.bf16.mxu0 %v8301_v0 }
  0xaf   :  { %489 = vmatmul.mubr.bf16.gmra.mxu0 %v207_v48 }
  0xb0   :  { %5720 = vmatprep.mubr.msk.bf16.mxu0 %vm6638_vm1, %v8302_v49 }
 0x137   :  { %v420_v53 = vpop.f32.mrf.mxu0 }
 0x138   :  { %v421_v7 = vadd.f32 %v420_v53, %v6777_v2 }
 0x139   :  { %v422_v55 = vpop.f32.mrf.mxu0 }
 0x13a   :  { %v423_v60 = vadd.f32 %v422_v55, %v6768_v56 }
 0x13b   :  { %v424_v57 = vpop.f32.mrf.mxu0 }
 0x13c   :  { %v425_v5 = vadd.f32 %v424_v57, %v6777_v2 }
 0x13d   :  { %v426_v58 = vpop.f32.mrf.mxu0 }
 0x13e   :  { %v427_v61 = vadd.f32 %v426_v58, %v6768_v56  ;;  %v6786_v12 = vpack.c.bf16 %v425_v5, %v421_v7  ;;  %v6794_v16 = vpop.f32.mrf.mxu1 }
 0x13f   :  { %v430_v62 = vpop.f32.mrf.mxu0 }
 0x140   :  { %v6774_v63 = vpack.c.bf16 %v427_v61, %v423_v60  ;;  %v533_v20 = vpop.f32.mrf.mxu1  ;;  %v431_v22 = vadd.f32 %v430_v62, %v6777_v2 }
 0x141   :  { %v432_v1 = vpop.f32.mrf.mxu0  ;;  %v534_v27 = vadd.f32 %v533_v20, %v6798_v18 }
 0x142   :  { %v625_v3 = vsel %vm620_vm2, %v6774_v63, 0  ;;  %v433_v8 = vadd.f32 %v432_v1, %v6768_v56  ;;  %v6805_v25 = vpop.f32.mrf.mxu1 }
 0x143   :  { %v434_v4 = vpop.f32.mrf.mxu0  ;;  %5671 = vmatpush3.bf16.xpose.msra.mxu1 %v625_v3 }
 0x144   :  { %5676 = vmatprep.subr.bf16.mxu1 %v8302_v49  ;;  %v435_v19 = vadd.f32 %v434_v4, %v6777_v2  ;;  %v536_v30 = vpop.f32.mrf.mxu1 }
 0x145   :  { %v436_v6 = vpop.f32.mrf.mxu0  ;;  %v537_v32 = vadd.f32 %v536_v30, %v6798_v18 }
 0x146   :  { %v437_v9 = vadd.f32 %v436_v6, %v6768_v56  ;;  %v6808_v28 = vpack.c.bf16 %v435_v19, %v431_v22  ;;  %v5660_v34 = vpop.f32.mrf.mxu1 }
 0x147   :  { %v440_v10 = vpop.f32.mrf.mxu0  ;;  %v6819_v36 = vpack.c.bf16 %v537_v32, %v534_v27  ;;  %v558_v37 = vadd.f32 %v5660_v34, %v6798_v18 }
 0x148   :  { %v6788_v13 = vpack.c.bf16 %v437_v9, %v433_v8  ;;  %v549_v39 = vpop.f32.mrf.mxu1  ;;  %v441_v42 = vadd.f32 %v440_v10, %v6777_v2 }
 0x149   :  { %v442_v14 = vpop.f32.mrf.mxu0  ;;  %v550_v41 = vadd.f32 %v549_v39, %v6798_v18  ;;  %5719 = vmatpush3.bf16.msra.mxu0 %v6819_v36 }
 0x14a   :  { %5673 = vmatmul.mubr.msk.bf16.vlgmr.msra.gmra.mxu1 %vm620_vm2, %v6786_v12  ;;  %v672_v15 = vsel %vm620_vm2, %v6788_v13, 0  ;;  %v443_v23 = vadd.f32 %v442_v14, %v6768_v56  ;;  %v5661_v45 = vpop.f32.mrf.mxu1  ;;  %5730 = vmatprep.subr.bf16.mxu0 %v8302_v49 }
 0x14b   :  { %v444_v17 = vpop.f32.mrf.mxu0  ;;  %5677 = vmatpush3.bf16.xpose.msra.mxu1 %v672_v15  ;;  %5678 = vmatprep.mubr.msk.bf16.mxu1 %vm6638_vm1, %v8302_v49  ;;  %v561_v47 = vadd.f32 %v5661_v45, %v6798_v18 }
 0x14c   :  { %5682 = vmatprep.subr.bf16.mxu1 %v8302_v49  ;;  %v445_v38 = vadd.f32 %v444_v17, %v6777_v2  ;;  %v552_v51 = vpop.f32.mrf.mxu1 }
 0x14d   :  { %v446_v21 = vpop.f32.mrf.mxu0  ;;  %v6835_v54 = vpack.c.bf16 %v561_v47, %v558_v37  ;;  %v553_v55 = vadd.f32 %v552_v51, %v6798_v18 }
 0x14e   :  { %v447_v24 = vadd.f32 %v446_v21, %v6768_v56  ;;  %v6831_v48 = vpack.c.bf16 %v445_v38, %v441_v42  ;;  %v5664_v58 = vpop.f32.mrf.mxu1 }
 0x14f   :  { %v450_v26 = vpop.f32.mrf.mxu0  ;;  %v6844_v61 = vpack.c.bf16 %v553_v55, %v550_v41  ;;  %v574_v62 = vadd.f32 %v5664_v58, %v6798_v18 }
 0x150   :  { %v6810_v29 = vpack.c.bf16 %v447_v24, %v443_v23  ;;  %v565_v3 = vpop.f32.mrf.mxu1  ;;  %v451_v6 = vadd.f32 %v450_v26, %v6777_v2 }
 0x151   :  { %v452_v31 = vpop.f32.mrf.mxu0  ;;  %v566_v5 = vadd.f32 %v565_v3, %v6798_v18 }
 0x152   :  { %5679 = vmatmul.mubr.msk.bf16.vlgmr.msra.gmra.mxu1 %vm620_vm2, %v6808_v28  ;;  %v719_v33 = vsel %vm620_vm2, %v6810_v29, 0  ;;  %v453_v43 = vadd.f32 %v452_v31, %v6768_v56  ;;  %v5665_v9 = vpop.f32.mrf.mxu1 }
 0x153   :  { %v454_v35 = vpop.f32.mrf.mxu0  ;;  %5683 = vmatpush3.bf16.xpose.msra.mxu1 %v719_v33  ;;  %5684 = vmatprep.mubr.msk.bf16.mxu1 %vm6638_vm1, %v8302_v49  ;;  %v577_v11 = vadd.f32 %v5665_v9, %v6798_v18 }
 0x154   :  { %5688 = vmatprep.subr.bf16.mxu1 %v8302_v49  ;;  %v455_v1 = vadd.f32 %v454_v35, %v6777_v2  ;;  %v568_v17 = vpop.f32.mrf.mxu1 }
 0x155   :  { %v456_v40 = vpop.f32.mrf.mxu0  ;;  %v6858_v20 = vpack.c.bf16 %v577_v11, %v574_v62  ;;  %v569_v21 = vadd.f32 %v568_v17, %v6798_v18 }
 0x156   :  { %v457_v44 = vadd.f32 %v456_v40, %v6768_v56  ;;  %v6854_v14 = vpack.c.bf16 %v455_v1, %v451_v6  ;;  %v5668_v23 = vpop.f32.mrf.mxu1 }
 0x157   :  { %v460_v46 = vpop.f32.mrf.mxu0  ;;  %v6867_v26 = vpack.c.bf16 %v569_v21, %v566_v5  ;;  %v590_v27 = vadd.f32 %v5668_v23, %v6798_v18 }
 0x158   :  { %v6833_v50 = vpack.c.bf16 %v457_v44, %v453_v43  ;;  %v581_v31 = vpop.f32.mrf.mxu1  ;;  %v461_v34 = vadd.f32 %v460_v46, %v6777_v2 }
 0x159   :  { %v462_v53 = vpop.f32.mrf.mxu0  ;;  %v582_v33 = vadd.f32 %v581_v31, %v6798_v18 }
 0x15a   :  { %5685 = vmatmul.mubr.msk.bf16.vlgmr.msra.gmra.mxu1 %vm620_vm2, %v6831_v48  ;;  %v766_v57 = vsel %vm620_vm2, %v6833_v50, 0  ;;  %v463_v7 = vadd.f32 %v462_v53, %v6768_v56  ;;  %v5669_v38 = vpop.f32.mrf.mxu1 }
 0x15b   :  { %v464_v60 = vpop.f32.mrf.mxu0  ;;  %5689 = vmatpush3.bf16.xpose.msra.mxu1 %v766_v57  ;;  %5690 = vmatprep.mubr.msk.bf16.mxu1 %vm6638_vm1, %v8302_v49  ;;  %v593_v40 = vadd.f32 %v5669_v38, %v6798_v18 }
 0x15c   :  { %5694 = vmatprep.subr.bf16.mxu1 %v8302_v49  ;;  %v465_v30 = vadd.f32 %v464_v60, %v6777_v2  ;;  %v584_v43 = vpop.f32.mrf.mxu1 }
 0x15d   :  { %v466_v4 = vpop.f32.mrf.mxu0  ;;  %v6881_v45 = vpack.c.bf16 %v593_v40, %v590_v27  ;;  %v585_v47 = vadd.f32 %v584_v43, %v6798_v18  ;;  %v545_v27 = vadd.f32 %v6805_v25, %v6798_v18 }
 0x15e   :  { %v467_v8 = vadd.f32 %v466_v4, %v6768_v56  ;;  %v6877_v41 = vpack.c.bf16 %v465_v30, %v461_v34 }
 0x15f   :  { %v470_v10 = vpop.f32.mrf.mxu0  ;;  %v6890_v53 = vpack.c.bf16 %v585_v47, %v582_v33 }
 0x160   :  { %v6856_v15 = vpack.c.bf16 %v467_v8, %v463_v7  ;;  %v471_v58 = vadd.f32 %v470_v10, %v6777_v2 }
 0x161   :  { %v472_v19 = vpop.f32.mrf.mxu0 }
 0x162   :  { %5691 = vmatmul.mubr.msk.bf16.vlgmr.msra.gmra.mxu1 %vm620_vm2, %v6854_v14  ;;  %v813_v22 = vsel %vm620_vm2, %v6856_v15, 0  ;;  %v473_v35 = vadd.f32 %v472_v19, %v6768_v56 }
 0x163   :  { %v474_v24 = vpop.f32.mrf.mxu0  ;;  %5695 = vmatpush3.bf16.xpose.msra.mxu1 %v813_v22  ;;  %5696 = vmatprep.mubr.msk.bf16.mxu1 %vm6638_vm1, %v8302_v49 }
 0x164   :  { %5700 = vmatprep.subr.bf16.mxu1 %v8302_v49  ;;  %v475_v55 = vadd.f32 %v474_v24, %v6777_v2 }
 0x165   :  { %v476_v32 = vpop.f32.mrf.mxu0 }
 0x166   :  { %v477_v37 = vadd.f32 %v476_v32, %v6768_v56  ;;  %v6897_v3 = vpack.c.bf16 %v475_v55, %v471_v58 }
 0x167   :  { %v480_v39 = vpop.f32.mrf.mxu0 }
 0x168   :  { %v6879_v42 = vpack.c.bf16 %v477_v37, %v473_v35  ;;  %v481_v11 = vadd.f32 %v480_v39, %v6777_v2 }
 0x169   :  { %v482_v44 = vpop.f32.mrf.mxu0 }
 0x16a   :  { %5697 = vmatmul.mubr.msk.bf16.vlgmr.msra.gmra.mxu1 %vm620_vm2, %v6877_v41  ;;  %v860_v46 = vsel %vm620_vm2, %v6879_v42, 0  ;;  %v483_v60 = vadd.f32 %v482_v44, %v6768_v56 }
 0x16b   :  { %v484_v51 = vpop.f32.mrf.mxu0  ;;  %5701 = vmatpush3.bf16.xpose.msra.mxu1 %v860_v46  ;;  %5702 = vmatprep.mubr.msk.bf16.mxu1 %vm6638_vm1, %v8302_v49 }
 0x16c   :  { %5706 = vmatprep.subr.bf16.mxu1 %v8302_v49  ;;  %v485_v8 = vadd.f32 %v484_v51, %v6777_v2 }
 0x16d   :  { %v486_v57 = vpop.f32.mrf.mxu0 }
 0x16e   :  { %v487_v62 = vadd.f32 %v486_v57, %v6768_v56  ;;  %v6912_v19 = vpack.c.bf16 %v485_v8, %v481_v11 }
 0x16f   :  { %v490_v1 = vpop.f32.mrf.mxu0 }
 0x170   :  { %v6899_v4 = vpack.c.bf16 %v487_v62, %v483_v60  ;;  %v491_v22 = vadd.f32 %v490_v1, %v6777_v2 }
 0x171   :  { %v492_v5 = vpop.f32.mrf.mxu0 }
 0x172   :  { %5703 = vmatmul.mubr.msk.bf16.vlgmr.msra.gmra.mxu1 %vm620_vm2, %v6897_v3  ;;  %v907_v6 = vsel %vm620_vm2, %v6899_v4, 0  ;;  %v493_v9 = vadd.f32 %v492_v5, %v6768_v56 }
 0x173   :  { %v494_v7 = vpop.f32.mrf.mxu0  ;;  %5707 = vmatpush3.bf16.xpose.msra.mxu1 %v907_v6  ;;  %5708 = vmatprep.mubr.msk.bf16.mxu1 %vm6638_vm1, %v8302_v49 }
 0x174   :  { %5712 = vmatprep.subr.bf16.mxu1 %v8302_v49  ;;  %v495_v23 = vadd.f32 %v494_v7, %v6777_v2 }
 0x175   :  { %v496_v10 = vpop.f32.mrf.mxu0 }
 0x176   :  { %v497_v17 = vadd.f32 %v496_v10, %v6768_v56  ;;  %v542_v56 = vadd.f32 %v6794_v16, %v6798_v18  ;;  %v6929_v30 = vpack.c.bf16 %v495_v23, %v491_v22 }
 0x178   :  { %v6914_v21 = vpack.c.bf16 %v497_v17, %v493_v9  ;;  %v6931_v2 = vpack.c.bf16 %v545_v27, %v542_v56 }
 0x17a   :  { %5709 = vmatmul.mubr.msk.bf16.vlgmr.msra.gmra.mxu1 %vm620_vm2, %v6912_v19  ;;  %v954_v24 = vsel %vm620_vm2, %v6914_v21, 0 }
 0x17b   :  { %5713 = vmatpush3.bf16.xpose.msra.mxu1 %v954_v24  ;;  %5714 = vmatprep.mubr.msk.bf16.mxu1 %vm6638_vm1, %v8302_v49 }
 0x17c   :  { %5724 = vmatprep.subr.bf16.mxu1 %v8302_v49 }
 0x182   :  { %5715 = vmatmul.mubr.msk.bf16.vlgmr.msra.gmra.mxu1 %vm620_vm2, %v6929_v30 }
 0x183   :  { %5725 = vmatpush3.bf16.msra.mxu1 %v6931_v2  ;;  %5726 = vmatprep.mubr.msk.bf16.mxu1 %vm6638_vm1, %v8302_v49 }
 0x184   :  { %5736 = vmatprep.subr.bf16.mxu1 %v8302_v49 }
 0x20a   :  { %v6939_v16 = vpop.f32.mrf.mxu1 }
 0x20b   :  { %v998_v18 = vsel %vm997_vm3, %v6939_v16, -inf }
 0x20c   :  { %999 = vmax.xlane.f32.xlu0 %v998_v18  ;;  %v5674_v25 = vpop.f32.mrf.mxu1 }
 0x20e   :  { %v6943_v31 = vpop.f32.mrf.mxu1 }
 0x20f   :  { %v1001_v32 = vsel %vm997_vm3, %v6943_v31, -inf }
 0x210   :  { %1002 = vmax.xlane.f32.xlu0 %v1001_v32  ;;  %v5675_v33 = vpop.f32.mrf.mxu1 }
 0x212   :  { %v6947_v34 = vpop.f32.mrf.mxu1 }
 0x213   :  { %v1004_v35 = vsel %vm997_vm3, %v6947_v34, -inf }
 0x214   :  { %1005 = vmax.xlane.f32.xlu1 %v1004_v35  ;;  %v5680_v37 = vpop.f32.mrf.mxu1 }
 0x216   :  { %v6951_v38 = vpop.f32.mrf.mxu1 }
 0x217   :  { %v1007_v39 = vsel %vm997_vm3, %v6951_v38, -inf }
 0x218   :  { %1008 = vmax.xlane.f32.xlu1 %v1007_v39  ;;  %v5681_v40 = vpop.f32.mrf.mxu1 }
 0x21a   :  { %v6955_v43 = vpop.f32.mrf.mxu1 }
 0x21b   :  { %v1010_v44 = vsel %vm997_vm3, %v6955_v43, -inf }
 0x21c   :  { %1011 = vmax.xlane.f32.xlu0 %v1010_v44  ;;  %v5686_v47 = vpop.f32.mrf.mxu1 }
 0x21e   :  { %v6959_v46 = vpop.f32.mrf.mxu1 }
 0x21f   :  { %v1013_v51 = vsel %vm997_vm3, %v6959_v46, -inf }
 0x220   :  { %1014 = vmax.xlane.f32.xlu1 %v1013_v51  ;;  %v5687_v55 = vpop.f32.mrf.mxu1 }
 0x222   :  { %v6963_v57 = vpop.f32.mrf.mxu1 }
 0x223   :  { %v1016_v58 = vsel %vm997_vm3, %v6963_v57, -inf }
 0x224   :  { %1017 = vmax.xlane.f32.xlu0 %v1016_v58  ;;  %v5692_v60 = vpop.f32.mrf.mxu1 }
 0x226   :  { %v6967_v62 = vpop.f32.mrf.mxu1 }
 0x227   :  { %v1019_v1 = vsel %vm997_vm3, %v6967_v62, -inf }
 0x228   :  { %1020 = vmax.xlane.f32.xlu1 %v1019_v1  ;;  %v5693_v5 = vpop.f32.mrf.mxu1 }
 0x22a   :  { %v6971_v6 = vpop.f32.mrf.mxu1 }
 0x22b   :  { %v1022_v7 = vsel %vm997_vm3, %v6971_v6, -inf }
 0x22c   :  { %1023 = vmax.xlane.f32.xlu0 %v1022_v7  ;;  %v5698_v8 = vpop.f32.mrf.mxu1 }
 0x22e   :  { %v6975_v9 = vpop.f32.mrf.mxu1 }
 0x22f   :  { %v1025_v10 = vsel %vm997_vm3, %v6975_v9, -inf }
 0x230   :  { %1026 = vmax.xlane.f32.xlu1 %v1025_v10  ;;  %v5699_v11 = vpop.f32.mrf.mxu1 }
 0x232   :  { %v6979_v17 = vpop.f32.mrf.mxu1 }
 0x233   :  { %v1028_v22 = vsel %vm997_vm3, %v6979_v17, -inf }
 0x234   :  { %1029 = vmax.xlane.f32.xlu0 %v1028_v22  ;;  %v5704_v23 = vpop.f32.mrf.mxu1 }
 0x236   :  { %v6983_v24 = vpop.f32.mrf.mxu1 }
 0x237   :  { %v1031_v56 = vsel %vm997_vm3, %v6983_v24, -inf }
 0x238   :  { %1032 = vmax.xlane.f32.xlu1 %v1031_v56  ;;  %v5705_v27 = vpop.f32.mrf.mxu1 }
 0x23a   :  { %v6987_v18 = vpop.f32.mrf.mxu1 }
 0x23b   :  { %v1034_v25 = vsel %vm997_vm3, %v6987_v18, -inf }
 0x23c   :  { %1035 = vmax.xlane.f32.xlu0 %v1034_v25  ;;  %v5710_v32 = vpop.f32.mrf.mxu1 }
 0x23e   :  { %v6991_v33 = vpop.f32.mrf.mxu1 }
 0x23f   :  { %v1037_v35 = vsel %vm997_vm3, %v6991_v33, -inf }
 0x240   :  { %1038 = vmax.xlane.f32.xlu1 %v1037_v35  ;;  %v5711_v37 = vpop.f32.mrf.mxu1 }
 0x242   :  { %v6995_v39 = vpop.f32.mrf.mxu1 }
 0x243   :  { %v1040_v40 = vsel %vm997_vm3, %v6995_v39, -inf }
 0x244   :  { %1041 = vmax.xlane.f32.xlu0 %v1040_v40  ;;  %v5716_v44 = vpop.f32.mrf.mxu1 }
 0x246   :  { %v6999_v47 = vpop.f32.mrf.mxu1 }
 0x247   :  { %v1043_v51 = vsel %vm997_vm3, %v6999_v47, -inf }
 0x248   :  { %1044 = vmax.xlane.f32.xlu1 %v1043_v51  ;;  %v5717_v55 = vpop.f32.mrf.mxu1 }
 0x295   :  { %v1000_v58 = vpop.xlane.xlu0 %999 }
 0x296   :  { %v1046_v60 = vsub.f32 %v6939_v16, %v1000_v58 }
 0x298   :  { %v1062_v1 = vmul.f32 1.442695, %v1046_v60 }
 0x299   :  { %v1003_v5 = vpop.xlane.xlu0 %1002 }
 0x29a   :  { %6193 = vpow2.f32 %v1062_v1  ;;  %v1047_v7 = vsub.f32 %v6943_v31, %v1003_v5 }
 0x29c   :  { %v1064_v8 = vmul.f32 1.442695, %v1047_v7 }
 0x29d   :  { %v1006_v10 = vpop.xlane.xlu1 %1005 }
 0x29e   :  { %6195 = vpow2.f32 %v1064_v8  ;;  %v1048_v11 = vsub.f32 %v6947_v34, %v1006_v10 }
 0x2a0   :  { %v1066_v22 = vmul.f32 1.442695, %v1048_v11 }
 0x2a1   :  { %v1009_v23 = vpop.xlane.xlu1 %1008 }
 0x2a2   :  { %6197 = vpow2.f32 %v1066_v22  ;;  %v1049_v56 = vsub.f32 %v6951_v38, %v1009_v23 }
 0x2a4   :  { %v1068_v27 = vmul.f32 1.442695, %v1049_v56 }
 0x2a5   :  { %v1012_v25 = vpop.xlane.xlu0 %1011 }
 0x2a6   :  { %6199 = vpow2.f32 %v1068_v27  ;;  %v1050_v16 = vsub.f32 %v6955_v43, %v1012_v25 }
 0x2a7   :  { %v7008_v32 = vpop.eup %6193 }
 0x2a8   :  { %v1070_v35 = vmul.f32 1.442695, %v1050_v16  ;;  %v1094_v31 = vsel %vm997_vm3, %v7008_v32, 0.0 }
 0x2a9   :  { %v1015_v37 = vpop.xlane.xlu1 %1014  ;;  %1095 = vadd.xlane.f32.xlu0 %v1094_v31 }
 0x2aa   :  { %6201 = vpow2.f32 %v1070_v35  ;;  %v1051_v34 = vsub.f32 %v6959_v46, %v1015_v37 }
 0x2ab   :  { %v7013_v40 = vpop.eup %6195 }
 0x2ac   :  { %v1072_v44 = vmul.f32 1.442695, %v1051_v34  ;;  %v1097_v38 = vsel %vm997_vm3, %v7013_v40, 0.0 }
 0x2ad   :  { %v1018_v51 = vpop.xlane.xlu0 %1017  ;;  %1098 = vadd.xlane.f32.xlu1 %v1097_v38 }
 0x2ae   :  { %6203 = vpow2.f32 %v1072_v44  ;;  %v1052_v43 = vsub.f32 %v6963_v57, %v1018_v51 }
 0x2af   :  { %v7018_v55 = vpop.eup %6197 }
 0x2b0   :  { %v1074_v58 = vmul.f32 1.442695, %v1052_v43  ;;  %v1100_v60 = vsel %vm997_vm3, %v7018_v55, 0.0 }
 0x2b1   :  { %v1021_v1 = vpop.xlane.xlu1 %1020  ;;  %1101 = vadd.xlane.f32.xlu0 %v1100_v60 }
 0x2b2   :  { %6205 = vpow2.f32 %v1074_v58  ;;  %v1053_v46 = vsub.f32 %v6967_v62, %v1021_v1 }
 0x2b3   :  { %v7023_v5 = vpop.eup %6199 }
 0x2b4   :  { %v1076_v7 = vmul.f32 1.442695, %v1053_v46  ;;  %v1103_v8 = vsel %vm997_vm3, %v7023_v5, 0.0 }
 0x2b5   :  { %v1024_v10 = vpop.xlane.xlu0 %1023  ;;  %1104 = vadd.xlane.f32.xlu1 %v1103_v8 }
 0x2b6   :  { %6207 = vpow2.f32 %v1076_v7  ;;  %v1054_v57 = vsub.f32 %v6971_v6, %v1024_v10 }
 0x2b7   :  { %v7028_v11 = vpop.eup %6201 }
 0x2b8   :  { %v1078_v22 = vmul.f32 1.442695, %v1054_v57  ;;  %v1106_v23 = vsel %vm997_vm3, %v7028_v11, 0.0 }
 0x2b9   :  { %v1027_v56 = vpop.xlane.xlu1 %1026  ;;  %1107 = vadd.xlane.f32.xlu0 %v1106_v23 }
 0x2ba   :  { %6209 = vpow2.f32 %v1078_v22  ;;  %v1055_v62 = vsub.f32 %v6975_v9, %v1027_v56 }
 0x2bb   :  { %v7033_v27 = vpop.eup %6203 }
 0x2bc   :  { %v1080_v25 = vmul.f32 1.442695, %v1055_v62  ;;  %v1109_v16 = vsel %vm997_vm3, %v7033_v27, 0.0 }
 0x2bd   :  { %v1030_v35 = vpop.xlane.xlu0 %1029  ;;  %1110 = vadd.xlane.f32.xlu1 %v1109_v16 }
 0x2be   :  { %6211 = vpow2.f32 %v1080_v25  ;;  %v1056_v6 = vsub.f32 %v6979_v17, %v1030_v35 }
 0x2bf   :  { %v7038_v31 = vpop.eup %6205 }
 0x2c0   :  { %v1082_v37 = vmul.f32 1.442695, %v1056_v6  ;;  %v1112_v34 = vsel %vm997_vm3, %v7038_v31, 0.0 }
 0x2c1   :  { %v1033_v44 = vpop.xlane.xlu1 %1032  ;;  %1113 = vadd.xlane.f32.xlu0 %v1112_v34 }
 0x2c2   :  { %6213 = vpow2.f32 %v1082_v37  ;;  %v1057_v9 = vsub.f32 %v6983_v24, %v1033_v44 }
 0x2c3   :  { %v7043_v38 = vpop.eup %6207 }
 0x2c4   :  { %v1084_v51 = vmul.f32 1.442695, %v1057_v9  ;;  %v1115_v43 = vsel %vm997_vm3, %v7043_v38, 0.0 }
 0x2c5   :  { %v1036_v58 = vpop.xlane.xlu0 %1035  ;;  %1116 = vadd.xlane.f32.xlu1 %v1115_v43 }
 0x2c6   :  { %6215 = vpow2.f32 %v1084_v51  ;;  %v1058_v17 = vsub.f32 %v6987_v18, %v1036_v58 }
 0x2c7   :  { %v7048_v60 = vpop.eup %6209 }
 0x2c8   :  { %v1086_v1 = vmul.f32 1.442695, %v1058_v17  ;;  %v1118_v46 = vsel %vm997_vm3, %v7048_v60, 0.0 }
 0x2c9   :  { %v1039_v7 = vpop.xlane.xlu1 %1038  ;;  %1119 = vadd.xlane.f32.xlu0 %v1118_v46 }
 0x2ca   :  { %6217 = vpow2.f32 %v1086_v1  ;;  %v1059_v24 = vsub.f32 %v6991_v33, %v1039_v7 }
 0x2cb   :  { %v7053_v8 = vpop.eup %6211 }
 0x2cc   :  { %v1088_v10 = vmul.f32 1.442695, %v1059_v24  ;;  %v1121_v57 = vsel %vm997_vm3, %v7053_v8, 0.0 }
 0x2cd   :  { %v1042_v22 = vpop.xlane.xlu0 %1041  ;;  %1122 = vadd.xlane.f32.xlu1 %v1121_v57 }
 0x2ce   :  { %6219 = vpow2.f32 %v1088_v10  ;;  %v1060_v18 = vsub.f32 %v6995_v39, %v1042_v22 }
 0x2cf   :  { %v7058_v23 = vpop.eup %6213 }
 0x2d0   :  { %v1090_v56 = vmul.f32 1.442695, %v1060_v18  ;;  %v1124_v62 = vsel %vm997_vm3, %v7058_v23, 0.0 }
 0x2d1   :  { %1125 = vadd.xlane.f32.xlu0 %v1124_v62  ;;  %v1045_v44 = vpop.xlane.xlu1 %1044 }
 0x2d2   :  { %6221 = vpow2.f32 %v1090_v56  ;;  %v1061_v9 = vsub.f32 %v6999_v47, %v1045_v44 }
 0x2d3   :  { %v7062_v33 = vpop.eup %6215 }
 0x2d4   :  { %v1127_v25 = vsel %vm997_vm3, %v7062_v33, 0.0  ;;  %v1092_v51 = vmul.f32 1.442695, %v1061_v9 }
 0x2d5   :  { %1128 = vadd.xlane.f32.xlu1 %v1127_v25 }
 0x2d6   :  { %6223 = vpow2.f32 %v1092_v51 }
 0x2d7   :  { %v7066_v16 = vpop.eup %6217 }
 0x2d8   :  { %v1130_v35 = vsel %vm997_vm3, %v7066_v16, 0.0 }
 0x2d9   :  { %1131 = vadd.xlane.f32.xlu0 %v1130_v35 }
 0x2db   :  { %v7070_v39 = vpop.eup %6219 }
 0x2dc   :  { %v1133_v6 = vsel %vm997_vm3, %v7070_v39, 0.0 }
 0x2dd   :  { %1134 = vadd.xlane.f32.xlu1 %v1133_v6 }
 0x2df   :  { %v7074_v37 = vpop.eup %6221 }
 0x2e0   :  { %v1136_v34 = vsel %vm997_vm3, %v7074_v37, 0.0 }
 0x2e1   :  { %1137 = vadd.xlane.f32.xlu0 %v1136_v34 }
 0x2e3   :  { %v7097_v43 = vpop.eup %6223 }
 0x2e4   :  { %v1139_v47 = vsel %vm997_vm3, %v7097_v43, 0.0 }
 0x2ee   :  { %1599 = vrot.lane.b32.xlu1 %v6788_v13, %s6639_s3 }
 0x2f2   :  { %1543 = vrot.lane.b32.xlu1 %v6786_v12, %s6639_s3 }
 0x2f7   :  { %1546 = vrot.lane.b32.xlu0 %v6774_v63, %s6639_s3 }
 0x2fb   :  { %1596 = vrot.lane.b32.xlu0 %v6808_v28, %s6639_s3 }
 0x2ff   :  { %1649 = vrot.lane.b32.xlu0 %v6831_v48, %s6639_s3 }
 0x303   :  { %1702 = vrot.lane.b32.xlu0 %v6854_v14, %s6639_s3 }
 0x307   :  { %1755 = vrot.lane.b32.xlu0 %v6877_v41, %s6639_s3 }
 0x30b   :  { %1808 = vrot.lane.b32.xlu0 %v6897_v3, %s6639_s3 }
 0x30f   :  { %1861 = vrot.lane.b32.xlu0 %v6912_v19, %s6639_s3 }
 0x316   :  { %1140 = vadd.xlane.f32.xlu1 %v1139_v47 }
 0x327   :  { %1652 = vrot.lane.b32.xlu1 %v6810_v29, %s6639_s3 }
 0x32b   :  { %1705 = vrot.lane.b32.xlu1 %v6833_v50, %s6639_s3 }
 0x32f   :  { %1758 = vrot.lane.b32.xlu1 %v6856_v15, %s6639_s3 }
 0x332   :  { %v1096_v58 = vpop.xlane.xlu0 %1095 }
 0x333   :  { %1811 = vrot.lane.b32.xlu1 %v6879_v42, %s6639_s3  ;;  %6225 = vrcp.f32 %v1096_v58 }
 0x336   :  { %v1099_v17 = vpop.xlane.xlu1 %1098 }
 0x337   :  { %6227 = vrcp.f32 %v1099_v17  ;;  %1864 = vrot.lane.b32.xlu1 %v6899_v4, %s6639_s3 }
 0x33a   :  { %v1102_v1 = vpop.xlane.xlu0 %1101 }
 0x33b   :  { %1917 = vrot.lane.b32.xlu1 %v6914_v21, %s6639_s3  ;;  %6229 = vrcp.f32 %v1102_v1 }
 0x33e   :  { %v1105_v46 = vpop.xlane.xlu1 %1104 }
 0x33f   :  { %6231 = vrcp.f32 %v1105_v46  ;;  %1914 = vrot.lane.b32.xlu1 %v6929_v30, %s6639_s3 }
 0x340   :  { %v6226_v7 = vpop.eup %6225 }
 0x341   :  { %v1158_v57 = vmul.f32 %v6226_v7, %v7008_v32 }
 0x342   :  { %v1108_v24 = vpop.xlane.xlu0 %1107 }
 0x343   :  { %6233 = vrcp.f32 %v1108_v24 }
 0x344   :  { %v6228_v10 = vpop.eup %6227 }
 0x345   :  { %v1159_v22 = vmul.f32 %v6228_v10, %v7013_v40 }
 0x346   :  { %v1111_v18 = vpop.xlane.xlu1 %1110 }
 0x347   :  { %6235 = vrcp.f32 %v1111_v18  ;;  %v1174_v56 = vpack.c.bf16 %v1159_v22, %v1158_v57 }
 0x348   :  { %v6230_v62 = vpop.eup %6229 }
 0x349   :  { %5721 = vmatmul.mubr.msk.bf16.vlgmr.msra.gmra.mxu0 %vm997_vm3, %v1174_v56  ;;  %v1160_v32 = vmul.f32 %v6230_v62, %v7018_v55 }
 0x34a   :  { %5731 = vmatpush3.bf16.msra.mxu0 %v6844_v61  ;;  %v1114_v25 = vpop.xlane.xlu0 %1113  ;;  %5732 = vmatprep.mubr.msk.bf16.mxu0 %vm6638_vm1, %v8302_v49 }
 0x34b   :  { %5742 = vmatprep.subr.bf16.mxu0 %v8302_v49  ;;  %6237 = vrcp.f32 %v1114_v25 }
 0x34c   :  { %v6232_v35 = vpop.eup %6231 }
 0x34d   :  { %v1161_v40 = vmul.f32 %v6232_v35, %v7023_v5 }
 0x34e   :  { %v1117_v6 = vpop.xlane.xlu1 %1116 }
 0x34f   :  { %6239 = vrcp.f32 %v1117_v6  ;;  %v1175_v34 = vpack.c.bf16 %v1161_v40, %v1160_v32 }
 0x350   :  { %v6234_v44 = vpop.eup %6233 }
 0x351   :  { %5727 = vmatmul.mubr.msk.bf16.vlgmr.msra.gmra.mxu1 %vm997_vm3, %v1175_v34  ;;  %v1162_v55 = vmul.f32 %v6234_v44, %v7028_v11 }
 0x352   :  { %5737 = vmatpush3.bf16.msra.mxu1 %v6835_v54  ;;  %v1120_v9 = vpop.xlane.xlu0 %1119  ;;  %5738 = vmatprep.mubr.msk.bf16.mxu1 %vm6638_vm1, %v8302_v49 }
 0x353   :  { %5748 = vmatprep.subr.bf16.mxu1 %v8302_v49  ;;  %6241 = vrcp.f32 %v1120_v9 }
 0x354   :  { %v6236_v51 = vpop.eup %6235 }
 0x355   :  { %v1163_v5 = vmul.f32 %v6236_v51, %v7033_v27 }
 0x356   :  { %v1123_v47 = vpop.xlane.xlu1 %1122 }
 0x357   :  { %6243 = vrcp.f32 %v1123_v47  ;;  %v1176_v58 = vpack.c.bf16 %v1163_v5, %v1162_v55 }
 0x358   :  { %v6238_v17 = vpop.eup %6237 }
 0x359   :  { %5733 = vmatmul.mubr.msk.bf16.vlgmr.msra.gmra.mxu0 %vm997_vm3, %v1176_v58  ;;  %v1164_v11 = vmul.f32 %v6238_v17, %v7038_v31 }
 0x35a   :  { %5743 = vmatpush3.bf16.msra.mxu0 %v6867_v26  ;;  %v1126_v1 = vpop.xlane.xlu0 %1125  ;;  %5744 = vmatprep.mubr.msk.bf16.mxu0 %vm6638_vm1, %v8302_v49 }
 0x35b   :  { %5754 = vmatprep.subr.bf16.mxu0 %v8302_v49  ;;  %6245 = vrcp.f32 %v1126_v1 }
 0x35c   :  { %v6240_v46 = vpop.eup %6239 }
 0x35d   :  { %v1165_v27 = vmul.f32 %v6240_v46, %v7043_v38 }
 0x35e   :  { %v1129_v7 = vpop.xlane.xlu1 %1128 }
 0x35f   :  { %6247 = vrcp.f32 %v1129_v7  ;;  %v1177_v24 = vpack.c.bf16 %v1165_v27, %v1164_v11 }
 0x360   :  { %v6242_v10 = vpop.eup %6241 }
 0x361   :  { %5739 = vmatmul.mubr.msk.bf16.vlgmr.msra.gmra.mxu1 %vm997_vm3, %v1177_v24  ;;  %v1166_v31 = vmul.f32 %v6242_v10, %v7048_v60 }
 0x362   :  { %5749 = vmatpush3.bf16.msra.mxu1 %v6858_v20  ;;  %v1132_v57 = vpop.xlane.xlu0 %1131  ;;  %5750 = vmatprep.mubr.msk.bf16.mxu1 %vm6638_vm1, %v8302_v49 }
 0x363   :  { %5760 = vmatprep.subr.bf16.mxu1 %v8302_v49  ;;  %6249 = vrcp.f32 %v1132_v57 }
 0x364   :  { %v6244_v22 = vpop.eup %6243 }
 0x365   :  { %v1167_v38 = vmul.f32 %v6244_v22, %v7053_v8 }
 0x366   :  { %v1135_v18 = vpop.xlane.xlu1 %1134 }
 0x367   :  { %6251 = vrcp.f32 %v1135_v18  ;;  %v1178_v56 = vpack.c.bf16 %v1167_v38, %v1166_v31 }
 0x368   :  { %v6246_v62 = vpop.eup %6245 }
 0x369   :  { %5745 = vmatmul.mubr.msk.bf16.vlgmr.msra.gmra.mxu0 %vm997_vm3, %v1178_v56  ;;  %v1168_v35 = vmul.f32 %v6246_v62, %v7058_v23 }
 0x36a   :  { %5755 = vmatpush3.bf16.msra.mxu0 %v6890_v53  ;;  %5756 = vmatprep.mubr.msk.bf16.mxu0 %vm6638_vm1, %v8302_v49  ;;  %v1138_v8 = vpop.xlane.xlu0 %1137  ;;  %v1600_v51 = vpop.permute.xlu1 %1599 }
 0x36b   :  { %5766 = vmatprep.subr.bf16.mxu0 %v8302_v49  ;;  %6253 = vrcp.f32 %v1138_v8  ;;  %v1605_v38 = vsel %vm620_vm2, %v1600_v51, 0 }
 0x36c   :  { %v6248_v25 = vpop.eup %6247 }
 0x36d   :  { %v1169_v60 = vmul.f32 %v6248_v25, %v7062_v33 }
 0x36e   :  { %v1547_v23 = vpop.permute.xlu0 %1546  ;;  %v1544_v55 = vpop.permute.xlu1 %1543 }
 0x36f   :  { %v1179_v32 = vpack.c.bf16 %v1169_v60, %v1168_v35  ;;  %v1552_v33 = vsel %vm620_vm2, %v1547_v23, 0 }
 0x370   :  { %v6250_v40 = vpop.eup %6249 }
 0x371   :  { %5751 = vmatmul.mubr.msk.bf16.vlgmr.msra.gmra.mxu1 %vm997_vm3, %v1179_v32  ;;  %v1170_v34 = vmul.f32 %v6250_v40, %v7066_v16 }
 0x372   :  { %5761 = vmatpush3.bf16.msra.mxu1 %v6881_v45  ;;  %5762 = vmatprep.mubr.msk.bf16.mxu1 %vm6638_vm1, %v8302_v49  ;;  %v1597_v16 = vpop.permute.xlu0 %1596 }
 0x373   :  { %5772 = vmatprep.subr.bf16.mxu1 %v8302_v49 }
 0x374   :  { %v6252_v6 = vpop.eup %6251 }
 0x375   :  { %v1171_v44 = vmul.f32 %v6252_v6, %v7070_v39 }
 0x376   :  { %v1650_v5 = vpop.permute.xlu0 %1649 }
 0x377   :  { %v1180_v9 = vpack.c.bf16 %v1171_v44, %v1170_v34 }
 0x378   :  { %v6254_v46 = vpop.eup %6253 }
 0x379   :  { %5757 = vmatmul.mubr.msk.bf16.vlgmr.msra.gmra.mxu0 %vm997_vm3, %v1180_v9  ;;  %v1172_v24 = vmul.f32 %v6254_v46, %v7074_v37 }
 0x37a   :  { %5767 = vmatpush3.bf16.xpose.msra.mxu0 %v1552_v33  ;;  %5768 = vmatprep.mubr.msk.bf16.mxu0 %vm6638_vm1, %v8302_v49  ;;  %v1703_v1 = vpop.permute.xlu0 %1702 }
 0x37b   :  { %5778 = vmatprep.subr.bf16.mxu0 %v8302_v49 }
 0x37e   :  { %v1756_v57 = vpop.permute.xlu0 %1755 }
 0x381   :  { %5769 = vmatmul.mubr.msk.bf16.vlgmr.msra.gmra.mxu0 %vm620_vm2, %v1544_v55 }
 0x382   :  { %5780 = vmatprep.mubr.msk.bf16.mxu0 %vm6638_vm1, %v8302_v49  ;;  %v1809_v37 = vpop.permute.xlu0 %1808 }
 0x386   :  { %v1862_v62 = vpop.permute.xlu0 %1861 }
 0x39f   :  { %v1141_v39 = vpop.xlane.xlu1 %1140 }
 0x3a0   :  { %6255 = vrcp.f32 %v1141_v39 }
 0x3a3   :  { %v1653_v47 = vpop.permute.xlu1 %1652 }
 0x3a4   :  { %v1658_v58 = vsel %vm620_vm2, %v1653_v47, 0 }
 0x3a5   :  { %5779 = vmatpush3.bf16.xpose.msra.mxu0 %v1658_v58 }
 0x3a6   :  { %5790 = vmatprep.subr.bf16.mxu0 %v8302_v49 }
 0x3a7   :  { %v1706_v17 = vpop.permute.xlu1 %1705 }
 0x3ab   :  { %v1759_v11 = vpop.permute.xlu1 %1758 }
 0x3ac   :  { %v1764_v27 = vsel %vm620_vm2, %v1759_v11, 0  ;;  %5781 = vmatmul.mubr.msk.bf16.vlgmr.msra.gmra.mxu0 %vm620_vm2, %v1650_v5 }
 0x3ad   :  { %v6256_v7 = vpop.eup %6255  ;;  %5791 = vmatpush3.bf16.xpose.msra.mxu0 %v1764_v27  ;;  %5792 = vmatprep.mubr.msk.bf16.mxu0 %vm6638_vm1, %v8302_v49 }
 0x3ae   :  { %v1173_v10 = vmul.f32 %v6256_v7, %v7097_v43  ;;  %5802 = vmatprep.subr.bf16.mxu0 %v8302_v49  ;;  %v1711_v43 = vsel %vm620_vm2, %v1706_v17, 0 }
 0x3af   :  { %v1812_v22 = vpop.permute.xlu1 %1811 }
 0x3b0   :  { %v1181_v31 = vpack.c.bf16 %v1173_v10, %v1172_v24  ;;  %v1817_v25 = vsel %vm620_vm2, %v1812_v22, 0 }
 0x3b2   :  { %5763 = vmatmul.mubr.msk.bf16.vlgmr.msra.gmra.mxu1 %vm997_vm3, %v1181_v31 }
 0x3b3   :  { %5773 = vmatpush3.bf16.xpose.msra.mxu1 %v1605_v38  ;;  %v1865_v18 = vpop.permute.xlu1 %1864  ;;  %5774 = vmatprep.mubr.msk.bf16.mxu1 %vm6638_vm1, %v8302_v49 }
 0x3b4   :  { %v1870_v56 = vsel %vm620_vm2, %v1865_v18, 0  ;;  %5793 = vmatmul.mubr.msk.bf16.vlgmr.msra.gmra.mxu0 %vm620_vm2, %v1756_v57  ;;  %5784 = vmatprep.subr.bf16.mxu1 %v8302_v49 }
 0x3b5   :  { %5803 = vmatpush3.bf16.xpose.msra.mxu0 %v1870_v56  ;;  %5804 = vmatprep.mubr.msk.bf16.mxu0 %vm6638_vm1, %v8302_v49 }
 0x3b6   :  { %5814 = vmatprep.subr.bf16.mxu0 %v8302_v49 }
 0x3b7   :  { %v1918_v35 = vpop.permute.xlu1 %1917 }
 0x3b8   :  { %v1923_v60 = vsel %vm620_vm2, %v1918_v35, 0 }
 0x3ba   :  { %5775 = vmatmul.mubr.msk.bf16.vlgmr.msra.gmra.mxu1 %vm620_vm2, %v1597_v16 }
 0x3bb   :  { %5785 = vmatpush3.bf16.xpose.msra.mxu1 %v1711_v43  ;;  %5786 = vmatprep.mubr.msk.bf16.mxu1 %vm6638_vm1, %v8302_v49  ;;  %v1915_v32 = vpop.permute.xlu1 %1914 }
 0x3bc   :  { %5805 = vmatmul.mubr.msk.bf16.vlgmr.msra.gmra.mxu0 %vm620_vm2, %v1862_v62  ;;  %5796 = vmatprep.subr.bf16.mxu1 %v8302_v49 }
 0x3bd   :  { %5816 = vmatprep.mubr.msk.bf16.mxu0 %vm6638_vm1, %v8302_v49 }
 0x3c2   :  { %5787 = vmatmul.mubr.msk.bf16.vlgmr.msra.gmra.mxu1 %vm620_vm2, %v1703_v1 }
 0x3c3   :  { %5797 = vmatpush3.bf16.xpose.msra.mxu1 %v1817_v25  ;;  %5798 = vmatprep.mubr.msk.bf16.mxu1 %vm6638_vm1, %v8302_v49 }
 0x3c4   :  { %5808 = vmatprep.subr.bf16.mxu1 %v8302_v49 }
 0x3ca   :  { %5799 = vmatmul.mubr.msk.bf16.vlgmr.msra.gmra.mxu1 %vm620_vm2, %v1809_v37 }
 0x3cb   :  { %5809 = vmatpush3.bf16.xpose.msra.mxu1 %v1923_v60  ;;  %5810 = vmatprep.mubr.msk.bf16.mxu1 %vm6638_vm1, %v8302_v49 }
 0x3cc   :  { %5820 = vmatprep.subr.bf16.mxu1 %v8302_v49 }
 0x3d2   :  { %5811 = vmatmul.mubr.msk.bf16.vlgmr.msra.gmra.mxu1 %vm620_vm2, %v1915_v32 }
 0x3d3   :  { %5822 = vmatprep.mubr.msk.bf16.mxu1 %vm6638_vm1, %v8302_v49 }
 0x409   :  { %v7207_v8 = vpop.f32.mrf.mxu0 }
 0x40a   :  { %8333 = vst [vmem:[#allocation22_spill] sm:$0xff] %v7207_v8 }
 0x40b   :  { %v5722_v40 = vpop.f32.mrf.mxu0 }
 0x40d   :  { %v7209_v6 = vpop.f32.mrf.mxu0 }
 0x40e   :  { %8334 = vst [vmem:[#allocation23_spill] sm:$0xff] %v7209_v6 }
 0x40f   :  { %v5723_v44 = vpop.f32.mrf.mxu0 }
 0x411   :  { %v7213_v23 = vpop.f32.mrf.mxu1 }
 0x412   :  { %8335 = vst [vmem:[#allocation24_spill] sm:$0xff] %v7213_v23 }
 0x413   :  { %v5728_v9 = vpop.f32.mrf.mxu1 }
 0x415   :  { %v7215_v33 = vpop.f32.mrf.mxu1 }
 0x416   :  { %8336 = vst [vmem:[#allocation25_spill] sm:$0xff] %v7215_v33 }
 0x417   :  { %v5729_v55 = vpop.f32.mrf.mxu1 }
 0x419   :  { %v7219_v16 = vpop.f32.mrf.mxu0 }
 0x41a   :  { %8337 = vst [vmem:[#allocation26_spill] sm:$0xff] %v7219_v16 }
 0x41b   :  { %v5734_v39 = vpop.f32.mrf.mxu0 }
 0x41d   :  { %v7221_v5 = vpop.f32.mrf.mxu0 }
 0x41e   :  { %8338 = vst [vmem:[#allocation27_spill] sm:$0xff] %v7221_v5 }
 0x41f   :  { %v5735_v58 = vpop.f32.mrf.mxu0 }
 0x421   :  { %v7225_v17 = vpop.f32.mrf.mxu1 }
 0x422   :  { %8339 = vst [vmem:[#allocation28_spill] sm:$0xff] %v7225_v17 }
 0x423   :  { %v5740_v1 = vpop.f32.mrf.mxu1 }
 0x425   :  { %v7227_v46 = vpop.f32.mrf.mxu1 }
 0x426   :  { %8340 = vst [vmem:[#allocation29_spill] sm:$0xff] %v7227_v46 }
 0x427   :  { %v5741_v27 = vpop.f32.mrf.mxu1 }
 0x429   :  { %v7231_v7 = vpop.f32.mrf.mxu0 }
 0x42a   :  { %8341 = vst [vmem:[#allocation30_spill] sm:$0xff] %v7231_v7 }
 0x42b   :  { %v5746_v24 = vpop.f32.mrf.mxu0 }
 0x42d   :  { %v7233_v10 = vpop.f32.mrf.mxu0 }
 0x42e   :  { %8342 = vst [vmem:[#allocation31_spill] sm:$0xff] %v7233_v10 }
 0x42f   :  { %v5747_v22 = vpop.f32.mrf.mxu0 }
 0x431   :  { %v7237_v31 = vpop.f32.mrf.mxu1 }
 0x432   :  { %8343 = vst [vmem:[#allocation32_spill] sm:$0xff] %v7237_v31 }
 0x433   :  { %v5752_v38 = vpop.f32.mrf.mxu1 }
 0x435   :  { %v7239_v18 = vpop.f32.mrf.mxu1 }
 0x436   :  { %8344 = vst [vmem:[#allocation33_spill] sm:$0xff] %v7239_v18 }
 0x437   :  { %v5753_v37 = vpop.f32.mrf.mxu1 }
 0x439   :  { %v7243_v43 = vpop.f32.mrf.mxu0 }
 0x43a   :  { %8345 = vst [vmem:[#allocation34_spill] sm:$0xff] %v7243_v43 }
 0x43b   :  { %v5758_v62 = vpop.f32.mrf.mxu0 }
 0x43d   :  { %v7245_v25 = vpop.f32.mrf.mxu0 }
 0x43e   :  { %8346 = vst [vmem:[#allocation35_spill] sm:$0xff] %v7245_v25 }
 0x43f   :  { %v5759_v60 = vpop.f32.mrf.mxu0 }
 0x441   :  { %v7249_v32 = vpop.f32.mrf.mxu0 }
 0x442   :  { %v1966_v40 = vsel %vm997_vm3, %v7249_v32, -inf }
 0x443   :  { %1967 = vmax.xlane.f32.xlu0 %v1966_v40  ;;  %v5770_v44 = vpop.f32.mrf.mxu0 }
 0x445   :  { %v7253_v9 = vpop.f32.mrf.mxu0 }
 0x446   :  { %v1969_v55 = vsel %vm997_vm3, %v7253_v9, -inf }
 0x447   :  { %1970 = vmax.xlane.f32.xlu1 %v1969_v55  ;;  %v5771_v39 = vpop.f32.mrf.mxu0 }
 0x46c   :  { %v7257_v58 = vpop.f32.mrf.mxu0 }
 0x46d   :  { %v1978_v47 = vsel %vm997_vm3, %v7257_v58, -inf }
 0x46e   :  { %v5782_v1 = vpop.f32.mrf.mxu0 }
 0x470   :  { %v7259_v27 = vpop.f32.mrf.mxu0 }
 0x471   :  { %v1981_v24 = vsel %vm997_vm3, %v7259_v27, -inf }
 0x472   :  { %1982 = vmax.xlane.f32.xlu1 %v1981_v24  ;;  %v7263_v22 = vpop.f32.mrf.mxu1  ;;  %v5783_v38 = vpop.f32.mrf.mxu0 }
 0x473   :  { %8347 = vst [vmem:[#allocation36_spill] sm:$0xff] %v7263_v22 }
 0x474   :  { %v5764_v37 = vpop.f32.mrf.mxu1  ;;  %v7265_v62 = vpop.f32.mrf.mxu0 }
 0x476   :  { %v7267_v60 = vpop.f32.mrf.mxu1  ;;  %v5794_v40 = vpop.f32.mrf.mxu0 }
 0x477   :  { %8348 = vst [vmem:[#allocation37_spill] sm:$0xff] %v7267_v60 }
 0x478   :  { %v5765_v55 = vpop.f32.mrf.mxu1  ;;  %v7271_v39 = vpop.f32.mrf.mxu0 }
 0x47a   :  { %v7273_v1 = vpop.f32.mrf.mxu1  ;;  %v5795_v35 = vpop.f32.mrf.mxu0 }
 0x47b   :  { %v1972_v24 = vsel %vm997_vm3, %v7273_v1, -inf }
 0x47c   :  { %v7277_v56 = vpop.f32.mrf.mxu0  ;;  %1973 = vmax.xlane.f32.xlu0 %v1972_v24  ;;  %v5776_v38 = vpop.f32.mrf.mxu1 }
 0x47d   :  { %v2002_v49 = vsel %vm997_vm3, %v7277_v56, -inf }
 0x47e   :  { %v7279_v37 = vpop.f32.mrf.mxu1  ;;  %v5806_v57 = vpop.f32.mrf.mxu0 }
 0x47f   :  { %v1975_v40 = vsel %vm997_vm3, %v7279_v37, -inf }
 0x480   :  { %v7283_v44 = vpop.f32.mrf.mxu0  ;;  %1976 = vmax.xlane.f32.xlu0 %v1975_v40  ;;  %v5777_v55 = vpop.f32.mrf.mxu1 }
 0x482   :  { %v7285_v11 = vpop.f32.mrf.mxu1  ;;  %v5807_v35 = vpop.f32.mrf.mxu0 }
 0x483   :  { %v1984_v57 = vsel %vm997_vm3, %v7285_v11, -inf  ;;  %v1990_v35 = vsel %vm997_vm3, %v7265_v62, -inf }
 0x484   :  { %1979 = vmax.xlane.f32.xlu0 %v1978_v47  ;;  %v5788_v51 = vpop.f32.mrf.mxu1  ;;  %v1993_v47 = vsel %vm997_vm3, %v7271_v39, -inf }
 0x486   :  { %v7289_v24 = vpop.f32.mrf.mxu1 }
 0x487   :  { %v1987_v38 = vsel %vm997_vm3, %v7289_v24, -inf }
 0x488   :  { %1985 = vmax.xlane.f32.xlu0 %v1984_v57  ;;  %1988 = vmax.xlane.f32.xlu1 %v1987_v38  ;;  %v5789_v40 = vpop.f32.mrf.mxu1 }
 0x48a   :  { %v7295_v55 = vpop.f32.mrf.mxu1 }
 0x48b   :  { %v1996_v0 = vsel %vm997_vm3, %v7295_v55, -inf }
 0x48c   :  { %1991 = vmax.xlane.f32.xlu0 %v1990_v35  ;;  %1994 = vmax.xlane.f32.xlu1 %v1993_v47  ;;  %v5800_v51 = vpop.f32.mrf.mxu1  ;;  %v2005_v35 = vsel %vm997_vm3, %v7283_v44, -inf }
 0x48e   :  { %v7301_v34 = vpop.f32.mrf.mxu1 }
 0x48f   :  { %v1999_v57 = vsel %vm997_vm3, %v7301_v34, -inf }
 0x490   :  { %1997 = vmax.xlane.f32.xlu0 %v1996_v0  ;;  %2000 = vmax.xlane.f32.xlu1 %v1999_v57  ;;  %v5801_v38 = vpop.f32.mrf.mxu1 }
 0x492   :  { %v7307_v40 = vpop.f32.mrf.mxu1 }
 0x493   :  { %v2008_v52 = vsel %vm997_vm3, %v7307_v40, -inf }
 0x494   :  { %2003 = vmax.xlane.f32.xlu0 %v2002_v49  ;;  %2006 = vmax.xlane.f32.xlu1 %v2005_v35  ;;  %v5812_v47 = vpop.f32.mrf.mxu1 }
 0x496   :  { %v7313_v51 = vpop.f32.mrf.mxu1 }
 0x497   :  { %v2011_v38 = vsel %vm997_vm3, %v7313_v51, -inf }
 0x498   :  { %2009 = vmax.xlane.f32.xlu0 %v2008_v52  ;;  %v5813_v0 = vpop.f32.mrf.mxu1 }
 0x4a5   :  { %2199 = vrot.lane.b32.xlu1 %v6931_v2, %s6639_s3 }
 0x4a9   :  { %2247 = vrot.lane.b32.xlu1 %v6844_v61, %s6639_s3 }
 0x4ad   :  { %2295 = vrot.lane.b32.xlu1 %v6835_v54, %s6639_s3 }
 0x4ae   :  { %2151 = vrot.lane.b32.xlu0 %v6819_v36, %s6639_s3 }
 0x4b1   :  { %2391 = vrot.lane.b32.xlu1 %v6858_v20, %s6639_s3 }
 0x4b2   :  { %2343 = vrot.lane.b32.xlu0 %v6867_v26, %s6639_s3 }
 0x4b6   :  { %2439 = vrot.lane.b32.xlu0 %v6890_v53, %s6639_s3 }
 0x4cc   :  { %v1968_v49 = vpop.xlane.xlu0 %1967 }
 0x4cd   :  { %v2014_v52 = vsub.f32 %v7249_v32, %v1968_v49 }
 0x4cf   :  { %v2030_v57 = vmul.f32 1.442695, %v2014_v52 }
 0x4d0   :  { %v1971_v0 = vpop.xlane.xlu1 %1970 }
 0x4d1   :  { %6257 = vpow2.f32 %v2030_v57  ;;  %v2015_v59 = vsub.f32 %v7253_v9, %v1971_v0 }
 0x4d3   :  { %v2032_v43 = vmul.f32 1.442695, %v2015_v59 }
 0x4d5   :  { %2012 = vmax.xlane.f32.xlu1 %v2011_v38  ;;  %6259 = vpow2.f32 %v2032_v43 }
 0x4de   :  { %v7334_v35 = vpop.eup %6257 }
 0x4df   :  { %v2062_v47 = vsel %vm997_vm3, %v7334_v35, 0.0 }
 0x4e0   :  { %2063 = vadd.xlane.f32.xlu0 %v2062_v47 }
 0x4e2   :  { %v7341_v52 = vpop.eup %6259 }
 0x4e3   :  { %v2065_v47 = vsel %vm997_vm3, %v7341_v52, 0.0 }
 0x4e6   :  { %2487 = vrot.lane.b32.xlu1 %v6881_v45, %s6639_s3 }
 0x4fb   :  { %v1983_v32 = vpop.xlane.xlu1 %1982 }
 0x4fc   :  { %v2019_v38 = vsub.f32 %v7259_v27, %v1983_v32 }
 0x4fe   :  { %v2040_v9 = vmul.f32 1.442695, %v2019_v38 }
 0x505   :  { %v1974_v49 = vpop.xlane.xlu0 %1973 }
 0x506   :  { %v2016_v57 = vsub.f32 %v7273_v1, %v1974_v49 }
 0x508   :  { %v2034_v25 = vmul.f32 1.442695, %v2016_v57 }
 0x509   :  { %v1977_v31 = vpop.xlane.xlu0 %1976 }
 0x50a   :  { %6261 = vpow2.f32 %v2034_v25  ;;  %v2017_v18 = vsub.f32 %v7279_v37, %v1977_v31  ;;  %2066 = vadd.xlane.f32.xlu1 %v2065_v47 }
 0x50c   :  { %v2036_v59 = vmul.f32 1.442695, %v2017_v18 }
 0x50d   :  { %v1980_v43 = vpop.xlane.xlu0 %1979 }
 0x50e   :  { %6263 = vpow2.f32 %v2036_v59  ;;  %v2018_v0 = vsub.f32 %v7257_v58, %v1980_v43 }
 0x50f   :  { %6265 = vpow2.f32 %v2040_v9 }
 0x510   :  { %v2038_v22 = vmul.f32 1.442695, %v2018_v0 }
 0x511   :  { %v1986_v1 = vpop.xlane.xlu0 %1985  ;;  %v1989_v49 = vpop.xlane.xlu1 %1988 }
 0x512   :  { %6267 = vpow2.f32 %v2038_v22  ;;  %v2020_v27 = vsub.f32 %v7285_v11, %v1986_v1  ;;  %v2021_v32 = vsub.f32 %v7289_v24, %v1989_v49 }
 0x514   :  { %v2042_v57 = vmul.f32 1.442695, %v2020_v27  ;;  %v2044_v25 = vmul.f32 1.442695, %v2021_v32 }
 0x515   :  { %v1992_v60 = vpop.xlane.xlu0 %1991  ;;  %v1995_v31 = vpop.xlane.xlu1 %1994 }
 0x516   :  { %6269 = vpow2.f32 %v2042_v57  ;;  %v2022_v18 = vsub.f32 %v7265_v62, %v1992_v60  ;;  %v2023_v37 = vsub.f32 %v7271_v39, %v1995_v31 }
 0x517   :  { %v7353_v38 = vpop.eup %6261  ;;  %6271 = vpow2.f32 %v2044_v25 }
 0x518   :  { %v2046_v58 = vmul.f32 1.442695, %v2022_v18  ;;  %v2048_v47 = vmul.f32 1.442695, %v2023_v37  ;;  %v2068_v22 = vsel %vm997_vm3, %v7353_v38, 0.0 }
 0x519   :  { %v1998_v11 = vpop.xlane.xlu0 %1997  ;;  %v2001_v9 = vpop.xlane.xlu1 %2000  ;;  %2069 = vadd.xlane.f32.xlu0 %v2068_v22 }
 0x51a   :  { %6273 = vpow2.f32 %v2046_v58  ;;  %v2024_v24 = vsub.f32 %v7295_v55, %v1998_v11  ;;  %v2025_v59 = vsub.f32 %v7301_v34, %v2001_v9  ;;  %v8349_v58 = vmov 0.0  }
 0x51b   :  { %v7359_v43 = vpop.eup %6263  ;;  %6275 = vpow2.f32 %v2048_v47 }
 0x51c   :  { %v2050_v62 = vmul.f32 1.442695, %v2024_v24  ;;  %v2052_v60 = vmul.f32 1.442695, %v2025_v59  ;;  %v2071_v39 = vsel %vm997_vm3, %v7359_v43, 0.0  ;;  %v7363_v0 = vpop.eup %6265 }
 0x51d   :  { %v2004_v1 = vpop.xlane.xlu0 %2003  ;;  %v2007_v49 = vpop.xlane.xlu1 %2006  ;;  %2072 = vadd.xlane.f32.xlu1 %v2071_v39  ;;  %v2077_v31 = vsel %vm997_vm3, %v7363_v0, 0.0 }
 0x51e   :  { %6277 = vpow2.f32 %v2050_v62  ;;  %v2026_v27 = vsub.f32 %v7277_v56, %v2004_v1  ;;  %v2027_v55 = vsub.f32 %v7283_v44, %v2007_v49 }
 0x51f   :  { %v7367_v32 = vpop.eup %6267  ;;  %6279 = vpow2.f32 %v2052_v60 }
 0x520   :  { %v2054_v34 = vmul.f32 1.442695, %v2026_v27  ;;  %v2056_v57 = vmul.f32 1.442695, %v2027_v55  ;;  %v2074_v25 = vsel %vm997_vm3, %v7367_v32, 0.0 }
 0x521   :  { %v2200_v18 = vpop.permute.xlu1 %2199  ;;  %2075 = vadd.xlane.f32.xlu0 %v2074_v25  ;;  %v2010_v37 = vpop.xlane.xlu0 %2009  ;;  %2078 = vadd.xlane.f32.xlu1 %v2077_v31 }
 0x522   :  { %6281 = vpow2.f32 %v2054_v34  ;;  %v2028_v56 = vsub.f32 %v7307_v40, %v2010_v37  ;;  %5821 = vmatpush3.bf16.msra.mxu1 %v2200_v18 }
 0x523   :  { %v7374_v44 = vpop.eup %6269  ;;  %6283 = vpow2.f32 %v2056_v57  ;;  %5832 = vmatprep.subr.bf16.mxu1 %v8349_v58 }
 0x524   :  { %v7377_v47 = vpop.eup %6271  ;;  %v2058_v22 = vmul.f32 1.442695, %v2028_v56  ;;  %v2080_v11 = vsel %vm997_vm3, %v7374_v44, 0.0 }
 0x525   :  { %2081 = vadd.xlane.f32.xlu0 %v2080_v11  ;;  %v2152_v9 = vpop.permute.xlu0 %2151  ;;  %v2083_v24 = vsel %vm997_vm3, %v7377_v47, 0.0  ;;  %v2248_v37 = vpop.permute.xlu1 %2247 }
 0x526   :  { %6285 = vpow2.f32 %v2058_v22  ;;  %2084 = vadd.xlane.f32.xlu1 %v2083_v24  ;;  %5815 = vmatpush3.bf16.msra.mxu0 %v2152_v9 }
 0x527   :  { %v7383_v40 = vpop.eup %6273  ;;  %5826 = vmatprep.subr.bf16.mxu0 %v8349_v58 }
 0x528   :  { %v7386_v59 = vpop.eup %6275  ;;  %v2086_v62 = vsel %vm997_vm3, %v7383_v40, 0.0 }
 0x529   :  { %2087 = vadd.xlane.f32.xlu0 %v2086_v62  ;;  %v2089_v60 = vsel %vm997_vm3, %v7386_v59, 0.0  ;;  %v7420_v56 = vpop.permute.xlu1 %2295 }
 0x52a   :  { %2090 = vadd.xlane.f32.xlu1 %v2089_v60 }
 0x52b   :  { %v7392_v39 = vpop.eup %6277 }
 0x52c   :  { %v7394_v1 = vpop.eup %6279  ;;  %v2092_v49 = vsel %vm997_vm3, %v7392_v39, 0.0 }
 0x52d   :  { %2093 = vadd.xlane.f32.xlu0 %v2092_v49  ;;  %v2095_v27 = vsel %vm997_vm3, %v7394_v1, 0.0  ;;  %v7424_v22 = vpop.permute.xlu1 %2391 }
 0x52e   :  { %2096 = vadd.xlane.f32.xlu1 %v2095_v27 }
 0x52f   :  { %v7400_v55 = vpop.eup %6281 }
 0x530   :  { %v7402_v34 = vpop.eup %6283  ;;  %v2098_v57 = vsel %vm997_vm3, %v7400_v55, 0.0 }
 0x531   :  { %2099 = vadd.xlane.f32.xlu0 %v2098_v57  ;;  %v2101_v25 = vsel %vm997_vm3, %v7402_v34, 0.0 }
 0x532   :  { %2102 = vadd.xlane.f32.xlu1 %v2101_v25 }
 0x533   :  { %v7408_v31 = vpop.eup %6285 }
 0x534   :  { %v2104_v18 = vsel %vm997_vm3, %v7408_v31, 0.0 }
 0x535   :  { %2105 = vadd.xlane.f32.xlu0 %v2104_v18 }
 0x543   :  { %2595 = vrot.lane.b32.xlu1 %v6788_v13, %s6625_s26 }
 0x54b   :  { %2544 = vrot.lane.b32.xlu0 %v6774_v63, %s6625_s26 }
 0x54f   :  { %2542 = vrot.lane.b32.xlu0 %v6786_v12, %s6625_s26 }
 0x553   :  { %2593 = vrot.lane.b32.xlu0 %v6808_v28, %s6625_s26 }
 0x557   :  { %2644 = vrot.lane.b32.xlu0 %v6831_v48, %s6625_s26 }
 0x55b   :  { %2695 = vrot.lane.b32.xlu0 %v6854_v14, %s6625_s26 }
 0x55e   :  { %v2013_v11 = vpop.xlane.xlu1 %2012 }
 0x55f   :  { %v2029_v9 = vsub.f32 %v7313_v51, %v2013_v11  ;;  %2746 = vrot.lane.b32.xlu0 %v6877_v41, %s6625_s26  ;;  %v7441_v51 = vpop.permute.xlu0 %2343 }
 0x561   :  { %v2060_v24 = vmul.f32 1.442695, %v2029_v9 }
 0x562   :  { %v7449_v27 = vpop.permute.xlu1 %2487 }
 0x563   :  { %6287 = vpow2.f32 %v2060_v24  ;;  %2797 = vrot.lane.b32.xlu0 %v6897_v3, %s6625_s26  ;;  %v7445_v49 = vpop.permute.xlu0 %2439 }
 0x567   :  { %2848 = vrot.lane.b32.xlu0 %v6912_v19, %s6625_s26 }
 0x569   :  { %v2064_v57 = vpop.xlane.xlu0 %2063 }
 0x56a   :  { %6289 = vrcp.f32 %v2064_v57 }
 0x570   :  { %v7435_v62 = vpop.eup %6287 }
 0x571   :  { %v2107_v60 = vsel %vm997_vm3, %v7435_v62, 0.0 }
 0x572   :  { %2108 = vadd.xlane.f32.xlu1 %v2107_v60 }
 0x577   :  { %v6290_v18 = vpop.eup %6289 }
 0x578   :  { %v2126_v24 = vmul.f32 %v6290_v18, %v7334_v35 }
 0x583   :  { %2646 = vrot.lane.b32.xlu1 %v6810_v29, %s6625_s26 }
 0x587   :  { %2697 = vrot.lane.b32.xlu1 %v6833_v50, %s6625_s26 }
 0x58b   :  { %2748 = vrot.lane.b32.xlu1 %v6856_v15, %s6625_s26 }
 0x58f   :  { %2799 = vrot.lane.b32.xlu1 %v6879_v42, %s6625_s26 }
 0x593   :  { %2850 = vrot.lane.b32.xlu1 %v6899_v4, %s6625_s26  ;;  %v2067_v25 = vpop.xlane.xlu1 %2066 }
 0x594   :  { %6291 = vrcp.f32 %v2067_v25 }
 0x597   :  { %2901 = vrot.lane.b32.xlu1 %v6914_v21, %s6625_s26 }
 0x59b   :  { %2899 = vrot.lane.b32.xlu1 %v6929_v30, %s6625_s26 }
 0x5a1   :  { %v6292_v11 = vpop.eup %6291 }
 0x5a2   :  { %v2070_v9 = vpop.xlane.xlu0 %2069  ;;  %v2127_v60 = vmul.f32 %v6292_v11, %v7341_v52 }
 0x5a3   :  { %6293 = vrcp.f32 %v2070_v9 }
 0x5a4   :  { %v2142_v7 = vpack.c.bf16 %v2127_v60, %v2126_v24 }
 0x5a6   :  { %5817 = vmatmul.mubr.msk.bf16.vlgmr.msra.gmra.mxu0 %vm997_vm3, %v2142_v7  ;;  %v2073_v57 = vpop.xlane.xlu1 %2072 }
 0x5a7   :  { %5827 = vmatpush3.bf16.msra.mxu0 %v2248_v37  ;;  %6295 = vrcp.f32 %v2073_v57  ;;  %5828 = vmatprep.mubr.msk.bf16.mxu0 %vm6638_vm1, %v8349_v58 }
 0x5a8   :  { %5838 = vmatprep.subr.bf16.mxu0 %v8349_v58 }
 0x5aa   :  { %v2076_v25 = vpop.xlane.xlu0 %2075  ;;  %v2079_v10 = vpop.xlane.xlu1 %2078 }
 0x5ab   :  { %6297 = vrcp.f32 %v2076_v25 }
 0x5ac   :  { %6299 = vrcp.f32 %v2079_v10 }
 0x5ae   :  { %v2082_v17 = vpop.xlane.xlu0 %2081 }
 0x5af   :  { %6301 = vrcp.f32 %v2082_v17  ;;  %v2085_v35 = vpop.xlane.xlu1 %2084 }
 0x5b0   :  { %6303 = vrcp.f32 %v2085_v35  ;;  %v6294_v52 = vpop.eup %6293 }
 0x5b1   :  { %v2128_v37 = vmul.f32 %v6294_v52, %v7353_v38 }
 0x5b2   :  { %v2088_v18 = vpop.xlane.xlu0 %2087 }
 0x5b3   :  { %6305 = vrcp.f32 %v2088_v18  ;;  %v2091_v7 = vpop.xlane.xlu1 %2090 }
 0x5b4   :  { %v6296_v11 = vpop.eup %6295  ;;  %6307 = vrcp.f32 %v2091_v7 }
 0x5b5   :  { %v2129_v9 = vmul.f32 %v6296_v11, %v7359_v43 }
 0x5b6   :  { %v2094_v24 = vpop.xlane.xlu0 %2093 }
 0x5b7   :  { %6309 = vrcp.f32 %v2094_v24  ;;  %v2097_v60 = vpop.xlane.xlu1 %2096  ;;  %v2143_v57 = vpack.c.bf16 %v2129_v9, %v2128_v37 }
 0x5b8   :  { %v6298_v25 = vpop.eup %6297  ;;  %6311 = vrcp.f32 %v2097_v60 }
 0x5b9   :  { %v6300_v10 = vpop.eup %6299  ;;  %5823 = vmatmul.mubr.msk.bf16.vlgmr.msra.gmra.mxu1 %vm997_vm3, %v2143_v57  ;;  %v2130_v17 = vmul.f32 %v6298_v25, %v7367_v32 }
 0x5ba   :  { %5833 = vmatpush3.bf16.msra.mxu1 %v7420_v56  ;;  %v2100_v35 = vpop.xlane.xlu0 %2099  ;;  %v2131_v18 = vmul.f32 %v6300_v10, %v7363_v0  ;;  %5834 = vmatprep.mubr.msk.bf16.mxu1 %vm6638_vm1, %v8349_v58 }
 0x5bb   :  { %6313 = vrcp.f32 %v2100_v35  ;;  %v2103_v38 = vpop.xlane.xlu1 %2102  ;;  %5844 = vmatprep.subr.bf16.mxu1 %v8349_v58 }
 0x5bc   :  { %v6302_v43 = vpop.eup %6301  ;;  %6315 = vrcp.f32 %v2103_v38  ;;  %v2144_v52 = vpack.c.bf16 %v2131_v18, %v2130_v17 }
 0x5bd   :  { %v6304_v7 = vpop.eup %6303  ;;  %v2132_v11 = vmul.f32 %v6302_v43, %v7374_v44 }
 0x5be   :  { %5829 = vmatmul.mubr.msk.bf16.vlgmr.msra.gmra.mxu0 %vm997_vm3, %v2144_v52  ;;  %v2133_v32 = vmul.f32 %v6304_v7, %v7377_v47  ;;  %v2106_v60 = vpop.xlane.xlu0 %2105 }
 0x5bf   :  { %5839 = vmatpush3.bf16.msra.mxu0 %v7441_v51  ;;  %5840 = vmatprep.mubr.msk.bf16.mxu0 %vm6638_vm1, %v8349_v58  ;;  %6317 = vrcp.f32 %v2106_v60 }
 0x5c0   :  { %v6306_v0 = vpop.eup %6305  ;;  %v2145_v56 = vpack.c.bf16 %v2133_v32, %v2132_v11  ;;  %5850 = vmatprep.subr.bf16.mxu0 %v8349_v58 }
 0x5c1   :  { %v6308_v37 = vpop.eup %6307  ;;  %v2134_v9 = vmul.f32 %v6306_v0, %v7383_v40 }
 0x5c2   :  { %5835 = vmatmul.mubr.msk.bf16.vlgmr.msra.gmra.mxu1 %vm997_vm3, %v2145_v56  ;;  %v2135_v44 = vmul.f32 %v6308_v37, %v7386_v59  ;;  %v2545_v17 = vpop.permute.xlu0 %2544 }
 0x5c3   :  { %5845 = vmatpush3.bf16.msra.mxu1 %v7424_v22  ;;  %5846 = vmatprep.mubr.msk.bf16.mxu1 %vm6638_vm1, %v8349_v58 }
 0x5c4   :  { %v6310_v47 = vpop.eup %6309  ;;  %v2146_v51 = vpack.c.bf16 %v2135_v44, %v2134_v9  ;;  %5856 = vmatprep.subr.bf16.mxu1 %v8349_v58 }
 0x5c5   :  { %v6312_v24 = vpop.eup %6311  ;;  %v2136_v57 = vmul.f32 %v6310_v47, %v7392_v39 }
 0x5c6   :  { %5841 = vmatmul.mubr.msk.bf16.vlgmr.msra.gmra.mxu0 %vm997_vm3, %v2146_v51  ;;  %v2137_v40 = vmul.f32 %v6312_v24, %v7394_v1 }
 0x5c7   :  { %5851 = vmatpush3.bf16.msra.mxu0 %v7445_v49  ;;  %5852 = vmatprep.mubr.msk.bf16.mxu0 %vm6638_vm1, %v8349_v58  ;;  %v2550_v49 = vsel %vm620_vm2, %v2545_v17, 0 }
 0x5c8   :  { %v6314_v59 = vpop.eup %6313  ;;  %v2147_v22 = vpack.c.bf16 %v2137_v40, %v2136_v57  ;;  %5862 = vmatprep.subr.bf16.mxu0 %v8349_v58 }
 0x5c9   :  { %v6316_v25 = vpop.eup %6315  ;;  %v2138_v10 = vmul.f32 %v6314_v59, %v7400_v55  ;;  %v2543_v55 = vpop.permute.xlu0 %2542 }
 0x5ca   :  { %5847 = vmatmul.mubr.msk.bf16.vlgmr.msra.gmra.mxu1 %vm997_vm3, %v2147_v22  ;;  %v2139_v39 = vmul.f32 %v6316_v25, %v7402_v34  ;;  %v2596_v34 = vpop.permute.xlu1 %2595 }
 0x5cb   :  { %5857 = vmatpush3.bf16.msra.mxu1 %v7449_v27  ;;  %5858 = vmatprep.mubr.msk.bf16.mxu1 %vm6638_vm1, %v8349_v58  ;;  %v2601_v24 = vsel %vm620_vm2, %v2596_v34, 0 }
 0x5cc   :  { %v2148_v1 = vpack.c.bf16 %v2139_v39, %v2138_v10  ;;  %5868 = vmatprep.subr.bf16.mxu1 %v8349_v58  ;;  %v6318_v11 = vpop.eup %6317 }
 0x5cd   :  { %v2594_v27 = vpop.permute.xlu0 %2593  ;;  %v2140_v37 = vmul.f32 %v6318_v11, %v7408_v31 }
 0x5ce   :  { %5853 = vmatmul.mubr.msk.bf16.vlgmr.msra.gmra.mxu0 %vm997_vm3, %v2148_v1 }
 0x5cf   :  { %5863 = vmatpush3.bf16.xpose.msra.mxu0 %v2550_v49  ;;  %5864 = vmatprep.mubr.msk.bf16.mxu0 %vm6638_vm1, %v8349_v58 }
 0x5d0   :  { %5874 = vmatprep.subr.bf16.mxu0 %v8349_v58 }
 0x5d1   :  { %v2645_v18 = vpop.permute.xlu0 %2644 }
 0x5d5   :  { %v2696_v7 = vpop.permute.xlu0 %2695 }
 0x5d6   :  { %5865 = vmatmul.mubr.msk.bf16.vlgmr.msra.gmra.mxu0 %vm620_vm2, %v2543_v55 }
 0x5d7   :  { %5876 = vmatprep.mubr.msk.bf16.mxu0 %vm6638_vm1, %v8349_v58 }
 0x5d9   :  { %v2747_v44 = vpop.permute.xlu0 %2746 }
 0x5dd   :  { %v2798_v31 = vpop.permute.xlu0 %2797 }
 0x5e1   :  { %v2849_v40 = vpop.permute.xlu0 %2848 }
 0x5fb   :  { %v2109_v35 = vpop.xlane.xlu1 %2108 }
 0x5fc   :  { %6319 = vrcp.f32 %v2109_v35 }
 0x5ff   :  { %v2647_v38 = vpop.permute.xlu1 %2646 }
 0x600   :  { %v2652_v43 = vsel %vm620_vm2, %v2647_v38, 0 }
 0x601   :  { %5875 = vmatpush3.bf16.xpose.msra.mxu0 %v2652_v43 }
 0x602   :  { %5886 = vmatprep.subr.bf16.mxu0 %v8349_v58 }
 0x603   :  { %v2698_v52 = vpop.permute.xlu1 %2697 }
 0x607   :  { %v2749_v32 = vpop.permute.xlu1 %2748 }
 0x608   :  { %v2754_v0 = vsel %vm620_vm2, %v2749_v32, 0  ;;  %5877 = vmatmul.mubr.msk.bf16.vlgmr.msra.gmra.mxu0 %vm620_vm2, %v2645_v18 }
 0x609   :  { %v6320_v56 = vpop.eup %6319  ;;  %5887 = vmatpush3.bf16.xpose.msra.mxu0 %v2754_v0  ;;  %5888 = vmatprep.mubr.msk.bf16.mxu0 %vm6638_vm1, %v8349_v58 }
 0x60a   :  { %v2141_v9 = vmul.f32 %v6320_v56, %v7435_v62  ;;  %5898 = vmatprep.subr.bf16.mxu0 %v8349_v58  ;;  %v2703_v62 = vsel %vm620_vm2, %v2698_v52, 0 }
 0x60b   :  { %v2800_v47 = vpop.permute.xlu1 %2799 }
 0x60c   :  { %v2149_v51 = vpack.c.bf16 %v2141_v9, %v2140_v37  ;;  %v2805_v59 = vsel %vm620_vm2, %v2800_v47, 0 }
 0x60e   :  { %5859 = vmatmul.mubr.msk.bf16.vlgmr.msra.gmra.mxu1 %vm997_vm3, %v2149_v51 }
 0x60f   :  { %5869 = vmatpush3.bf16.xpose.msra.mxu1 %v2601_v24  ;;  %v2851_v60 = vpop.permute.xlu1 %2850  ;;  %5870 = vmatprep.mubr.msk.bf16.mxu1 %vm6638_vm1, %v8349_v58 }
 0x610   :  { %v2856_v57 = vsel %vm620_vm2, %v2851_v60, 0  ;;  %5889 = vmatmul.mubr.msk.bf16.vlgmr.msra.gmra.mxu0 %vm620_vm2, %v2747_v44  ;;  %5880 = vmatprep.subr.bf16.mxu1 %v8349_v58 }
 0x611   :  { %5899 = vmatpush3.bf16.xpose.msra.mxu0 %v2856_v57  ;;  %5900 = vmatprep.mubr.msk.bf16.mxu0 %vm6638_vm1, %v8349_v58 }
 0x612   :  { %5910 = vmatprep.subr.bf16.mxu0 %v8349_v58 }
 0x613   :  { %v2902_v22 = vpop.permute.xlu1 %2901 }
 0x614   :  { %v2907_v25 = vsel %vm620_vm2, %v2902_v22, 0 }
 0x616   :  { %5871 = vmatmul.mubr.msk.bf16.vlgmr.msra.gmra.mxu1 %vm620_vm2, %v2594_v27 }
 0x617   :  { %5881 = vmatpush3.bf16.xpose.msra.mxu1 %v2703_v62  ;;  %5882 = vmatprep.mubr.msk.bf16.mxu1 %vm6638_vm1, %v8349_v58  ;;  %v2900_v10 = vpop.permute.xlu1 %2899 }
 0x618   :  { %5901 = vmatmul.mubr.msk.bf16.vlgmr.msra.gmra.mxu0 %vm620_vm2, %v2849_v40  ;;  %5892 = vmatprep.subr.bf16.mxu1 %v8349_v58 }
 0x619   :  { %5912 = vmatprep.mubr.msk.bf16.mxu0 %vm6638_vm1, %v8349_v58 }
 0x61e   :  { %5883 = vmatmul.mubr.msk.bf16.vlgmr.msra.gmra.mxu1 %vm620_vm2, %v2696_v7 }
 0x61f   :  { %5893 = vmatpush3.bf16.xpose.msra.mxu1 %v2805_v59  ;;  %5894 = vmatprep.mubr.msk.bf16.mxu1 %vm6638_vm1, %v8349_v58 }
 0x620   :  { %5904 = vmatprep.subr.bf16.mxu1 %v8349_v58 }
 0x626   :  { %5895 = vmatmul.mubr.msk.bf16.vlgmr.msra.gmra.mxu1 %vm620_vm2, %v2798_v31 }
 0x627   :  { %5905 = vmatpush3.bf16.xpose.msra.mxu1 %v2907_v25  ;;  %5906 = vmatprep.mubr.msk.bf16.mxu1 %vm6638_vm1, %v8349_v58 }
 0x628   :  { %5916 = vmatprep.subr.bf16.mxu1 %v8349_v58 }
 0x62e   :  { %5907 = vmatmul.mubr.msk.bf16.vlgmr.msra.gmra.mxu1 %vm620_vm2, %v2900_v10 }
 0x62f   :  { %5918 = vmatprep.mubr.msk.bf16.mxu1 %vm6638_vm1, %v8349_v58 }
 0x666   :  { %v7550_v39 = vpop.f32.mrf.mxu0 }
 0x668   :  { %v5818_v17 = vpop.f32.mrf.mxu0 }
 0x66a   :  { %v7552_v1 = vpop.f32.mrf.mxu0 }
 0x66c   :  { %v5819_v55 = vpop.f32.mrf.mxu0 }
 0x679   :  { %v7556_v34 = vpop.f32.mrf.mxu1 }
 0x67b   :  { %v5824_v27 = vpop.f32.mrf.mxu1 }
 0x67d   :  { %v7558_v35 = vpop.f32.mrf.mxu1 }
 0x67e   :  { %v7562_v38 = vpop.f32.mrf.mxu0 }
 0x67f   :  { %v5825_v43 = vpop.f32.mrf.mxu1 }
 0x680   :  { %v5830_v52 = vpop.f32.mrf.mxu0 }
 0x682   :  { %v7564_v7 = vpop.f32.mrf.mxu0  ;;  %v7566_v11 = vpop.f32.mrf.mxu1 }
 0x683   :  { %8350 = vst [vmem:[#allocation38_spill] sm:$0xff] %v7566_v11 }
 0x684   :  { %v5831_v0 = vpop.f32.mrf.mxu0  ;;  %v5836_v56 = vpop.f32.mrf.mxu1 }
 0x686   :  { %v7570_v37 = vpop.f32.mrf.mxu1  ;;  %v7572_v9 = vpop.f32.mrf.mxu0 }
 0x688   :  { %v5837_v47 = vpop.f32.mrf.mxu1  ;;  %v5842_v51 = vpop.f32.mrf.mxu0 }
 0x68a   :  { %v7576_v24 = vpop.f32.mrf.mxu0  ;;  %v7578_v60 = vpop.f32.mrf.mxu1 }
 0x68b   :  { %8351 = vst [vmem:[#allocation39_spill] sm:$0xff] %v7578_v60 }
 0x68c   :  { %v5843_v31 = vpop.f32.mrf.mxu0  ;;  %v5848_v62 = vpop.f32.mrf.mxu1 }
 0x68e   :  { %v7582_v40 = vpop.f32.mrf.mxu1  ;;  %v7584_v59 = vpop.f32.mrf.mxu0 }
 0x68f   :  { %8352 = vst [vmem:[#allocation40_spill] sm:$0xff] %v7582_v40  ;;  %8353 = vst [vmem:[#allocation41_spill] sm:$0xff] %v7584_v59 }
 0x690   :  { %v5849_v25 = vpop.f32.mrf.mxu1  ;;  %v5854_v10 = vpop.f32.mrf.mxu0 }
 0x692   :  { %v7588_v17 = vpop.f32.mrf.mxu0 }
 0x693   :  { %8354 = vst [vmem:[#allocation42_spill] sm:$0xff] %v7588_v17 }
 0x694   :  { %v5855_v27 = vpop.f32.mrf.mxu0 }
 0x696   :  { %v7592_v43 = vpop.f32.mrf.mxu0 }
 0x697   :  { %v2950_v52 = vsel %vm997_vm3, %v7592_v43, -inf }
 0x698   :  { %2951 = vmax.xlane.f32.xlu0 %v2950_v52  ;;  %v5866_v0 = vpop.f32.mrf.mxu0 }
 0x69a   :  { %v7596_v56 = vpop.f32.mrf.mxu0 }
 0x69b   :  { %v2953_v47 = vsel %vm997_vm3, %v7596_v56, -inf }
 0x69c   :  { %2954 = vmax.xlane.f32.xlu1 %v2953_v47  ;;  %v5867_v51 = vpop.f32.mrf.mxu0 }
 0x6c8   :  { %v7600_v31 = vpop.f32.mrf.mxu0 }
 0x6c9   :  { %v2962_v16 = vsel %vm997_vm3, %v7600_v31, -inf }
 0x6ca   :  { %v5878_v62 = vpop.f32.mrf.mxu0 }
 0x6cc   :  { %v7602_v25 = vpop.f32.mrf.mxu0 }
 0x6cd   :  { %v2965_v10 = vsel %vm997_vm3, %v7602_v25, -inf }
 0x6ce   :  { %2966 = vmax.xlane.f32.xlu1 %v2965_v10  ;;  %v7606_v27 = vpop.f32.mrf.mxu1  ;;  %v5879_v52 = vpop.f32.mrf.mxu0 }
 0x6cf   :  { %8355 = vst [vmem:[#allocation43_spill] sm:$0xff] %v7606_v27 }
 0x6d0   :  { %v5860_v0 = vpop.f32.mrf.mxu1  ;;  %v7608_v55 = vpop.f32.mrf.mxu0 }
 0x6d2   :  { %v7610_v22 = vpop.f32.mrf.mxu1  ;;  %v5890_v44 = vpop.f32.mrf.mxu0 }
 0x6d3   :  { %8356 = vst [vmem:[#allocation44_spill] sm:$0xff] %v7610_v22 }
 0x6d4   :  { %v5861_v51 = vpop.f32.mrf.mxu1  ;;  %v7614_v62 = vpop.f32.mrf.mxu0 }
 0x6d6   :  { %v7616_v18 = vpop.f32.mrf.mxu1  ;;  %v5891_v57 = vpop.f32.mrf.mxu0 }
 0x6d7   :  { %v2956_v10 = vsel %vm997_vm3, %v7616_v18, -inf }
 0x6d8   :  { %v7620_v32 = vpop.f32.mrf.mxu0  ;;  %2957 = vmax.xlane.f32.xlu0 %v2956_v10  ;;  %v5872_v52 = vpop.f32.mrf.mxu1 }
 0x6d9   :  { %v2986_v8 = vsel %vm997_vm3, %v7620_v32, -inf }
 0x6da   :  { %v7622_v0 = vpop.f32.mrf.mxu1  ;;  %v5902_v49 = vpop.f32.mrf.mxu0 }
 0x6db   :  { %v2959_v44 = vsel %vm997_vm3, %v7622_v0, -inf }
 0x6dc   :  { %v7626_v47 = vpop.f32.mrf.mxu0  ;;  %2960 = vmax.xlane.f32.xlu0 %v2959_v44  ;;  %v5873_v51 = vpop.f32.mrf.mxu1 }
 0x6de   :  { %v7628_v46 = vpop.f32.mrf.mxu1  ;;  %v5903_v57 = vpop.f32.mrf.mxu0 }
 0x6df   :  { %v2968_v49 = vsel %vm997_vm3, %v7628_v46, -inf  ;;  %v2974_v57 = vsel %vm997_vm3, %v7608_v55, -inf }
 0x6e0   :  { %2963 = vmax.xlane.f32.xlu0 %v2962_v16  ;;  %v5884_v5 = vpop.f32.mrf.mxu1  ;;  %v2977_v16 = vsel %vm997_vm3, %v7614_v62, -inf }
 0x6e2   :  { %v7632_v10 = vpop.f32.mrf.mxu1 }
 0x6e3   :  { %v2971_v52 = vsel %vm997_vm3, %v7632_v10, -inf }
 0x6e4   :  { %2969 = vmax.xlane.f32.xlu0 %v2968_v49  ;;  %2972 = vmax.xlane.f32.xlu1 %v2971_v52  ;;  %v5885_v44 = vpop.f32.mrf.mxu1 }
 0x6e6   :  { %v7638_v51 = vpop.f32.mrf.mxu1 }
 0x6e7   :  { %v2980_v33 = vsel %vm997_vm3, %v7638_v51, -inf }
 0x6e8   :  { %2975 = vmax.xlane.f32.xlu0 %v2974_v57  ;;  %2978 = vmax.xlane.f32.xlu1 %v2977_v16  ;;  %v5896_v5 = vpop.f32.mrf.mxu1  ;;  %v2989_v57 = vsel %vm997_vm3, %v7626_v47, -inf }
 0x6ea   :  { %v7644_v23 = vpop.f32.mrf.mxu1 }
 0x6eb   :  { %v2983_v49 = vsel %vm997_vm3, %v7644_v23, -inf }
 0x6ec   :  { %2981 = vmax.xlane.f32.xlu0 %v2980_v33  ;;  %2984 = vmax.xlane.f32.xlu1 %v2983_v49  ;;  %v5897_v52 = vpop.f32.mrf.mxu1 }
 0x6ee   :  { %v7650_v44 = vpop.f32.mrf.mxu1 }
 0x6ef   :  { %v2992_v6 = vsel %vm997_vm3, %v7650_v44, -inf }
 0x6f0   :  { %2987 = vmax.xlane.f32.xlu0 %v2986_v8  ;;  %2990 = vmax.xlane.f32.xlu1 %v2989_v57  ;;  %v5908_v16 = vpop.f32.mrf.mxu1 }
 0x6f2   :  { %v7656_v5 = vpop.f32.mrf.mxu1 }
 0x6f3   :  { %v2995_v52 = vsel %vm997_vm3, %v7656_v5, -inf }
 0x6f4   :  { %2993 = vmax.xlane.f32.xlu0 %v2992_v6  ;;  %v5909_v33 = vpop.f32.mrf.mxu1 }
 0x701   :  { %3181 = vrot.lane.b32.xlu1 %v6931_v2, %s6625_s26 }
 0x705   :  { %3228 = vrot.lane.b32.xlu1 %v6844_v61, %s6625_s26 }
 0x709   :  { %3275 = vrot.lane.b32.xlu1 %v6835_v54, %s6625_s26 }
 0x70a   :  { %3134 = vrot.lane.b32.xlu0 %v6819_v36, %s6625_s26 }
 0x70d   :  { %3369 = vrot.lane.b32.xlu1 %v6858_v20, %s6625_s26 }
 0x70e   :  { %3322 = vrot.lane.b32.xlu0 %v6867_v26, %s6625_s26 }
 0x712   :  { %3416 = vrot.lane.b32.xlu0 %v6890_v53, %s6625_s26 }
 0x721   :  { %v2952_v8 = vpop.xlane.xlu0 %2951 }
 0x722   :  { %v2998_v6 = vsub.f32 %v7592_v43, %v2952_v8 }
 0x724   :  { %v3014_v49 = vmul.f32 1.442695, %v2998_v6 }
 0x725   :  { %v2955_v33 = vpop.xlane.xlu1 %2954 }
 0x726   :  { %6321 = vpow2.f32 %v3014_v49  ;;  %v2999_v27 = vsub.f32 %v7596_v56, %v2955_v33 }
 0x728   :  { %v3016_v22 = vmul.f32 1.442695, %v2999_v27 }
 0x72a   :  { %6323 = vpow2.f32 %v3016_v22 }
 0x731   :  { %2996 = vmax.xlane.f32.xlu1 %v2995_v52 }
 0x733   :  { %v7677_v57 = vpop.eup %6321 }
 0x734   :  { %v3046_v16 = vsel %vm997_vm3, %v7677_v57, 0.0 }
 0x735   :  { %3047 = vadd.xlane.f32.xlu0 %v3046_v16 }
 0x737   :  { %v7684_v6 = vpop.eup %6323 }
 0x738   :  { %v3049_v16 = vsel %vm997_vm3, %v7684_v6, 0.0 }
 0x742   :  { %3463 = vrot.lane.b32.xlu1 %v6881_v45, %s6625_s26 }
 0x757   :  { %v2967_v43 = vpop.xlane.xlu1 %2966 }
 0x758   :  { %v3003_v52 = vsub.f32 %v7602_v25, %v2967_v43 }
 0x75a   :  { %v3024_v56 = vmul.f32 1.442695, %v3003_v52 }
 0x761   :  { %v2958_v8 = vpop.xlane.xlu0 %2957 }
 0x762   :  { %v3000_v49 = vsub.f32 %v7616_v18, %v2958_v8 }
 0x764   :  { %v3018_v59 = vmul.f32 1.442695, %v3000_v49 }
 0x765   :  { %v2961_v17 = vpop.xlane.xlu0 %2960 }
 0x766   :  { %6325 = vpow2.f32 %v3018_v59  ;;  %v3001_v60 = vsub.f32 %v7622_v0, %v2961_v17  ;;  %3050 = vadd.xlane.f32.xlu1 %v3049_v16 }
 0x768   :  { %v3020_v27 = vmul.f32 1.442695, %v3001_v60 }
 0x769   :  { %v2964_v22 = vpop.xlane.xlu0 %2963 }
 0x76a   :  { %6327 = vpow2.f32 %v3020_v27  ;;  %v3002_v33 = vsub.f32 %v7600_v31, %v2964_v22 }
 0x76b   :  { %6329 = vpow2.f32 %v3024_v56 }
 0x76c   :  { %v3022_v40 = vmul.f32 1.442695, %v3002_v33 }
 0x76d   :  { %v2970_v18 = vpop.xlane.xlu0 %2969  ;;  %v2973_v8 = vpop.xlane.xlu1 %2972 }
 0x76e   :  { %6331 = vpow2.f32 %v3022_v40  ;;  %v3004_v25 = vsub.f32 %v7628_v46, %v2970_v18  ;;  %v3005_v43 = vsub.f32 %v7632_v10, %v2973_v8 }
 0x770   :  { %v3026_v49 = vmul.f32 1.442695, %v3004_v25  ;;  %v3028_v59 = vmul.f32 1.442695, %v3005_v43 }
 0x771   :  { %v2976_v11 = vpop.xlane.xlu0 %2975  ;;  %v2979_v17 = vpop.xlane.xlu1 %2978 }
 0x772   :  { %6333 = vpow2.f32 %v3026_v49  ;;  %v3006_v60 = vsub.f32 %v7608_v55, %v2976_v11  ;;  %v3007_v0 = vsub.f32 %v7614_v62, %v2979_v17 }
 0x773   :  { %v7696_v52 = vpop.eup %6325  ;;  %6335 = vpow2.f32 %v3028_v59 }
 0x774   :  { %v3030_v31 = vmul.f32 1.442695, %v3006_v60  ;;  %v3032_v16 = vmul.f32 1.442695, %v3007_v0  ;;  %v3052_v40 = vsel %vm997_vm3, %v7696_v52, 0.0 }
 0x775   :  { %v2982_v46 = vpop.xlane.xlu0 %2981  ;;  %v2985_v56 = vpop.xlane.xlu1 %2984  ;;  %3053 = vadd.xlane.f32.xlu0 %v3052_v40 }
 0x776   :  { %6337 = vpow2.f32 %v3030_v31  ;;  %v3008_v10 = vsub.f32 %v7638_v51, %v2982_v46  ;;  %v3009_v27 = vsub.f32 %v7644_v23, %v2985_v56 }
 0x777   :  { %v7702_v22 = vpop.eup %6327  ;;  %6339 = vpow2.f32 %v3032_v16 }
 0x778   :  { %v3034_v11 = vmul.f32 1.442695, %v3008_v10  ;;  %v3036_v55 = vmul.f32 1.442695, %v3009_v27  ;;  %v3055_v62 = vsel %vm997_vm3, %v7702_v22, 0.0  ;;  %v7706_v33 = vpop.eup %6329 }
 0x779   :  { %v2988_v18 = vpop.xlane.xlu0 %2987  ;;  %v2991_v8 = vpop.xlane.xlu1 %2990  ;;  %3056 = vadd.xlane.f32.xlu1 %v3055_v62  ;;  %v3061_v17 = vsel %vm997_vm3, %v7706_v33, 0.0 }
 0x77a   :  { %6341 = vpow2.f32 %v3034_v11  ;;  %v3010_v25 = vsub.f32 %v7620_v32, %v2988_v18  ;;  %v3011_v51 = vsub.f32 %v7626_v47, %v2991_v8 }
 0x77b   :  { %v7710_v43 = vpop.eup %6331  ;;  %6343 = vpow2.f32 %v3036_v55 }
 0x77c   :  { %v3038_v23 = vmul.f32 1.442695, %v3010_v25  ;;  %v3040_v49 = vmul.f32 1.442695, %v3011_v51  ;;  %v3058_v59 = vsel %vm997_vm3, %v7710_v43, 0.0 }
 0x77d   :  { %v3182_v60 = vpop.permute.xlu1 %3181  ;;  %3059 = vadd.xlane.f32.xlu0 %v3058_v59  ;;  %v2994_v0 = vpop.xlane.xlu0 %2993  ;;  %3062 = vadd.xlane.f32.xlu1 %v3061_v17 }
 0x77e   :  { %6345 = vpow2.f32 %v3038_v23  ;;  %v3012_v32 = vsub.f32 %v7650_v44, %v2994_v0  ;;  %5917 = vmatpush3.bf16.msra.mxu1 %v3182_v60 }
 0x77f   :  { %v7717_v47 = vpop.eup %6333  ;;  %6347 = vpow2.f32 %v3040_v49  ;;  %5928 = vmatprep.subr.bf16.mxu1 %v8349_v58 }
 0x780   :  { %v7720_v31 = vpop.eup %6335  ;;  %v3042_v16 = vmul.f32 1.442695, %v3012_v32  ;;  %v3064_v40 = vsel %vm997_vm3, %v7717_v47, 0.0 }
 0x781   :  { %3065 = vadd.xlane.f32.xlu0 %v3064_v40  ;;  %v3135_v46 = vpop.permute.xlu0 %3134  ;;  %v3067_v56 = vsel %vm997_vm3, %v7720_v31, 0.0  ;;  %v3229_v60 = vpop.permute.xlu1 %3228 }
 0x782   :  { %6349 = vpow2.f32 %v3042_v16  ;;  %3068 = vadd.xlane.f32.xlu1 %v3067_v56  ;;  %5911 = vmatpush3.bf16.msra.mxu0 %v3135_v46 }
 0x783   :  { %v7726_v44 = vpop.eup %6337  ;;  %5922 = vmatprep.subr.bf16.mxu0 %v8349_v58 }
 0x784   :  { %v7729_v10 = vpop.eup %6339  ;;  %v3070_v27 = vsel %vm997_vm3, %v7726_v44, 0.0 }
 0x785   :  { %3071 = vadd.xlane.f32.xlu0 %v3070_v27  ;;  %v3073_v11 = vsel %vm997_vm3, %v7729_v10, 0.0  ;;  %v7763_v0 = vpop.permute.xlu1 %3275 }
 0x786   :  { %3074 = vadd.xlane.f32.xlu1 %v3073_v11 }
 0x787   :  { %v7735_v55 = vpop.eup %6341 }
 0x788   :  { %v7737_v62 = vpop.eup %6343  ;;  %v3076_v18 = vsel %vm997_vm3, %v7735_v55, 0.0 }
 0x789   :  { %3077 = vadd.xlane.f32.xlu0 %v3076_v18  ;;  %v3079_v8 = vsel %vm997_vm3, %v7737_v62, 0.0  ;;  %v7767_v32 = vpop.permute.xlu1 %3369 }
 0x78a   :  { %3080 = vadd.xlane.f32.xlu1 %v3079_v8 }
 0x78b   :  { %v7743_v25 = vpop.eup %6345 }
 0x78c   :  { %v7745_v51 = vpop.eup %6347  ;;  %v3082_v23 = vsel %vm997_vm3, %v7743_v25, 0.0 }
 0x78d   :  { %3083 = vadd.xlane.f32.xlu0 %v3082_v23  ;;  %v3085_v49 = vsel %vm997_vm3, %v7745_v51, 0.0 }
 0x78e   :  { %3086 = vadd.xlane.f32.xlu1 %v3085_v49 }
 0x78f   :  { %v7751_v59 = vpop.eup %6349 }
 0x790   :  { %v3088_v17 = vsel %vm997_vm3, %v7751_v59, 0.0 }
 0x791   :  { %3089 = vadd.xlane.f32.xlu0 %v3088_v17 }
 0x79f   :  { %3571 = vrot.lane.b32.xlu1 %v6788_v13, %s6640_s27 }
 0x7a7   :  { %3520 = vrot.lane.b32.xlu0 %v6774_v63, %s6640_s27 }
 0x7ab   :  { %3518 = vrot.lane.b32.xlu0 %v6786_v12, %s6640_s27 }
 0x7af   :  { %3569 = vrot.lane.b32.xlu0 %v6808_v28, %s6640_s27 }
 0x7b3   :  { %3620 = vrot.lane.b32.xlu0 %v6831_v48, %s6640_s27 }
 0x7b7   :  { %3671 = vrot.lane.b32.xlu0 %v6854_v14, %s6640_s27  ;;  %v7784_v14 = vpop.permute.xlu0 %3322 }
 0x7ba   :  { %v2997_v13 = vpop.xlane.xlu1 %2996 }
 0x7bb   :  { %v3013_v63 = vsub.f32 %v7656_v5, %v2997_v13  ;;  %3722 = vrot.lane.b32.xlu0 %v6877_v41, %s6640_s27  ;;  %v7788_v41 = vpop.permute.xlu0 %3416 }
 0x7bd   :  { %v3044_v12 = vmul.f32 1.442695, %v3013_v63 }
 0x7bf   :  { %6351 = vpow2.f32 %v3044_v12  ;;  %3773 = vrot.lane.b32.xlu0 %v6897_v3, %s6640_s27  ;;  %v3048_v3 = vpop.xlane.xlu0 %3047 }
 0x7c0   :  { %6353 = vrcp.f32 %v3048_v3 }
 0x7c3   :  { %3824 = vrot.lane.b32.xlu0 %v6912_v19, %s6640_s27  ;;  %v7792_v19 = vpop.permute.xlu1 %3463 }
 0x7cc   :  { %v7778_v28 = vpop.eup %6351 }
 0x7cd   :  { %v3091_v48 = vsel %vm997_vm3, %v7778_v28, 0.0 }
 0x7ce   :  { %3092 = vadd.xlane.f32.xlu1 %v3091_v48 }
 0x7df   :  { %3622 = vrot.lane.b32.xlu1 %v6810_v29, %s6640_s27 }
 0x7e3   :  { %3673 = vrot.lane.b32.xlu1 %v6833_v50, %s6640_s27  ;;  %v6354_v50 = vpop.eup %6353 }
 0x7e4   :  { %v3110_v16 = vmul.f32 %v6354_v50, %v7677_v57 }
 0x7e7   :  { %3724 = vrot.lane.b32.xlu1 %v6856_v15, %s6640_s27 }
 0x7eb   :  { %3775 = vrot.lane.b32.xlu1 %v6879_v42, %s6640_s27 }
 0x7ef   :  { %3826 = vrot.lane.b32.xlu1 %v6899_v4, %s6640_s27  ;;  %v3051_v29 = vpop.xlane.xlu1 %3050 }
 0x7f0   :  { %6355 = vrcp.f32 %v3051_v29 }
 0x7f3   :  { %3877 = vrot.lane.b32.xlu1 %v6914_v21, %s6640_s27 }
 0x7f7   :  { %3875 = vrot.lane.b32.xlu1 %v6929_v30, %s6640_s27 }
 0x7fd   :  { %v6356_v15 = vpop.eup %6355 }
 0x7fe   :  { %v3054_v5 = vpop.xlane.xlu0 %3053  ;;  %v3111_v40 = vmul.f32 %v6356_v15, %v7684_v6 }
 0x7ff   :  { %6357 = vrcp.f32 %v3054_v5 }
 0x800   :  { %v3126_v42 = vpack.c.bf16 %v3111_v40, %v3110_v16 }
 0x802   :  { %5913 = vmatmul.mubr.msk.bf16.vlgmr.msra.gmra.mxu0 %vm997_vm3, %v3126_v42  ;;  %v3057_v4 = vpop.xlane.xlu1 %3056 }
 0x803   :  { %5923 = vmatpush3.bf16.msra.mxu0 %v3229_v60  ;;  %6359 = vrcp.f32 %v3057_v4  ;;  %5924 = vmatprep.mubr.msk.bf16.mxu0 %vm6638_vm1, %v8349_v58 }
 0x804   :  { %5934 = vmatprep.subr.bf16.mxu0 %v8349_v58 }
 0x806   :  { %v3060_v21 = vpop.xlane.xlu0 %3059  ;;  %v3063_v30 = vpop.xlane.xlu1 %3062 }
 0x807   :  { %6361 = vrcp.f32 %v3060_v21 }
 0x808   :  { %6363 = vrcp.f32 %v3063_v30 }
 0x80a   :  { %v3066_v46 = vpop.xlane.xlu0 %3065 }
 0x80b   :  { %6365 = vrcp.f32 %v3066_v46  ;;  %v3069_v57 = vpop.xlane.xlu1 %3068 }
 0x80c   :  { %6367 = vrcp.f32 %v3069_v57  ;;  %v6358_v6 = vpop.eup %6357 }
 0x80d   :  { %v3112_v18 = vmul.f32 %v6358_v6, %v7696_v52 }
 0x80e   :  { %v3072_v56 = vpop.xlane.xlu0 %3071 }
 0x80f   :  { %6369 = vrcp.f32 %v3072_v56  ;;  %v3075_v27 = vpop.xlane.xlu1 %3074 }
 0x810   :  { %v6360_v11 = vpop.eup %6359  ;;  %6371 = vrcp.f32 %v3075_v27 }
 0x811   :  { %v3113_v8 = vmul.f32 %v6360_v11, %v7702_v22 }
 0x812   :  { %v3078_v23 = vpop.xlane.xlu0 %3077 }
 0x813   :  { %v3127_v49 = vpack.c.bf16 %v3113_v8, %v3112_v18  ;;  %6373 = vrcp.f32 %v3078_v23  ;;  %v3081_v17 = vpop.xlane.xlu1 %3080 }
 0x814   :  { %v6362_v60 = vpop.eup %6361  ;;  %6375 = vrcp.f32 %v3081_v17 }
 0x815   :  { %v6364_v13 = vpop.eup %6363  ;;  %5919 = vmatmul.mubr.msk.bf16.vlgmr.msra.gmra.mxu1 %vm997_vm3, %v3127_v49  ;;  %v3114_v63 = vmul.f32 %v6362_v60, %v7710_v43 }
 0x816   :  { %5929 = vmatpush3.bf16.msra.mxu1 %v7763_v0  ;;  %v3084_v12 = vpop.xlane.xlu0 %3083  ;;  %v3115_v48 = vmul.f32 %v6364_v13, %v7706_v33  ;;  %5930 = vmatprep.mubr.msk.bf16.mxu1 %vm6638_vm1, %v8349_v58 }
 0x817   :  { %6377 = vrcp.f32 %v3084_v12  ;;  %v3087_v52 = vpop.xlane.xlu1 %3086  ;;  %5940 = vmatprep.subr.bf16.mxu1 %v8349_v58 }
 0x818   :  { %v6366_v22 = vpop.eup %6365  ;;  %6379 = vrcp.f32 %v3087_v52  ;;  %v3128_v3 = vpack.c.bf16 %v3115_v48, %v3114_v63 }
 0x819   :  { %v6368_v29 = vpop.eup %6367  ;;  %v3116_v50 = vmul.f32 %v6366_v22, %v7717_v47 }
 0x81a   :  { %v3117_v43 = vmul.f32 %v6368_v29, %v7720_v31  ;;  %5925 = vmatmul.mubr.msk.bf16.vlgmr.msra.gmra.mxu0 %vm997_vm3, %v3128_v3  ;;  %v3090_v42 = vpop.xlane.xlu0 %3089 }
 0x81b   :  { %5935 = vmatpush3.bf16.msra.mxu0 %v7784_v14  ;;  %5936 = vmatprep.mubr.msk.bf16.mxu0 %vm6638_vm1, %v8349_v58  ;;  %6381 = vrcp.f32 %v3090_v42 }
 0x81c   :  { %v6370_v33 = vpop.eup %6369  ;;  %v3129_v0 = vpack.c.bf16 %v3117_v43, %v3116_v50  ;;  %5946 = vmatprep.subr.bf16.mxu0 %v8349_v58 }
 0x81d   :  { %v6372_v15 = vpop.eup %6371  ;;  %v3118_v5 = vmul.f32 %v6370_v33, %v7726_v44 }
 0x81e   :  { %5931 = vmatmul.mubr.msk.bf16.vlgmr.msra.gmra.mxu1 %vm997_vm3, %v3129_v0  ;;  %v3119_v47 = vmul.f32 %v6372_v15, %v7729_v10  ;;  %v3521_v30 = vpop.permute.xlu0 %3520 }
 0x81f   :  { %5941 = vmatpush3.bf16.msra.mxu1 %v7767_v32  ;;  %5942 = vmatprep.mubr.msk.bf16.mxu1 %vm6638_vm1, %v8349_v58 }
 0x820   :  { %v6374_v31 = vpop.eup %6373  ;;  %v3130_v14 = vpack.c.bf16 %v3119_v47, %v3118_v5  ;;  %5952 = vmatprep.subr.bf16.mxu1 %v8349_v58 }
 0x821   :  { %v6376_v16 = vpop.eup %6375  ;;  %v3120_v40 = vmul.f32 %v6374_v31, %v7735_v55 }
 0x822   :  { %v3121_v4 = vmul.f32 %v6376_v16, %v7737_v62  ;;  %5937 = vmatmul.mubr.msk.bf16.vlgmr.msra.gmra.mxu0 %vm997_vm3, %v3130_v14 }
 0x823   :  { %5947 = vmatpush3.bf16.msra.mxu0 %v7788_v41  ;;  %5948 = vmatprep.mubr.msk.bf16.mxu0 %vm6638_vm1, %v8349_v58  ;;  %v3526_v41 = vsel %vm620_vm2, %v3521_v30, 0 }
 0x824   :  { %v6378_v44 = vpop.eup %6377  ;;  %v3131_v10 = vpack.c.bf16 %v3121_v4, %v3120_v40  ;;  %5958 = vmatprep.subr.bf16.mxu0 %v8349_v58 }
 0x825   :  { %v6380_v32 = vpop.eup %6379  ;;  %v3122_v21 = vmul.f32 %v6378_v44, %v7743_v25  ;;  %v3519_v25 = vpop.permute.xlu0 %3518 }
 0x826   :  { %5943 = vmatmul.mubr.msk.bf16.vlgmr.msra.gmra.mxu1 %vm997_vm3, %v3131_v10  ;;  %v3123_v55 = vmul.f32 %v6380_v32, %v7745_v51  ;;  %v3572_v51 = vpop.permute.xlu1 %3571 }
 0x827   :  { %5953 = vmatpush3.bf16.msra.mxu1 %v7792_v19  ;;  %5954 = vmatprep.mubr.msk.bf16.mxu1 %vm6638_vm1, %v8349_v58  ;;  %v3577_v48 = vsel %vm620_vm2, %v3572_v51, 0 }
 0x828   :  { %v3132_v62 = vpack.c.bf16 %v3123_v55, %v3122_v21  ;;  %5964 = vmatprep.subr.bf16.mxu1 %v8349_v58  ;;  %v6382_v18 = vpop.eup %6381 }
 0x829   :  { %v3570_v19 = vpop.permute.xlu0 %3569  ;;  %v3124_v17 = vmul.f32 %v6382_v18, %v7751_v59 }
 0x82a   :  { %5949 = vmatmul.mubr.msk.bf16.vlgmr.msra.gmra.mxu0 %vm997_vm3, %v3132_v62 }
 0x82b   :  { %5959 = vmatpush3.bf16.xpose.msra.mxu0 %v3526_v41  ;;  %5960 = vmatprep.mubr.msk.bf16.mxu0 %vm6638_vm1, %v8349_v58 }
 0x82c   :  { %5970 = vmatprep.subr.bf16.mxu0 %v8349_v58 }
 0x82d   :  { %v3621_v57 = vpop.permute.xlu0 %3620 }
 0x831   :  { %v3672_v11 = vpop.permute.xlu0 %3671 }
 0x832   :  { %5961 = vmatmul.mubr.msk.bf16.vlgmr.msra.gmra.mxu0 %vm620_vm2, %v3519_v25 }
 0x833   :  { %5972 = vmatprep.mubr.msk.bf16.mxu0 %vm6638_vm1, %v8349_v58 }
 0x835   :  { %v3723_v13 = vpop.permute.xlu0 %3722 }
 0x839   :  { %v3774_v59 = vpop.permute.xlu0 %3773 }
 0x83d   :  { %v3825_v3 = vpop.permute.xlu0 %3824 }
 0x857   :  { %v3093_v46 = vpop.xlane.xlu1 %3092 }
 0x858   :  { %6383 = vrcp.f32 %v3093_v46 }
 0x85b   :  { %v3623_v6 = vpop.permute.xlu1 %3622 }
 0x85c   :  { %v3628_v56 = vsel %vm620_vm2, %v3623_v6, 0 }
 0x85d   :  { %5971 = vmatpush3.bf16.xpose.msra.mxu0 %v3628_v56 }
 0x85e   :  { %5982 = vmatprep.subr.bf16.mxu0 %v8349_v58 }
 0x85f   :  { %v3674_v27 = vpop.permute.xlu1 %3673 }
 0x863   :  { %v3725_v8 = vpop.permute.xlu1 %3724 }
 0x864   :  { %v3730_v23 = vsel %vm620_vm2, %v3725_v8, 0  ;;  %5973 = vmatmul.mubr.msk.bf16.vlgmr.msra.gmra.mxu0 %vm620_vm2, %v3621_v57 }
 0x865   :  { %v6384_v49 = vpop.eup %6383  ;;  %5983 = vmatpush3.bf16.xpose.msra.mxu0 %v3730_v23  ;;  %5984 = vmatprep.mubr.msk.bf16.mxu0 %vm6638_vm1, %v8349_v58 }
 0x866   :  { %v3125_v60 = vmul.f32 %v6384_v49, %v7778_v28  ;;  %5994 = vmatprep.subr.bf16.mxu0 %v8349_v58  ;;  %v3679_v28 = vsel %vm620_vm2, %v3674_v27, 0 }
 0x867   :  { %v3776_v63 = vpop.permute.xlu1 %3775 }
 0x868   :  { %v3133_v12 = vpack.c.bf16 %v3125_v60, %v3124_v17  ;;  %v3781_v29 = vsel %vm620_vm2, %v3776_v63, 0 }
 0x86a   :  { %5955 = vmatmul.mubr.msk.bf16.vlgmr.msra.gmra.mxu1 %vm997_vm3, %v3133_v12 }
 0x86b   :  { %5965 = vmatpush3.bf16.xpose.msra.mxu1 %v3577_v48  ;;  %v3827_v52 = vpop.permute.xlu1 %3826  ;;  %5966 = vmatprep.mubr.msk.bf16.mxu1 %vm6638_vm1, %v8349_v58 }
 0x86c   :  { %v3832_v22 = vsel %vm620_vm2, %v3827_v52, 0  ;;  %5985 = vmatmul.mubr.msk.bf16.vlgmr.msra.gmra.mxu0 %vm620_vm2, %v3723_v13  ;;  %5976 = vmatprep.subr.bf16.mxu1 %v8349_v58 }
 0x86d   :  { %5995 = vmatpush3.bf16.xpose.msra.mxu0 %v3832_v22  ;;  %5996 = vmatprep.mubr.msk.bf16.mxu0 %vm6638_vm1, %v8349_v58 }
 0x86e   :  { %6006 = vmatprep.subr.bf16.mxu0 %v8349_v58 }
 0x86f   :  { %v3878_v50 = vpop.permute.xlu1 %3877 }
 0x870   :  { %v3883_v43 = vsel %vm620_vm2, %v3878_v50, 0 }
 0x872   :  { %5967 = vmatmul.mubr.msk.bf16.vlgmr.msra.gmra.mxu1 %vm620_vm2, %v3570_v19 }
 0x873   :  { %5977 = vmatpush3.bf16.xpose.msra.mxu1 %v3679_v28  ;;  %5978 = vmatprep.mubr.msk.bf16.mxu1 %vm6638_vm1, %v8349_v58  ;;  %v3876_v33 = vpop.permute.xlu1 %3875 }
 0x874   :  { %5997 = vmatmul.mubr.msk.bf16.vlgmr.msra.gmra.mxu0 %vm620_vm2, %v3825_v3  ;;  %5988 = vmatprep.subr.bf16.mxu1 %v8349_v58 }
 0x875   :  { %6008 = vmatprep.mubr.msk.bf16.mxu0 %vm6638_vm1, %v8349_v58 }
 0x87a   :  { %5979 = vmatmul.mubr.msk.bf16.vlgmr.msra.gmra.mxu1 %vm620_vm2, %v3672_v11 }
 0x87b   :  { %5989 = vmatpush3.bf16.xpose.msra.mxu1 %v3781_v29  ;;  %5990 = vmatprep.mubr.msk.bf16.mxu1 %vm6638_vm1, %v8349_v58 }
 0x87c   :  { %6000 = vmatprep.subr.bf16.mxu1 %v8349_v58 }
 0x882   :  { %5991 = vmatmul.mubr.msk.bf16.vlgmr.msra.gmra.mxu1 %vm620_vm2, %v3774_v59 }
 0x883   :  { %6001 = vmatpush3.bf16.xpose.msra.mxu1 %v3883_v43  ;;  %6002 = vmatprep.mubr.msk.bf16.mxu1 %vm6638_vm1, %v8349_v58 }
 0x884   :  { %6012 = vmatprep.subr.bf16.mxu1 %v8349_v58 }
 0x88a   :  { %6003 = vmatmul.mubr.msk.bf16.vlgmr.msra.gmra.mxu1 %vm620_vm2, %v3876_v33 }
 0x88b   :  { %6014 = vmatprep.mubr.msk.bf16.mxu1 %vm6638_vm1, %v8349_v58 }
 0x8c2   :  { %v7893_v0 = vpop.f32.mrf.mxu0 }
 0x8c4   :  { %v5914_v15 = vpop.f32.mrf.mxu0 }
 0x8c6   :  { %v7895_v5 = vpop.f32.mrf.mxu0 }
 0x8c7   :  { %v3510_v47 = vpack.c.bf16 %v7895_v5, %v7893_v0 }
 0x8c8   :  { %v5915_v31 = vpop.f32.mrf.mxu0 }
 0x8d5   :  { %v7899_v14 = vpop.f32.mrf.mxu1 }
 0x8d7   :  { %v5920_v16 = vpop.f32.mrf.mxu1 }
 0x8d9   :  { %v7901_v40 = vpop.f32.mrf.mxu1 }
 0x8da   :  { %v3511_v42 = vpack.c.bf16 %v7901_v40, %v7899_v14  ;;  %v7905_v4 = vpop.f32.mrf.mxu0 }
 0x8db   :  { %v5921_v44 = vpop.f32.mrf.mxu1 }
 0x8dc   :  { %v5926_v10 = vpop.f32.mrf.mxu0 }
 0x8de   :  { %v7907_v32 = vpop.f32.mrf.mxu0  ;;  %v7909_v21 = vpop.f32.mrf.mxu1 }
 0x8df   :  { %v3512_v55 = vpack.c.bf16 %v7907_v32, %v7905_v4 }
 0x8e0   :  { %v5927_v30 = vpop.f32.mrf.mxu0  ;;  %v5932_v62 = vpop.f32.mrf.mxu1 }
 0x8e2   :  { %v7913_v41 = vpop.f32.mrf.mxu1  ;;  %v7915_v25 = vpop.f32.mrf.mxu0 }
 0x8e3   :  { %v3513_v51 = vpack.c.bf16 %v7913_v41, %v7909_v21 }
 0x8e4   :  { %v5933_v19 = vpop.f32.mrf.mxu1  ;;  %v5938_v46 = vpop.f32.mrf.mxu0 }
 0x8e6   :  { %v7919_v57 = vpop.f32.mrf.mxu0  ;;  %v7921_v6 = vpop.f32.mrf.mxu1 }
 0x8e7   :  { %v3514_v56 = vpack.c.bf16 %v7919_v57, %v7915_v25 }
 0x8e8   :  { %v5939_v27 = vpop.f32.mrf.mxu0  ;;  %v5944_v11 = vpop.f32.mrf.mxu1 }
 0x8ea   :  { %v7925_v18 = vpop.f32.mrf.mxu1  ;;  %v7927_v8 = vpop.f32.mrf.mxu0 }
 0x8eb   :  { %v8367_v25 = vpack.c.bf16 %v7925_v18, %v7921_v6  ;;  %v8371_v18 = vld [vmem:[#allocation44_spill] sm:$0xff] }
 0x8ec   :  { %v5945_v49 = vpop.f32.mrf.mxu1  ;;  %v5950_v17 = vpop.f32.mrf.mxu0 }
 0x8ee   :  { %v7931_v60 = vpop.f32.mrf.mxu0 }
 0x8f0   :  { %v5951_v63 = vpop.f32.mrf.mxu0 }
 0x8f2   :  { %v7935_v12 = vpop.f32.mrf.mxu0 }
 0x8f3   :  { %v3926_v48 = vsel %vm997_vm3, %v7935_v12, -inf }
 0x8f4   :  { %3927 = vmax.xlane.f32.xlu0 %v3926_v48  ;;  %v5962_v52 = vpop.f32.mrf.mxu0 }
 0x8f6   :  { %v7939_v22 = vpop.f32.mrf.mxu0 }
 0x8f7   :  { %v3929_v59 = vsel %vm997_vm3, %v7939_v22, -inf }
 0x8f8   :  { %3930 = vmax.xlane.f32.xlu1 %v3929_v59  ;;  %v5963_v28 = vpop.f32.mrf.mxu0 }
 0x924   :  { %v7943_v3 = vpop.f32.mrf.mxu0 }
 0x926   :  { %v5974_v29 = vpop.f32.mrf.mxu0 }
 0x928   :  { %v7945_v50 = vpop.f32.mrf.mxu0 }
 0x929   :  { %v3941_v43 = vsel %vm997_vm3, %v7945_v50, -inf }
 0x92a   :  { %3942 = vmax.xlane.f32.xlu1 %v3941_v43  ;;  %v7949_v33 = vpop.f32.mrf.mxu1  ;;  %v5975_v15 = vpop.f32.mrf.mxu0 }
 0x92b   :  { %v3938_v15 = vsel %vm997_vm3, %v7943_v3, -inf }
 0x92c   :  { %v5956_v31 = vpop.f32.mrf.mxu1  ;;  %v7951_v16 = vpop.f32.mrf.mxu0 }
 0x92e   :  { %v7953_v44 = vpop.f32.mrf.mxu1  ;;  %v5986_v10 = vpop.f32.mrf.mxu0 }
 0x930   :  { %v5957_v62 = vpop.f32.mrf.mxu1  ;;  %v7957_v19 = vpop.f32.mrf.mxu0 }
 0x932   :  { %v7959_v46 = vpop.f32.mrf.mxu1  ;;  %v5987_v27 = vpop.f32.mrf.mxu0 }
 0x933   :  { %v3932_v11 = vsel %vm997_vm3, %v7959_v46, -inf }
 0x934   :  { %v7963_v49 = vpop.f32.mrf.mxu0  ;;  %3933 = vmax.xlane.f32.xlu0 %v3932_v11  ;;  %v5968_v17 = vpop.f32.mrf.mxu1 }
 0x936   :  { %v7965_v63 = vpop.f32.mrf.mxu1  ;;  %v5998_v48 = vpop.f32.mrf.mxu0 }
 0x937   :  { %v3935_v52 = vsel %vm997_vm3, %v7965_v63, -inf  ;;  %v3950_v48 = vsel %vm997_vm3, %v7951_v16, -inf }
 0x938   :  { %v7969_v59 = vpop.f32.mrf.mxu0  ;;  %3936 = vmax.xlane.f32.xlu0 %v3935_v52  ;;  %v5969_v28 = vpop.f32.mrf.mxu1  ;;  %v3953_v52 = vsel %vm997_vm3, %v7957_v19, -inf }
 0x93a   :  { %v7971_v29 = vpop.f32.mrf.mxu1  ;;  %v5999_v43 = vpop.f32.mrf.mxu0 }
 0x93b   :  { %v3944_v62 = vsel %vm997_vm3, %v7971_v29, -inf }
 0x93c   :  { %3939 = vmax.xlane.f32.xlu0 %v3938_v15  ;;  %v5980_v31 = vpop.f32.mrf.mxu1 }
 0x93e   :  { %v7975_v10 = vpop.f32.mrf.mxu1 }
 0x93f   :  { %v3947_v27 = vsel %vm997_vm3, %v7975_v10, -inf }
 0x940   :  { %3945 = vmax.xlane.f32.xlu0 %v3944_v62  ;;  %3948 = vmax.xlane.f32.xlu1 %v3947_v27  ;;  %v5981_v11 = vpop.f32.mrf.mxu1 }
 0x941   :  { %v3962_v11 = vsel %vm997_vm3, %v7963_v49, -inf }
 0x942   :  { %v7981_v17 = vpop.f32.mrf.mxu1 }
 0x943   :  { %v3956_v15 = vsel %vm997_vm3, %v7981_v17, -inf }
 0x944   :  { %3951 = vmax.xlane.f32.xlu0 %v3950_v48  ;;  %3954 = vmax.xlane.f32.xlu1 %v3953_v52  ;;  %v5992_v28 = vpop.f32.mrf.mxu1  ;;  %v3965_v48 = vsel %vm997_vm3, %v7969_v59, -inf }
 0x946   :  { %v7987_v43 = vpop.f32.mrf.mxu1 }
 0x947   :  { %v3959_v31 = vsel %vm997_vm3, %v7987_v43, -inf }
 0x948   :  { %3957 = vmax.xlane.f32.xlu0 %v3956_v15  ;;  %3960 = vmax.xlane.f32.xlu1 %v3959_v31  ;;  %v5993_v62 = vpop.f32.mrf.mxu1 }
 0x94a   :  { %v7993_v27 = vpop.f32.mrf.mxu1 }
 0x94b   :  { %v3968_v30 = vsel %vm997_vm3, %v7993_v27, -inf }
 0x94c   :  { %3963 = vmax.xlane.f32.xlu0 %v3962_v11  ;;  %3966 = vmax.xlane.f32.xlu1 %v3965_v48  ;;  %v6004_v52 = vpop.f32.mrf.mxu1 }
 0x94e   :  { %v7999_v28 = vpop.f32.mrf.mxu1 }
 0x950   :  { %3969 = vmax.xlane.f32.xlu0 %v3968_v30  ;;  %v6005_v15 = vpop.f32.mrf.mxu1 }
 0x95d   :  { %4157 = vrot.lane.b32.xlu1 %v6931_v2, %s6640_s27  ;;  %v3971_v2 = vsel %vm997_vm3, %v7999_v28, -inf }
 0x961   :  { %4204 = vrot.lane.b32.xlu1 %v6844_v61, %s6640_s27 }
 0x965   :  { %4251 = vrot.lane.b32.xlu1 %v6835_v54, %s6640_s27 }
 0x966   :  { %4110 = vrot.lane.b32.xlu0 %v6819_v36, %s6640_s27 }
 0x96a   :  { %4298 = vrot.lane.b32.xlu0 %v6867_v26, %s6640_s27 }
 0x97d   :  { %v3928_v31 = vpop.xlane.xlu0 %3927 }
 0x97e   :  { %v3974_v62 = vsub.f32 %v7935_v12, %v3928_v31 }
 0x980   :  { %v3990_v30 = vmul.f32 1.442695, %v3974_v62 }
 0x981   :  { %v3931_v36 = vpop.xlane.xlu1 %3930 }
 0x982   :  { %6385 = vpow2.f32 %v3990_v30  ;;  %v3975_v61 = vsub.f32 %v7939_v22, %v3931_v36 }
 0x984   :  { %v3992_v26 = vmul.f32 1.442695, %v3975_v61 }
 0x986   :  { %6387 = vpow2.f32 %v3992_v26 }
 0x989   :  { %3972 = vmax.xlane.f32.xlu1 %v3971_v2 }
 0x98f   :  { %v8016_v11 = vpop.eup %6385 }
 0x990   :  { %v4022_v54 = vsel %vm997_vm3, %v8016_v11, 0.0 }
 0x991   :  { %4023 = vadd.xlane.f32.xlu0 %v4022_v54 }
 0x993   :  { %v8023_v12 = vpop.eup %6387 }
 0x994   :  { %v4025_v15 = vsel %vm997_vm3, %v8023_v12, 0.0 }
 0x99a   :  { %4345 = vrot.lane.b32.xlu1 %v6858_v20, %s6640_s27 }
 0x9b3   :  { %v3943_v48 = vpop.xlane.xlu1 %3942 }
 0x9b4   :  { %v3979_v62 = vsub.f32 %v7945_v50, %v3943_v48 }
 0x9b6   :  { %v4000_v22 = vmul.f32 1.442695, %v3979_v62 }
 0x9bd   :  { %v3934_v52 = vpop.xlane.xlu0 %3933 }
 0x9be   :  { %v3976_v31 = vsub.f32 %v7959_v46, %v3934_v52  ;;  %4026 = vadd.xlane.f32.xlu1 %v4025_v15 }
 0x9c0   :  { %v3994_v30 = vmul.f32 1.442695, %v3976_v31 }
 0x9c1   :  { %v3937_v2 = vpop.xlane.xlu0 %3936 }
 0x9c2   :  { %6389 = vpow2.f32 %v3994_v30  ;;  %v3977_v20 = vsub.f32 %v7965_v63, %v3937_v2 }
 0x9c4   :  { %v3996_v54 = vmul.f32 1.442695, %v3977_v20 }
 0x9c5   :  { %v3940_v36 = vpop.xlane.xlu0 %3939 }
 0x9c6   :  { %6391 = vpow2.f32 %v3996_v54  ;;  %v3978_v61 = vsub.f32 %v7943_v3, %v3940_v36 }
 0x9c7   :  { %6393 = vpow2.f32 %v4000_v22 }
 0x9c8   :  { %v3998_v26 = vmul.f32 1.442695, %v3978_v61 }
 0x9c9   :  { %v3946_v13 = vpop.xlane.xlu0 %3945  ;;  %v3949_v23 = vpop.xlane.xlu1 %3948 }
 0x9ca   :  { %6395 = vpow2.f32 %v3998_v26  ;;  %v3980_v46 = vsub.f32 %v7971_v29, %v3946_v13  ;;  %v3981_v50 = vsub.f32 %v7975_v10, %v3949_v23 }
 0x9cc   :  { %v4002_v48 = vmul.f32 1.442695, %v3980_v46  ;;  %v4004_v52 = vmul.f32 1.442695, %v3981_v50 }
 0x9cd   :  { %v3952_v15 = vpop.xlane.xlu0 %3951  ;;  %v3955_v31 = vpop.xlane.xlu1 %3954 }
 0x9ce   :  { %6397 = vpow2.f32 %v4002_v48  ;;  %v3982_v63 = vsub.f32 %v7951_v16, %v3952_v15  ;;  %v3983_v62 = vsub.f32 %v7957_v19, %v3955_v31 }
 0x9cf   :  { %v8035_v30 = vpop.eup %6389  ;;  %6399 = vpow2.f32 %v4004_v52 }
 0x9d0   :  { %v4006_v3 = vmul.f32 1.442695, %v3982_v63  ;;  %v4008_v2 = vmul.f32 1.442695, %v3983_v62  ;;  %v4028_v20 = vsel %vm997_vm3, %v8035_v30, 0.0 }
 0x9d1   :  { %v3958_v13 = vpop.xlane.xlu0 %3957  ;;  %v3961_v29 = vpop.xlane.xlu1 %3960  ;;  %4029 = vadd.xlane.f32.xlu0 %v4028_v20 }
 0x9d2   :  { %6401 = vpow2.f32 %v4006_v3  ;;  %v3984_v23 = vsub.f32 %v7981_v17, %v3958_v13  ;;  %v3985_v10 = vsub.f32 %v7987_v43, %v3961_v29 }
 0x9d3   :  { %v8041_v22 = vpop.eup %6391  ;;  %6403 = vpow2.f32 %v4008_v2 }
 0x9d4   :  { %v4010_v16 = vmul.f32 1.442695, %v3984_v23  ;;  %v4012_v19 = vmul.f32 1.442695, %v3985_v10  ;;  %v4031_v54 = vsel %vm997_vm3, %v8041_v22, 0.0  ;;  %v8045_v36 = vpop.eup %6393 }
 0x9d5   :  { %v3964_v61 = vpop.xlane.xlu0 %3963  ;;  %v3967_v26 = vpop.xlane.xlu1 %3966  ;;  %4032 = vadd.xlane.f32.xlu1 %v4031_v54  ;;  %v4037_v15 = vsel %vm997_vm3, %v8045_v36, 0.0 }
 0x9d6   :  { %6405 = vpow2.f32 %v4010_v16  ;;  %v3986_v46 = vsub.f32 %v7963_v49, %v3964_v61  ;;  %v3987_v17 = vsub.f32 %v7969_v59, %v3967_v26 }
 0x9d7   :  { %v8049_v50 = vpop.eup %6395  ;;  %6407 = vpow2.f32 %v4012_v19 }
 0x9d8   :  { %v4014_v43 = vmul.f32 1.442695, %v3986_v46  ;;  %v4016_v48 = vmul.f32 1.442695, %v3987_v17  ;;  %v4034_v52 = vsel %vm997_vm3, %v8049_v50, 0.0 }
 0x9d9   :  { %v4158_v31 = vpop.permute.xlu1 %4157  ;;  %4035 = vadd.xlane.f32.xlu0 %v4034_v52  ;;  %v3970_v63 = vpop.xlane.xlu0 %3969  ;;  %4038 = vadd.xlane.f32.xlu1 %v4037_v15  ;;  %v8357_v15 = vpack.c.bf16 %v7552_v1, %v7550_v39  ;;  %v8359_v1 = vpack.c.bf16 %v7576_v24, %v7572_v9 }
 0x9da   :  { %6409 = vpow2.f32 %v4014_v43  ;;  %v3988_v49 = vsub.f32 %v7993_v27, %v3970_v63  ;;  %6013 = vmatpush3.bf16.msra.mxu1 %v4158_v31 }
 0x9db   :  { %v8056_v59 = vpop.eup %6397  ;;  %6411 = vpow2.f32 %v4016_v48  ;;  %6024 = vmatprep.subr.bf16.mxu1 %v8349_v58 }
 0x9dc   :  { %v8059_v62 = vpop.eup %6399  ;;  %v4018_v3 = vmul.f32 1.442695, %v3988_v49  ;;  %v4040_v2 = vsel %vm997_vm3, %v8056_v59, 0.0  ;;  %v8358_v49 = vpack.c.bf16 %v7564_v7, %v7562_v38  ;;  %v8360_v7 = vpack.c.bf16 %v7558_v35, %v7556_v34  ;;  %v8363_v34 = vld [vmem:[#allocation40_spill] sm:$0xff]  ;;  %v8364_v35 = vld [vmem:[#allocation39_spill] sm:$0xff] }
 0x9dd   :  { %4041 = vadd.xlane.f32.xlu0 %v4040_v2  ;;  %v4111_v20 = vpop.permute.xlu0 %4110  ;;  %v4043_v13 = vsel %vm997_vm3, %v8059_v62, 0.0  ;;  %v4205_v31 = vpop.permute.xlu1 %4204  ;;  %v8365_v14 = vpack.c.bf16 %v8363_v34, %v8364_v35 }
 0x9de   :  { %6413 = vpow2.f32 %v4018_v3  ;;  %4044 = vadd.xlane.f32.xlu1 %v4043_v13  ;;  %6007 = vmatpush3.bf16.msra.mxu0 %v4111_v20 }
 0x9df   :  { %v8065_v27 = vpop.eup %6401  ;;  %6018 = vmatprep.subr.bf16.mxu0 %v8349_v58 }
 0x9e0   :  { %v8068_v29 = vpop.eup %6403  ;;  %v4046_v23 = vsel %vm997_vm3, %v8065_v27, 0.0 }
 0x9e1   :  { %4047 = vadd.xlane.f32.xlu0 %v4046_v23  ;;  %v4049_v10 = vsel %vm997_vm3, %v8068_v29, 0.0  ;;  %v4252_v63 = vpop.permute.xlu1 %4251  ;;  %v4299_v5 = vpop.permute.xlu0 %4298 }
 0x9e2   :  { %4050 = vadd.xlane.f32.xlu1 %v4049_v10 }
 0x9e3   :  { %v8074_v16 = vpop.eup %6405 }
 0x9e4   :  { %v8076_v19 = vpop.eup %6407  ;;  %v4052_v54 = vsel %vm997_vm3, %v8074_v16, 0.0 }
 0x9e5   :  { %4053 = vadd.xlane.f32.xlu0 %v4052_v54  ;;  %v4055_v61 = vsel %vm997_vm3, %v8076_v19, 0.0 }
 0x9e6   :  { %4056 = vadd.xlane.f32.xlu1 %v4055_v61 }
 0x9e7   :  { %v8082_v26 = vpop.eup %6409 }
 0x9e8   :  { %v8084_v46 = vpop.eup %6411  ;;  %v4058_v17 = vsel %vm997_vm3, %v8082_v26, 0.0 }
 0x9e9   :  { %4059 = vadd.xlane.f32.xlu0 %v4058_v17  ;;  %v4061_v43 = vsel %vm997_vm3, %v8084_v46, 0.0 }
 0x9ea   :  { %4062 = vadd.xlane.f32.xlu1 %v4061_v43 }
 0x9eb   :  { %v8090_v48 = vpop.eup %6413 }
 0x9ec   :  { %v4064_v52 = vsel %vm997_vm3, %v8090_v48, 0.0 }
 0x9ed   :  { %4065 = vadd.xlane.f32.xlu0 %v4064_v52 }
 0xa03   :  { %4392 = vrot.lane.b32.xlu0 %v6890_v53, %s6640_s27 }
 0xa07   :  { %4502 = vrot.lane.b32.xlu0 %v8357_v15, %s6640_s27 }
 0xa0b   :  { %4526 = vrot.lane.b32.xlu0 %v3510_v47, %s6625_s26  ;;  %v8361_v47 = vld [vmem:[#allocation38_spill] sm:$0xff] }
 0xa0c   :  { %v8362_v4 = vpack.c.bf16 %v7570_v37, %v8361_v47 }
 0xa0f   :  { %4506 = vrot.lane.b32.xlu0 %v8358_v49, %s6640_s27 }
 0xa12   :  { %v3973_v3 = vpop.xlane.xlu1 %3972 }
 0xa13   :  { %v3989_v53 = vsub.f32 %v7999_v28, %v3973_v3  ;;  %4530 = vrot.lane.b32.xlu0 %v3512_v55, %s6625_s26 }
 0xa15   :  { %v4020_v39 = vmul.f32 1.442695, %v3989_v53 }
 0xa16   :  { %v8131_v9 = vpop.permute.xlu1 %4345 }
 0xa17   :  { %6415 = vpow2.f32 %v4020_v39  ;;  %4510 = vrot.lane.b32.xlu0 %v8359_v1, %s6640_s27 }
 0xa1a   :  { %v4024_v24 = vpop.xlane.xlu0 %4023 }
 0xa1b   :  { %6417 = vrcp.f32 %v4024_v24 }
 0xa24   :  { %v8117_v0 = vpop.eup %6415 }
 0xa25   :  { %v4067_v38 = vsel %vm997_vm3, %v8117_v0, 0.0 }
 0xa26   :  { %4068 = vadd.xlane.f32.xlu1 %v4067_v38 }
 0xa28   :  { %v6418_v40 = vpop.eup %6417 }
 0xa29   :  { %v4086_v32 = vmul.f32 %v6418_v40, %v8016_v11 }
 0xa37   :  { %4439 = vrot.lane.b32.xlu1 %v6881_v45, %s6640_s27 }
 0xa3b   :  { %4504 = vrot.lane.b32.xlu1 %v8360_v7, %s6640_s27 }
 0xa3f   :  { %4528 = vrot.lane.b32.xlu1 %v3511_v42, %s6625_s26 }
 0xa43   :  { %4508 = vrot.lane.b32.xlu1 %v8362_v4, %s6640_s27 }
 0xa47   :  { %4532 = vrot.lane.b32.xlu1 %v3513_v51, %s6625_s26  ;;  %v4027_v45 = vpop.xlane.xlu1 %4026 }
 0xa48   :  { %6419 = vrcp.f32 %v4027_v45 }
 0xa4b   :  { %4512 = vrot.lane.b32.xlu1 %v8365_v14, %s6640_s27 }
 0xa55   :  { %v6420_v42 = vpop.eup %6419 }
 0xa56   :  { %v4087_v37 = vmul.f32 %v6420_v42, %v8023_v12 }
 0xa58   :  { %v4102_v55 = vpack.c.bf16 %v4087_v37, %v4086_v32 }
 0xa5a   :  { %v4030_v28 = vpop.xlane.xlu0 %4029  ;;  %6009 = vmatmul.mubr.msk.bf16.vlgmr.msra.gmra.mxu0 %vm997_vm3, %v4102_v55  ;;  %v8366_v55 = vmov 0  }
 0xa5b   :  { %6019 = vmatpush3.bf16.msra.mxu0 %v4205_v31  ;;  %6020 = vmatprep.mubr.msk.bf16.mxu0 %vm6638_vm1, %v8349_v58  ;;  %6421 = vrcp.f32 %v4030_v28  ;;  %v6146_v28 = vld [vmem:[#allocation8 + $0x30] sm:$0xff]  }
 0xa5c   :  { %6030 = vmatprep.subr.bf16.mxu0 %v8349_v58 }
 0xa5e   :  { %v4033_v21 = vpop.xlane.xlu1 %4032 }
 0xa5f   :  { %6423 = vrcp.f32 %v4033_v21  ;;  %v6147_v21 = vld [vmem:[#allocation8 + $0x28] sm:$0xff]  }
 0xa62   :  { %v4036_v41 = vpop.xlane.xlu0 %4035  ;;  %v4039_v51 = vpop.xlane.xlu1 %4038 }
 0xa63   :  { %6425 = vrcp.f32 %v4036_v41  ;;  %v6148_v41 = vld [vmem:[#allocation8 + $0x20] sm:$0xff]  }
 0xa64   :  { %6427 = vrcp.f32 %v4039_v51  ;;  %v6149_v51 = vld [vmem:[#allocation8 + $0x18] sm:$0xff]  }
 0xa66   :  { %v4042_v11 = vpop.xlane.xlu0 %4041 }
 0xa67   :  { %6429 = vrcp.f32 %v4042_v11  ;;  %v4045_v12 = vpop.xlane.xlu1 %4044 }
 0xa68   :  { %6431 = vrcp.f32 %v4045_v12  ;;  %v6422_v2 = vpop.eup %6421 }
 0xa69   :  { %v4088_v10 = vmul.f32 %v6422_v2, %v8035_v30 }
 0xa6a   :  { %v4048_v20 = vpop.xlane.xlu0 %4047 }
 0xa6b   :  { %6433 = vrcp.f32 %v4048_v20  ;;  %v4051_v13 = vpop.xlane.xlu1 %4050 }
 0xa6c   :  { %v6424_v23 = vpop.eup %6423  ;;  %6435 = vrcp.f32 %v4051_v13  ;;  %v6151_v13 = vld [vmem:[#allocation8 + $0x8] sm:$0xff]  }
 0xa6d   :  { %v4089_v54 = vmul.f32 %v6424_v23, %v8041_v22  ;;  %v6152_v23 = vld [vmem:[#allocation8] sm:$0xff]  }
 0xa6e   :  { %v4054_v61 = vpop.xlane.xlu0 %4053 }
 0xa6f   :  { %v4103_v17 = vpack.c.bf16 %v4089_v54, %v4088_v10  ;;  %6437 = vrcp.f32 %v4054_v61  ;;  %v4057_v43 = vpop.xlane.xlu1 %4056 }
 0xa70   :  { %v6426_v52 = vpop.eup %6425  ;;  %6439 = vrcp.f32 %v4057_v43 }
 0xa71   :  { %v6428_v15 = vpop.eup %6427  ;;  %v4090_v31 = vmul.f32 %v6426_v52, %v8049_v50  ;;  %6015 = vmatmul.mubr.msk.bf16.vlgmr.msra.gmra.mxu1 %vm997_vm3, %v4103_v17 }
 0xa72   :  { %v4091_v49 = vmul.f32 %v6428_v15, %v8045_v36  ;;  %6025 = vmatpush3.bf16.msra.mxu1 %v4252_v63  ;;  %v4060_v3 = vpop.xlane.xlu0 %4059  ;;  %6026 = vmatprep.mubr.msk.bf16.mxu1 %vm6638_vm1, %v8349_v58 }
 0xa73   :  { %6441 = vrcp.f32 %v4060_v3  ;;  %v4063_v30 = vpop.xlane.xlu1 %4062  ;;  %6036 = vmatprep.subr.bf16.mxu1 %v8349_v58 }
 0xa74   :  { %v6430_v22 = vpop.eup %6429  ;;  %v4104_v53 = vpack.c.bf16 %v4091_v49, %v4090_v31  ;;  %6443 = vrcp.f32 %v4063_v30 }
 0xa75   :  { %v6432_v39 = vpop.eup %6431  ;;  %v4092_v1 = vmul.f32 %v6430_v22, %v8056_v59 }
 0xa76   :  { %v4093_v50 = vmul.f32 %v6432_v39, %v8059_v62  ;;  %6021 = vmatmul.mubr.msk.bf16.vlgmr.msra.gmra.mxu0 %vm997_vm3, %v4104_v53  ;;  %v4066_v38 = vpop.xlane.xlu0 %4065 }
 0xa77   :  { %6031 = vmatpush3.bf16.msra.mxu0 %v4299_v5  ;;  %6032 = vmatprep.mubr.msk.bf16.mxu0 %vm6638_vm1, %v8349_v58  ;;  %6445 = vrcp.f32 %v4066_v38 }
 0xa78   :  { %v6434_v36 = vpop.eup %6433  ;;  %v4105_v63 = vpack.c.bf16 %v4093_v50, %v4092_v1  ;;  %6042 = vmatprep.subr.bf16.mxu0 %v8349_v58  ;;  %v8368_v50 = vld [vmem:[#allocation42_spill] sm:$0xff] }
 0xa79   :  { %v6436_v7 = vpop.eup %6435  ;;  %v4094_v24 = vmul.f32 %v6434_v36, %v8065_v27  ;;  %v8369_v36 = vld [vmem:[#allocation41_spill] sm:$0xff] }
 0xa7a   :  { %v4095_v47 = vmul.f32 %v6436_v7, %v8068_v29  ;;  %6027 = vmatmul.mubr.msk.bf16.vlgmr.msra.gmra.mxu1 %vm997_vm3, %v4105_v63  ;;  %v4393_v34 = vpop.permute.xlu0 %4392  ;;  %v8370_v63 = vpack.c.bf16 %v8368_v50, %v8369_v36 }
 0xa7b   :  { %6037 = vmatpush3.bf16.msra.mxu1 %v8131_v9  ;;  %6038 = vmatprep.mubr.msk.bf16.mxu1 %vm6638_vm1, %v8349_v58 }
 0xa7c   :  { %v6438_v59 = vpop.eup %6437  ;;  %v4106_v62 = vpack.c.bf16 %v4095_v47, %v4094_v24  ;;  %6048 = vmatprep.subr.bf16.mxu1 %v8349_v58 }
 0xa7d   :  { %v6440_v5 = vpop.eup %6439  ;;  %v4096_v4 = vmul.f32 %v6438_v59, %v8074_v16  ;;  %v8372_v59 = vld [vmem:[#allocation43_spill] sm:$0xff] }
 0xa7e   :  { %v4097_v45 = vmul.f32 %v6440_v5, %v8076_v19  ;;  %6033 = vmatmul.mubr.msk.bf16.vlgmr.msra.gmra.mxu0 %vm997_vm3, %v4106_v62  ;;  %v8373_v62 = vpack.c.bf16 %v8371_v18, %v8372_v59 }
 0xa7f   :  { %6043 = vmatpush3.bf16.msra.mxu0 %v4393_v34  ;;  %6044 = vmatprep.mubr.msk.bf16.mxu0 %vm6638_vm1, %v8349_v58 }
 0xa80   :  { %v6442_v27 = vpop.eup %6441  ;;  %v4107_v29 = vpack.c.bf16 %v4097_v45, %v4096_v4 }
 0xa81   :  { %v6444_v9 = vpop.eup %6443  ;;  %v4098_v35 = vmul.f32 %v6442_v27, %v8082_v26 }
 0xa82   :  { %v4099_v14 = vmul.f32 %v6444_v9, %v8084_v46  ;;  %6039 = vmatmul.mubr.msk.bf16.vlgmr.msra.gmra.mxu1 %vm997_vm3, %v4107_v29  ;;  %v8374_v29 = vpack.c.bf16 %v7931_v60, %v7927_v8 }
 0xa83   :  { %6050 = vmatprep.mubr.msk.bf16.mxu1 %vm6638_vm1, %v8349_v58  ;;  %v6145_v58 = vld [vmem:[#allocation8 + $0x38] sm:$0xff]  }
 0xa84   :  { %v4108_v16 = vpack.c.bf16 %v4099_v14, %v4098_v35  ;;  %v6446_v42 = vpop.eup %6445  ;;  %6054 = vmatprep.subr.bf16.mxu0 %v6145_v58 }
 0xa85   :  { %v4100_v37 = vmul.f32 %v6446_v42, %v8090_v48 }
 0xa86   :  { %6045 = vmatmul.mubr.msk.bf16.vlgmr.msra.gmra.mxu0 %vm997_vm3, %v4108_v16  ;;  %v8375_v16 = vpack.c.bf16 %v7953_v44, %v7949_v33 }
 0xa87   :  { %6055 = vmatpush3.bf16.msra.mxu0 %v6145_v58 }
 0xa88   :  { %6056 = vmatprep.subr.bf16.mxu0 %v6146_v28 }
 0xa8b   :  { %6057 = vmatpush3.bf16.msra.mxu0 %v6146_v28  ;;  %v8376_v28 = vld [vmem:[#allocation23_spill] sm:$0xff] }
 0xa8c   :  { %6058 = vmatprep.subr.bf16.mxu0 %v6147_v21 }
 0xa8f   :  { %6059 = vmatpush3.bf16.msra.mxu0 %v6147_v21  ;;  %v8377_v21 = vld [vmem:[#allocation22_spill] sm:$0xff] }
 0xa90   :  { %6060 = vmatprep.subr.bf16.mxu0 %v6148_v41 }
 0xa93   :  { %6061 = vmatpush3.bf16.msra.mxu0 %v6148_v41  ;;  %v8378_v41 = vpack.c.bf16 %v8376_v28, %v8377_v21 }
 0xa94   :  { %6062 = vmatprep.subr.bf16.mxu0 %v6149_v51 }
 0xa97   :  { %6063 = vmatpush3.bf16.msra.mxu0 %v6149_v51 }
 0xaaf   :  { %v4069_v19 = vpop.xlane.xlu1 %4068 }
 0xab0   :  { %6447 = vrcp.f32 %v4069_v19  ;;  %v4503_v19 = vpop.permute.xlu0 %4502 }
 0xab1   :  { %v4568_v33 = vsel %vm620_vm2, %v8378_v41, %v4503_v19  ;;  %v6153_v41 = vld [vmem:[#allocation11 + $0x70] ss:$8 sps:$4 sm:$0xff]  }
 0xab3   :  { %v4440_v40 = vpop.permute.xlu1 %4439 }
 0xab4   :  { %6049 = vmatpush3.bf16.msra.mxu1 %v4440_v40  ;;  %v4527_v40 = vpop.permute.xlu0 %4526 }
 0xab5   :  { %v4592_v44 = vsel %vm4590_vm4, %v4568_v33, %v4527_v40  ;;  %v6155_v33 = vld [vmem:[#allocation11 + $0x74] ss:$8 sps:$4 sm:$0xff]  }
 0xab6   :  { %5028 = vmatprep.subr.bf16.mxu1 %v6155_v33 }
 0xabd   :  { %v6448_v32 = vpop.eup %6447 }
 0xabe   :  { %v4101_v26 = vmul.f32 %v6448_v32, %v8117_v0  ;;  %v6150_v0 = vld [vmem:[#allocation8 + $0x10] sm:$0xff]   ;;  %v4507_v32 = vpop.permute.xlu0 %4506 }
 0xabf   :  { %6064 = vmatprep.subr.bf16.mxu0 %v6150_v0 }
 0xac0   :  { %v4109_v46 = vpack.c.bf16 %v4101_v26, %v4100_v37  ;;  %6065 = vmatpush3.bf16.msra.mxu0 %v6150_v0 }
 0xac1   :  { %6066 = vmatprep.subr.bf16.mxu0 %v6151_v13 }
 0xac2   :  { %6051 = vmatmul.mubr.msk.bf16.vlgmr.msra.gmra.mxu1 %vm997_vm3, %v4109_v46  ;;  %v4531_v46 = vpop.permute.xlu0 %4530 }
 0xac3   :  { %5060 = vmatprep.mubr.bf16.mxu1 %v8366_v55  ;;  %v4505_v55 = vpop.permute.xlu1 %4504  ;;  %5029 = vmatpush1.bf16.msra.mxu1 %v6153_v41 }
 0xac4   :  { %6067 = vmatpush3.bf16.msra.mxu0 %v6151_v13  ;;  %v8380_v13 = vld [vmem:[#allocation24_spill] sm:$0xff] }
 0xac5   :  { %6068 = vmatprep.subr.bf16.mxu0 %v6152_v23 }
 0xac6   :  { %v4511_v58 = vpop.permute.xlu0 %4510 }
 0xac8   :  { %6069 = vmatpush3.bf16.msra.mxu0 %v6152_v23 }
 0xb1a   :  { %v4150_v11 = vpop.f32.mrf.mxu0 }
 0xb1c   :  { %v6010_v48 = vpop.f32.mrf.mxu0 }
 0xb1e   :  { %v4153_v12 = vpop.f32.mrf.mxu0 }
 0xb1f   :  { %v4486_v2 = vpack.c.bf16 %v4153_v12, %v4150_v11  ;;  %v4529_v11 = vpop.permute.xlu1 %4528 }
 0xb20   :  { %v6011_v20 = vpop.f32.mrf.mxu0 }
 0xb21   :  { %4550 = vrot.lane.b32.xlu0 %v4486_v2, %s6639_s3  ;;  %v8379_v20 = vld [vmem:[#allocation25_spill] sm:$0xff] }
 0xb22   :  { %v8381_v23 = vpack.c.bf16 %v8379_v20, %v8380_v13  ;;  %v6165_v20 = vld [vmem:[#allocation11 + $0x30] ss:$8 sps:$4 sm:$0xff]   ;;  %v6170_v13 = vld [vmem:[#allocation11 + $0x24] ss:$8 sps:$4 sm:$0xff]  }
 0xb23   :  { %v4509_v0 = vpop.permute.xlu1 %4508 }
 0xb25   :  { %4534 = vrot.lane.b32.xlu0 %v3514_v56, %s6625_s26 }
 0xb27   :  { %v4533_v12 = vpop.permute.xlu1 %4532 }
 0xb2b   :  { %v4513_v2 = vpop.permute.xlu1 %4512 }
 0xb31   :  { %v4197_v10 = vpop.f32.mrf.mxu1 }
 0xb33   :  { %v6016_v54 = vpop.f32.mrf.mxu1 }
 0xb35   :  { %v4200_v61 = vpop.f32.mrf.mxu1 }
 0xb36   :  { %v4487_v17 = vpack.c.bf16 %v4200_v61, %v4197_v10  ;;  %v4244_v43 = vpop.f32.mrf.mxu0  ;;  %v4571_v10 = vsel %vm620_vm2, %v8381_v23, %v4505_v55  ;;  %v6168_v23 = vld [vmem:[#allocation11 + $0x20] ss:$8 sps:$4 sm:$0xff]  }
 0xb37   :  { %v6017_v52 = vpop.f32.mrf.mxu1  ;;  %v4594_v54 = vsel %vm4590_vm4, %v4571_v10, %v4529_v11  ;;  %v6161_v11 = vld [vmem:[#allocation11 + $0x54] ss:$8 sps:$4 sm:$0xff]  }
 0xb38   :  { %v6022_v15 = vpop.f32.mrf.mxu0  ;;  %4552 = vrot.lane.b32.xlu1 %v4487_v17, %s6639_s3  ;;  %v8382_v52 = vld [vmem:[#allocation27_spill] sm:$0xff]  ;;  %v6173_v10 = vld [vmem:[#allocation11 + $0x14] ss:$8 sps:$4 sm:$0xff]  }
 0xb39   :  { %v8383_v15 = vld [vmem:[#allocation26_spill] sm:$0xff] }
 0xb3a   :  { %v4247_v31 = vpop.f32.mrf.mxu0  ;;  %v4291_v49 = vpop.f32.mrf.mxu1 }
 0xb3b   :  { %v4488_v3 = vpack.c.bf16 %v4247_v31, %v4244_v43  ;;  %v8384_v31 = vpack.c.bf16 %v8382_v52, %v8383_v15 }
 0xb3c   :  { %v6023_v30 = vpop.f32.mrf.mxu0  ;;  %v6028_v22 = vpop.f32.mrf.mxu1  ;;  %4536 = vrot.lane.b32.xlu1 %v8367_v25, %s6625_s26 }
 0xb3d   :  { %4554 = vrot.lane.b32.xlu0 %v4488_v3, %s6639_s3 }
 0xb3e   :  { %v4294_v57 = vpop.f32.mrf.mxu1  ;;  %v4338_v56 = vpop.f32.mrf.mxu0 }
 0xb3f   :  { %v4489_v53 = vpack.c.bf16 %v4294_v57, %v4291_v49  ;;  %v4574_v49 = vsel %vm620_vm2, %v8384_v31, %v4507_v32  ;;  %v8385_v57 = vld [vmem:[#allocation29_spill] sm:$0xff]  ;;  %v8398_v32 = vld [vmem:[#allocation34_spill] sm:$0xff] }
 0xb40   :  { %v6029_v39 = vpop.f32.mrf.mxu1  ;;  %v6034_v1 = vpop.f32.mrf.mxu0  ;;  %v4596_v30 = vsel %vm4590_vm4, %v4574_v49, %v4531_v46 }
 0xb41   :  { %4514 = vrot.lane.b32.xlu0 %v8370_v63, %s6640_s27  ;;  %4556 = vrot.lane.b32.xlu1 %v4489_v53, %s6639_s3 }
 0xb42   :  { %v4341_v38 = vpop.f32.mrf.mxu0  ;;  %v4385_v7 = vpop.f32.mrf.mxu1 }
 0xb43   :  { %v4490_v24 = vpack.c.bf16 %v4341_v38, %v4338_v56  ;;  %v8386_v56 = vld [vmem:[#allocation28_spill] sm:$0xff]  ;;  %v8388_v38 = vld [vmem:[#allocation31_spill] sm:$0xff] }
 0xb44   :  { %v6035_v47 = vpop.f32.mrf.mxu0  ;;  %v6040_v6 = vpop.f32.mrf.mxu1  ;;  %v8387_v53 = vpack.c.bf16 %v8385_v57, %v8386_v56 }
 0xb45   :  { %4558 = vrot.lane.b32.xlu0 %v4490_v24, %s6639_s3  ;;  %4516 = vrot.lane.b32.xlu1 %v8373_v62, %s6640_s27  ;;  %v8391_v62 = vld [vmem:[#allocation37_spill] sm:$0xff] }
 0xb46   :  { %v4388_v5 = vpop.f32.mrf.mxu1  ;;  %v4432_v4 = vpop.f32.mrf.mxu0  ;;  %v4577_v39 = vsel %vm620_vm2, %v8387_v53, %v4509_v0  ;;  %v6164_v0 = vld [vmem:[#allocation11 + $0x44] ss:$8 sps:$4 sm:$0xff]  }
 0xb47   :  { %v4491_v45 = vpack.c.bf16 %v4388_v5, %v4385_v7  ;;  %v4598_v1 = vsel %vm4590_vm4, %v4577_v39, %v4533_v12  ;;  %v8389_v7 = vld [vmem:[#allocation30_spill] sm:$0xff]  ;;  %v8392_v5 = vld [vmem:[#allocation36_spill] sm:$0xff] }
 0xb48   :  { %v6041_v34 = vpop.f32.mrf.mxu1  ;;  %v6046_v27 = vpop.f32.mrf.mxu0  ;;  %v8390_v24 = vpack.c.bf16 %v8388_v38, %v8389_v7  ;;  %v6162_v12 = vld [vmem:[#allocation11 + $0x40] ss:$8 sps:$4 sm:$0xff]  }
 0xb49   :  { %4538 = vrot.lane.b32.xlu0 %v8374_v29, %s6625_s26  ;;  %4560 = vrot.lane.b32.xlu1 %v4491_v45, %s6639_s3  ;;  %v8394_v27 = vld [vmem:[#allocation33_spill] sm:$0xff]  ;;  %v8395_v29 = vld [vmem:[#allocation32_spill] sm:$0xff] }
 0xb4a   :  { %v4435_v9 = vpop.f32.mrf.mxu0  ;;  %v4580_v47 = vsel %vm620_vm2, %v8390_v24, %v4511_v58 }
 0xb4b   :  { %v4492_v35 = vpack.c.bf16 %v4435_v9, %v4432_v4  ;;  %v8393_v4 = vpack.c.bf16 %v8391_v62, %v8392_v5  ;;  %v8396_v9 = vpack.c.bf16 %v8394_v27, %v8395_v29 }
 0xb4c   :  { %v6047_v14 = vpop.f32.mrf.mxu0 }
 0xb4d   :  { %4562 = vrot.lane.b32.xlu0 %v4492_v35, %s6639_s3  ;;  %4540 = vrot.lane.b32.xlu1 %v8375_v16, %s6625_s26  ;;  %v4583_v35 = vsel %vm620_vm2, %v8396_v9, %v4513_v2  ;;  %v6167_v2 = vld [vmem:[#allocation11 + $0x34] ss:$8 sps:$4 sm:$0xff]  }
 0xb82   :  { %v4479_v42 = vpop.f32.mrf.mxu1 }
 0xb84   :  { %v6052_v37 = vpop.f32.mrf.mxu1 }
 0xb86   :  { %v4482_v26 = vpop.f32.mrf.mxu1 }
 0xb87   :  { %v4493_v8 = vpack.c.bf16 %v4482_v26, %v4479_v42  ;;  %v8397_v42 = vld [vmem:[#allocation35_spill] sm:$0xff] }
 0xb88   :  { %v6053_v60 = vpop.f32.mrf.mxu1  ;;  %v8399_v37 = vpack.c.bf16 %v8397_v42, %v8398_v32 }
 0xb89   :  { %4564 = vrot.lane.b32.xlu1 %v4493_v8, %s6639_s3 }
 0xb93   :  { %v4551_v51 = vpop.permute.xlu0 %4550 }
 0xb94   :  { %v4609_v48 = vsel %vm4607_vm5, %v4592_v44, %v4551_v51  ;;  %v6158_v44 = vld [vmem:[#allocation11 + $0x64] ss:$8 sps:$4 sm:$0xff]   ;;  %v6156_v51 = vld [vmem:[#allocation11 + $0x60] ss:$8 sps:$4 sm:$0xff]  }
 0xb95   :  { %6070 = vmatprep.mubr.bf16.mxu0 %v4609_v48  ;;  %5030 = vmatprep.subr.bf16.mxu1 %v6158_v44  ;;  %v6159_v48 = vld [vmem:[#allocation11 + $0x50] ss:$8 sps:$4 sm:$0xff]  }
 0xb96   :  { %5031 = vmatpush1.bf16.msra.mxu1 %v6156_v51 }
 0xb97   :  { %v4535_v17 = vpop.permute.xlu0 %4534  ;;  %5032 = vmatprep.subr.bf16.mxu1 %v6161_v11 }
 0xb98   :  { %v4600_v6 = vsel %vm4590_vm4, %v4580_v47, %v4535_v17  ;;  %v6174_v17 = vld [vmem:[#allocation11] ss:$8 sps:$4 sm:$0xff]  }
 0xb9a   :  { %5033 = vmatpush1.bf16.msra.mxu1 %v6159_v48  ;;  %v5422_v48 = vld [vmem:[#allocation10] ss:$0 sm:$0xff] }
 0xb9b   :  { %5034 = vmatprep.subr.bf16.mxu1 %v6164_v0 }
 0xb9e   :  { %5035 = vmatpush1.bf16.msra.mxu1 %v6162_v12 }
 0xb9f   :  { %5036 = vmatprep.subr.bf16.mxu1 %v6167_v2 }
 0xba2   :  { %5037 = vmatpush1.bf16.msra.mxu1 %v6165_v20 }
 0xba3   :  { %5038 = vmatprep.subr.bf16.mxu1 %v6170_v13 }
 0xba6   :  { %5039 = vmatpush1.bf16.msra.mxu1 %v6168_v23 }
 0xba7   :  { %5040 = vmatprep.subr.bf16.mxu1 %v6173_v10 }
 0xbaa   :  { %v4553_v61 = vpop.permute.xlu1 %4552 }
 0xbab   :  { %v4612_v43 = vsel %vm4607_vm5, %v4594_v54, %v4553_v61  ;;  %v6171_v54 = vld [vmem:[#allocation11 + $0x10] ss:$8 sps:$4 sm:$0xff]   ;;  %v6176_v61 = vld [vmem:[#allocation11 + $0x4] ss:$8 sps:$4 sm:$0xff]  }
 0xbac   :  { %6071 = vmatmul.mubr.bf16.vlgmr.msra.gmra.mxu0 %v4612_v43  ;;  %5041 = vmatpush1.bf16.msra.mxu1 %v6171_v54 }
 0xbad   :  { %5042 = vmatprep.subr.bf16.mxu1 %v6176_v61 }
 0xbae   :  { %v4537_v3 = vpop.permute.xlu1 %4536 }
 0xbaf   :  { %v4555_v22 = vpop.permute.xlu0 %4554  ;;  %v4602_v14 = vsel %vm4590_vm4, %v4583_v35, %v4537_v3 }
 0xbb0   :  { %v4615_v25 = vsel %vm4607_vm5, %v4596_v30, %v4555_v22  ;;  %5043 = vmatpush1.bf16.msra.mxu1 %v6174_v17 }
 0xbb1   :  { %6074 = vmatprep.mubr.bf16.mxu0 %v4615_v25 }
 0xbb3   :  { %v4515_v50 = vpop.permute.xlu0 %4514  ;;  %v4557_v36 = vpop.permute.xlu1 %4556 }
 0xbb4   :  { %v4618_v63 = vsel %vm4607_vm5, %v4598_v1, %v4557_v36  ;;  %v4586_v26 = vsel %vm620_vm2, %v8399_v37, %v4515_v50 }
 0xbb5   :  { %6075 = vmatmul.mubr.bf16.gmra.mxu0 %v4618_v63 }
 0xbb7   :  { %v4559_v18 = vpop.permute.xlu0 %4558  ;;  %v4517_v59 = vpop.permute.xlu1 %4516 }
 0xbb8   :  { %v4589_v45 = vsel %vm620_vm2, %v8393_v4, %v4517_v59  ;;  %v4621_v34 = vsel %vm4607_vm5, %v4600_v6, %v4559_v18 }
 0xbb9   :  { %6078 = vmatprep.mubr.bf16.mxu0 %v4621_v34 }
 0xbbb   :  { %v4539_v16 = vpop.permute.xlu0 %4538  ;;  %v4561_v19 = vpop.permute.xlu1 %4560 }
 0xbbc   :  { %v4624_v40 = vsel %vm4607_vm5, %v4602_v14, %v4561_v19  ;;  %v4604_v8 = vsel %vm4590_vm4, %v4586_v26, %v4539_v16 }
 0xbbd   :  { %6079 = vmatmul.mubr.bf16.gmra.mxu0 %v4624_v40 }
 0xbbf   :  { %v4563_v60 = vpop.permute.xlu0 %4562  ;;  %v4541_v55 = vpop.permute.xlu1 %4540 }
 0xbc0   :  { %v4627_v46 = vsel %vm4607_vm5, %v4604_v8, %v4563_v60  ;;  %v4606_v58 = vsel %vm4590_vm4, %v4589_v45, %v4541_v55 }
 0xbc1   :  { %6082 = vmatprep.mubr.bf16.mxu0 %v4627_v46 }
 0xbfb   :  { %v4565_v28 = vpop.permute.xlu1 %4564 }
 0xbfc   :  { %v4630_v21 = vsel %vm4607_vm5, %v4606_v58, %v4565_v28 }
 0xbfd   :  { %6083 = vmatmul.mubr.bf16.gmra.mxu0 %v4630_v21 }
 0xc6c   :  { %v6072_v43 = vpop.f32.mrf.mxu0 }
 0xc6e   :  { %v4730_v52 = vpop.f32.mrf.mxu0 }
 0xc70   :  { %v6073_v15 = vpop.f32.mrf.mxu0 }
 0xc71   :  { %v4800_v53 = vadd.f32 %v6073_v15, %v6072_v43 }
 0xc72   :  { %v4733_v31 = vpop.f32.mrf.mxu0 }
 0xc73   :  { %v4801_v50 = vrot.slane %v4800_v53, 4  ;;  %v4793_v36 = vadd.f32 %v4733_v31, %v4730_v52 }
 0xc75   :  { %v6076_v49 = vpop.f32.mrf.mxu0  ;;  %v4802_v24 = vadd.f32 %v4801_v50, %v4800_v53  ;;  %v4794_v47 = vrot.slane %v4793_v36, 4 }
 0xc77   :  { %v4746_v3 = vpop.f32.mrf.mxu0  ;;  %v4803_v5 = vrot.slane %v4802_v24, 2  ;;  %v4795_v4 = vadd.f32 %v4794_v47, %v4793_v36 }
 0xc79   :  { %v6077_v30 = vpop.f32.mrf.mxu0  ;;  %v4804_v9 = vadd.f32 %v4803_v5, %v4802_v24  ;;  %v4796_v35 = vrot.slane %v4795_v4, 2 }
 0xc7a   :  { %v4814_v7 = vadd.f32 %v6077_v30, %v6076_v49 }
 0xc7b   :  { %v4749_v22 = vpop.f32.mrf.mxu0  ;;  %v4805_v42 = vrot.slane %v4804_v9, 1  ;;  %v4797_v32 = vadd.f32 %v4796_v35, %v4795_v4 }
 0xc7c   :  { %v4807_v39 = vadd.f32 %v4749_v22, %v4746_v3  ;;  %v4815_v59 = vrot.slane %v4814_v7, 4 }
 0xc7d   :  { %v6080_v25 = vpop.f32.mrf.mxu0  ;;  %v4806_v46 = vadd.f32 %v4805_v42, %v4804_v9  ;;  %v4798_v55 = vrot.slane %v4797_v32, 1 }
 0xc7e   :  { %v4808_v63 = vrot.slane %v4807_v39, 4  ;;  %v4816_v27 = vadd.f32 %v4815_v59, %v4814_v7 }
 0xc7f   :  { %v4762_v57 = vpop.f32.mrf.mxu0  ;;  %v4851_v44 = vmul.f32 0.0625, %v4806_v46  ;;  %v4799_v51 = vadd.f32 %v4798_v55, %v4797_v32 }
 0xc80   :  { %v4809_v6 = vadd.f32 %v4808_v63, %v4807_v39  ;;  %v4817_v19 = vrot.slane %v4816_v27, 2 }
 0xc81   :  { %v6081_v56 = vpop.f32.mrf.mxu0  ;;  %v4866_v10 = vadd.f32 %v5422_v48, %v4851_v44  ;;  %v4850_v54 = vmul.f32 0.0625, %v4799_v51 }
 0xc82   :  { %v4828_v62 = vadd.f32 %v6081_v56, %v6080_v25  ;;  %v4810_v45 = vrot.slane %v4809_v6, 2  ;;  %v4818_v8 = vadd.f32 %v4817_v19, %v4816_v27 }
 0xc83   :  { %v4765_v1 = vpop.f32.mrf.mxu0  ;;  %v4874_v22 = vpack.c.bf16 %v4866_v10, %v4866_v10  ;;  %v4865_v25 = vadd.f32 %v5422_v48, %v4850_v54 }
 0xc84   :  { %v4821_v38 = vadd.f32 %v4765_v1, %v4762_v57  ;;  %v4829_v29 = vrot.slane %v4828_v62, 4  ;;  %v4811_v14 = vadd.f32 %v4810_v45, %v4809_v6  ;;  %v4819_v21 = vrot.slane %v4818_v8, 1 }
 0xc85   :  { %v4873_v7 = vpack.c.bf16 %v4865_v25, %v4865_v25 }
 0xc86   :  { %v4822_v18 = vrot.slane %v4821_v38, 4  ;;  %v4830_v40 = vadd.f32 %v4829_v29, %v4828_v62  ;;  %v4812_v37 = vrot.slane %v4811_v14, 1  ;;  %v4820_v2 = vadd.f32 %v4819_v21, %v4818_v8 }
 0xc88   :  { %v4823_v34 = vadd.f32 %v4822_v18, %v4821_v38  ;;  %v4831_v60 = vrot.slane %v4830_v40, 2  ;;  %v4813_v58 = vadd.f32 %v4812_v37, %v4811_v14  ;;  %v4853_v31 = vmul.f32 0.0625, %v4820_v2 }
 0xc89   :  { %v4918_v38 = vunpack.c.l.b16 %v4874_v22 }
 0xc8a   :  { %v4824_v16 = vrot.slane %v4823_v34, 2  ;;  %v4832_v41 = vadd.f32 %v4831_v60, %v4830_v40  ;;  %v4852_v0 = vmul.f32 0.0625, %v4813_v58  ;;  %v4868_v1 = vadd.f32 %v5422_v48, %v4853_v31 }
 0xc8b   :  { %v4925_v45 = vrot.slane %v4918_v38, 7  ;;  %v6183_v38 = vld [vmem:[#allocation13 + $0x60] sm:$0xff]  }
 0xc8c   :  { %v4825_v26 = vadd.f32 %v4824_v16, %v4823_v34  ;;  %v4833_v20 = vrot.slane %v4832_v41, 1  ;;  %v4867_v17 = vadd.f32 %v5422_v48, %v4852_v0  ;;  %v4876_v59 = vpack.c.bf16 %v4868_v1, %v4868_v1  ;;  %v6179_v1 = vld [vmem:[#allocation13 + $0x70] sm:$0xff]  }
 0xc8d   :  { %v4917_v34 = vunpack.c.l.b16 %v4873_v7  ;;  %v6184_v7 = vld [vmem:[#allocation13 + $0x20] sm:$0xff]  }
 0xc8e   :  { %v4826_v28 = vrot.slane %v4825_v26, 1  ;;  %v4834_v49 = vadd.f32 %v4833_v20, %v4832_v41  ;;  %v4875_v57 = vpack.c.bf16 %v4867_v17, %v4867_v17  ;;  %v4920_v14 = vunpack.c.l.b16 %v4876_v59  ;;  %v8400_v20 = vld [vmem:[#allocation21_spill] sm:$0xff]  ;;  %v6189_v59 = vld [vmem:[#allocation13 + $0x48] sm:$0xff]  }
 0xc8f   :  { %v4927_v42 = vsel %vm4926_vm6, %v4925_v45, %v4917_v34 }
 0xc90   :  { %v4827_v12 = vadd.f32 %v4826_v28, %v4825_v26  ;;  %v4855_v50 = vmul.f32 0.0625, %v4834_v49  ;;  %v4919_v24 = vunpack.c.l.b16 %v4875_v57  ;;  %v4931_v60 = vrot.slane %v4920_v14, 5  ;;  %v6177_v49 = vld [vmem:[#allocation13 + $0x78] sm:$0xff]  }
 0xc91   :  { %5616 = vmatprep.subr.bf16.mxu0 %v6177_v49 }
 0xc92   :  { %v4854_v43 = vmul.f32 0.0625, %v4827_v12  ;;  %v4870_v62 = vadd.f32 %v5422_v48, %v4855_v50  ;;  %v4928_v27 = vrot.slane %v4919_v24, 6  ;;  %v6180_v50 = vld [vmem:[#allocation13 + $0x30] sm:$0xff]   ;;  %v6185_v24 = vld [vmem:[#allocation13 + $0x58] sm:$0xff]  }
 0xc94   :  { %v4869_v56 = vadd.f32 %v5422_v48, %v4854_v43  ;;  %v4878_v16 = vpack.c.bf16 %v4870_v62, %v4870_v62  ;;  %v4930_v32 = vsel %vm4929_vm7, %v4928_v27, %v4927_v42  ;;  %v6190_v62 = vld [vmem:[#allocation13 + $0x8] sm:$0xff]  }
 0xc95   :  { %v4933_v58 = vsel %vm4932_vm8, %v4931_v60, %v4930_v32 }
 0xc96   :  { %v4877_v47 = vpack.c.bf16 %v4869_v56, %v4869_v56  ;;  %v4922_v46 = vunpack.c.l.b16 %v4878_v16 }
 0xc98   :  { %v4921_v29 = vunpack.c.l.b16 %v4877_v47  ;;  %v6186_v47 = vld [vmem:[#allocation13 + $0x18] sm:$0xff]  }
 0xc9a   :  { %v4934_v37 = vrot.slane %v4921_v29, 4  ;;  %v5086_v29 = vld [vmem:[%s8296_s8] sm:$0x3] }
 0xc9c   :  { %v4936_v21 = vsel %vm4935_vm9, %v4934_v37, %v4933_v58 }
 0xcbd   :  { %v6084_v33 = vpop.f32.mrf.mxu0 }
 0xcbf   :  { %v4778_v11 = vpop.f32.mrf.mxu0 }
 0xcc1   :  { %v6085_v13 = vpop.f32.mrf.mxu0 }
 0xcc2   :  { %v4842_v23 = vadd.f32 %v6085_v13, %v6084_v33  ;;  %v4937_v33 = vrot.slane %v4922_v46, 3 }
 0xcc3   :  { %v4781_v61 = vpop.f32.mrf.mxu0 }
 0xcc4   :  { %v4843_v52 = vrot.slane %v4842_v23, 4  ;;  %v4835_v15 = vadd.f32 %v4781_v61, %v4778_v11  ;;  %v4939_v11 = vsel %vm4938_vm10, %v4937_v33, %v4936_v21 }
 0xcc6   :  { %v4844_v3 = vadd.f32 %v4843_v52, %v4842_v23  ;;  %v4836_v30 = vrot.slane %v4835_v15, 4  ;;  %v8401_v23 = vld [vmem:[#allocation20_spill] sm:$0xff] }
 0xcc7   :  { %v5095_v14 = vrot.slane %v5086_v29, %v8401_v23 }
 0xcc8   :  { %v4845_v53 = vrot.slane %v4844_v3, 2  ;;  %v4837_v39 = vadd.f32 %v4836_v30, %v4835_v15 }
 0xcca   :  { %v4846_v36 = vadd.f32 %v4845_v53, %v4844_v3  ;;  %v4838_v63 = vrot.slane %v4837_v39, 2  ;;  %v6178_v3 = vld [vmem:[#allocation13 + $0x38] sm:$0xff]  }
 0xccb   :  { %5617 = vmatpush3.bf16.msra.mxu0 %v6178_v3 }
 0xccc   :  { %v4847_v6 = vrot.slane %v4846_v36, 1  ;;  %v4839_v18 = vadd.f32 %v4838_v63, %v4837_v39  ;;  %5618 = vmatprep.subr.bf16.mxu0 %v6179_v1  ;;  %v6182_v63 = vld [vmem:[#allocation13 + $0x28] sm:$0xff]  }
 0xcce   :  { %v4848_v5 = vadd.f32 %v4847_v6, %v4846_v36  ;;  %v4840_v4 = vrot.slane %v4839_v18, 1  ;;  %v6181_v36 = vld [vmem:[#allocation13 + $0x68] sm:$0xff]   ;;  %v6187_v6 = vld [vmem:[#allocation13 + $0x50] sm:$0xff]  }
 0xccf   :  { %5619 = vmatpush3.bf16.msra.mxu0 %v6180_v50 }
 0xcd0   :  { %v4857_v9 = vmul.f32 0.0625, %v4848_v5  ;;  %v4841_v35 = vadd.f32 %v4840_v4, %v4839_v18  ;;  %5620 = vmatprep.subr.bf16.mxu0 %v6181_v36  ;;  %v6188_v18 = vld [vmem:[#allocation13 + $0x10] sm:$0xff]   ;;  %v6191_v5 = vld [vmem:[#allocation13 + $0x40] sm:$0xff]  }
 0xcd1   :  { %v6192_v4 = vld [vmem:[#allocation13] sm:$0xff]  }
 0xcd2   :  { %v4872_v19 = vadd.f32 %v5422_v48, %v4857_v9  ;;  %v4856_v40 = vmul.f32 0.0625, %v4841_v35  ;;  %v5100_v9 = vld [vmem:[%s8297_s9] sm:$0x3]  ;;  %v5091_v35 = vrot.slane %v5086_v29, %v8400_v20 }
 0xcd3   :  { %5621 = vmatpush3.bf16.msra.mxu0 %v6182_v63  ;;  %v5105_v42 = vrot.slane %v5100_v9, %v8400_v20  ;;  %v5109_v32 = vrot.slane %v5100_v9, %v8401_v23 }
 0xcd4   :  { %v4880_v26 = vpack.c.bf16 %v4872_v19, %v4872_v19  ;;  %v4871_v8 = vadd.f32 %v5422_v48, %v4856_v40  ;;  %v4897_v48 = vld [vmem:[%s8295_s7] sm:$0x3]  ;;  %5622 = vmatprep.subr.bf16.mxu0 %v6183_v38 }
 0xcd5   :  { %v4902_v13 = vrot.slane %v4897_v48, %v8400_v20  ;;  %v4906_v10 = vrot.slane %v4897_v48, %v8401_v23 }
 0xcd6   :  { %v4879_v55 = vpack.c.bf16 %v4871_v8, %v4871_v8  ;;  %v4924_v28 = vunpack.c.l.b16 %v4880_v26 }
 0xcd7   :  { %5623 = vmatpush3.bf16.msra.mxu0 %v6184_v7 }
 0xcd8   :  { %v4923_v41 = vunpack.c.l.b16 %v4879_v55  ;;  %v4943_v51 = vrot.slane %v4924_v28, 1  ;;  %5624 = vmatprep.subr.bf16.mxu0 %v6185_v24 }
 0xcda   :  { %v4940_v44 = vrot.slane %v4923_v41, 2  ;;  %v5439_v41 = vld [vmem:[%s8299_s11] ss:$0 sm:$0xff] }
 0xcdb   :  { %5625 = vmatpush3.bf16.msra.mxu0 %v6186_v47 }
 0xcdc   :  { %v4942_v0 = vsel %vm4941_vm11, %v4940_v44, %v4939_v11  ;;  %5626 = vmatprep.subr.bf16.mxu0 %v6187_v6 }
 0xcdd   :  { %v4945_v12 = vsel %vm4944_vm12, %v4943_v51, %v4942_v0 }
 0xcde   :  { %v4946_v2 = vpack.c.b16 %v4945_v12, %v4945_v12 }
 0xcdf   :  { %5627 = vmatpush3.bf16.msra.mxu0 %v6188_v18 }
 0xce0   :  { %5061 = vmatmul.mubr.bf16.vlgmr.msra.gmra.mxu1 %v4946_v2  ;;  %5628 = vmatprep.subr.bf16.mxu0 %v6189_v59 }
 0xce3   :  { %5629 = vmatpush3.bf16.msra.mxu0 %v6190_v62 }
 0xce4   :  { %5630 = vmatprep.subr.bf16.mxu0 %v6191_v5 }
 0xce7   :  { %5631 = vmatpush3.bf16.msra.mxu0 %v6192_v4 }
 0xda0   :  { %v5062_v54 = vpop.f32.mrf.mxu1 }
 0xda1   :  { %v5063_v17 = vadd.f32 %v5062_v54, %v4902_v13 }
 0xda2   :  { %v5064_v61 = vpop.f32.mrf.mxu1 }
 0xda3   :  { %v5065_v43 = vadd.f32 %v5064_v61, %v4906_v10 }
 0xda4   :  { %v5066_v52 = vpop.f32.mrf.mxu1 }
 0xda5   :  { %v5069_v15 = vadd.f32 %v5065_v43, %v5063_v17 }
 0xda6   :  { %v5067_v31 = vpop.f32.mrf.mxu1 }
 0xda7   :  { %5070 = vadd.xlane.f32.xlu0 %v5069_v15 }
 0xe30   :  { %v5071_v30 = vpop.xlane.xlu0 %5070 }
 0xe31   :  { %v5073_v22 = vmul.f32 0.00390625, %v5071_v30 }
 0xe33   :  { %v5074_v25 = vsub.f32 %v5063_v17, %v5073_v22  ;;  %v5075_v57 = vsub.f32 %v5065_v43, %v5073_v22 }
 0xe35   :  { %v5076_v56 = vmul.f32 %v5074_v25, %v5074_v25  ;;  %v5077_v53 = vmul.f32 %v5075_v57, %v5075_v57 }
 0xe37   :  { %v5078_v39 = vadd.f32 %v5077_v53, %v5076_v56 }
 0xe39   :  { %5079 = vadd.xlane.f32.xlu1 %v5078_v39 }
 0xec2   :  { %v5080_v45 = vpop.xlane.xlu1 %5079 }
 0xec3   :  { %v5081_v34 = vmul.f32 0.00390625, %v5080_v45 }
 0xec5   :  { %v5082_v27 = vadd.f32 1e-05, %v5081_v34 }
 0xec7   :  { %6449 = vrsqrt.f32 %v5082_v27 }
 0xed4   :  { %v6450_v16 = vpop.eup %6449 }
 0xed5   :  { %v5084_v19 = vmul.f32 %v6450_v16, %v5074_v25  ;;  %v5085_v40 = vmul.f32 %v6450_v16, %v5075_v57 }
 0xed7   :  { %v5098_v37 = vmul.f32 %v5091_v35, %v5084_v19  ;;  %v5099_v26 = vmul.f32 %v5095_v14, %v5085_v40 }
 0xed9   :  { %v5112_v8 = vadd.f32 %v5105_v42, %v5098_v37  ;;  %v5113_v60 = vadd.f32 %v5109_v32, %v5099_v26 }
 0xedb   :  { %v5114_v46 = vmax.f32 %v5112_v8, 0.0  ;;  %v5115_v55 = vmax.f32 %v5113_v60, 0.0 }
 0xedd   :  { %v5116_v58 = vpack.c.bf16 %v5114_v46, %v5114_v46  ;;  %v5117_v28 = vpack.c.bf16 %v5115_v55, %v5115_v55 }
 0xedf   :  { %5285 = vmatprep.mubr.bf16.mxu0 %v5117_v28 }
 0xee0   :  { %5286 = vmatmul.mubr.bf16.vlgmr.msra.gmra.mxu0 %v5116_v58 }
 0xfa0   :  { %v5632_v21 = vpop.f32.mrf.mxu0 }
 0xfa2   :  { %v5633_v33 = vpop.f32.mrf.mxu0 }
 0xfa3   :  { %v5634_v44 = vadd.f32 %v5633_v33, %v5632_v21 }
 0xfa4   :  { %v5635_v51 = vpop.f32.mrf.mxu0 }
 0xfa5   :  { %v5288_v11 = vadd.f32 %v5634_v44, %v5439_v41 }
 0xfa6   :  { %v5636_v0 = vpop.f32.mrf.mxu0 }
 0xfa7   :  { %v5293_v12 = vmul.f32 %v5288_v11, %v5288_v11 }
 0xfa9   :  { %5294 = vadd.xlane.f32.xlu0 %v5293_v12 }
0x1032   :  { %v5295_v2 = vpop.xlane.xlu0 %5294 }
0x1033   :  { %v5296_v48 = vmax.f32 %v5295_v2, 1e-24 }
0x1035   :  { %6451 = vrsqrt.f32 %v5296_v48 }
0x1042   :  { %v6452_v20 = vpop.eup %6451 }
0x1043   :  { %v5298_v13 = vmul.f32 %v6452_v20, %v5288_v11 }
0x1045   :  { %5299 = vst [vmem:[#allocation14] sm:$0xff] %v5298_v13 }
0x1046   :  { %6604 = shalt.err (!%p6601_p11)
}
0x1047   :  { %5309 = dma.vmem_to_hbm [thread:$0]  %s5307_s6, 128, %s8300_s12, [#allocation4]  }
0x1048   :  { %6621 = dma.done.wait [#allocation4], 128  }
0x1049   :  { %6622 = vsyncadd [#allocation4], 4294967168 }
0x104a   :  { %5313 = vsyncpa [#allocation3], 1 }
0x104b   :  { %5314 = vsyncpa [#allocation6], 1 }
0x104c   :  { %5315 = vsyncpa [#allocation9], 1 }
0x104d   :  { %5316 = vsyncpa [#allocation12], 1 }
0x104e   :  { %5317 = vsyncpa [#allocation4], 1 }

</bundles_post_ra>
